<compile_context>
chip_gen: v5e
topology: v5e:2x2
jax: 0.10.0
libtpu: 0.0.40
codegen_flags: <defaults>
</compile_context>

<pallas_src>
from functools import partial

import jax
import jax.numpy as jnp
from jax.experimental import pallas as pl
from jax.experimental.pallas import tpu as pltpu


def _cdilated_kernel(x_ref, w_ref, b_ref, o_ref, xp_ref, patch_ref, *,
                     k, d, stride, pad, H, W, Ho, Wo, tap_group):
    """One batch-chunk per grid step.

    x_ref:     (bt, Cin, H, W)       unpadded input chunk (NCHW)
    w_ref:     (Cout, k*k*Cin)       weights, tap-major: row = (kh*k+kw)*Cin + ci
    b_ref:     (Cout, 1)             bias (broadcast along the lane axis)
    o_ref:     (bt, Cout, Ho*Wo)     output, NCHW-flat (lane-dense Ho*Wo)
    xp_ref:    (bt, Cin, Hp, Wp)     VMEM scratch: zero-padded input
    patch_ref: (k*k*Cin, bt*Ho*Wo)   VMEM scratch: im2col patch matrix
    """
    bt, Cin = x_ref.shape[0], x_ref.shape[1]
    L = Ho * Wo

    # ---- in-kernel zero padding (replaces the wrapper jnp.pad HBM round trip) ----
    if pad > 0:
        xp_ref[...] = jnp.zeros_like(xp_ref)
    xp_ref[:, :, pad:pad + H, pad:pad + W] = x_ref[...]

    # ---- im2col into VMEM patch matrix, one sublane-aligned slab at a time -------
    taps = [(kh, kw) for kh in range(k) for kw in range(k)]
    for b in range(bt):
        c0 = b * L
        if stride != 1:
            # TODO(synk): for stride>1 hoist a single column deinterleave instead of
            # per-tap lane-strided slices (cheaper on the XLU).
            xb = xp_ref[b]  # (Cin, Hp, Wp) value; strided value-slices below
        for g0 in range(0, k * k, tap_group):
            grp = taps[g0:g0 + tap_group]
            slabs = []
            for kh, kw in grp:
                h0, w0 = kh * d, kw * d
                if stride == 1:
                    tap = xp_ref[b, :, h0:h0 + Ho, w0:w0 + Wo]
                else:
                    tap = xb[:, h0:h0 + (Ho - 1) * stride + 1:stride,
                                w0:w0 + (Wo - 1) * stride + 1:stride]
                slabs.append(tap.reshape(Cin, L))
            slab = slabs[0] if len(slabs) == 1 else jnp.concatenate(slabs, axis=0)
            r0 = g0 * Cin
            patch_ref[r0:r0 + slab.shape[0], c0:c0 + L] = slab

    # ---- one wide MXU matmul: (Cout, KK) @ (KK, bt*L) -> (Cout, bt*L), f32 acc ---
    acc = jnp.dot(w_ref[...], patch_ref[...], preferred_element_type=jnp.float32)
    acc = acc + b_ref[...]  # bias broadcast over the lane axis

    # ---- scatter back per image (lane-aligned slices when L % 128 == 0) ----------
    for b in range(bt):
        o_ref[b, :, :] = acc[:, b * L:(b + 1) * L].astype(o_ref.dtype)


def prepare_cdilated_params(weight_oihw, bias):
    """Repack Conv2d parameters once (hoisted out of the per-call path).

    weight: (Cout, Cin, k, k) OIHW -> (Cout, k*k*Cin), tap-major then channel,
            matching the in-kernel patch-row ordering (kh*k+kw)*Cin + ci.
    bias:   (Cout,) -> (Cout, 1) for lane-axis broadcast (kept f32; acc is f32).
    """
    Cout, Cin, k, _ = weight_oihw.shape
    w2 = jnp.transpose(weight_oihw, (0, 2, 3, 1)).reshape(Cout, k * k * Cin)
    b2 = bias.reshape(Cout, 1).astype(jnp.float32)
    return w2, b2


def _tensorcores_per_chip():
    try:
        kind = jax.devices()[0].device_kind.lower()
        if "v7" in kind:  # v7x: 2 TensorCores per chip; v5e/v6e: 1
            return 2
    except Exception:
        pass
    return 1


def cdilated_apply(x_nchw, w2, b2, *, kSize, stride=1, d=1, batch_tile=None):
    """Apply CDilated with pre-packed params (see prepare_cdilated_params)."""
    N, Cin, H, W = x_nchw.shape
    Cout = w2.shape[0]
    KK = kSize * kSize * Cin
    pad = ((kSize - 1) // 2) * d
    Ho = (H + 2 * pad - d * (kSize - 1) - 1) // stride + 1
    Wo = (W + 2 * pad - d * (kSize - 1) - 1) // stride + 1
    Hp, Wp = H + 2 * pad, W + 2 * pad
    L = Ho * Wo

    # Grid sized to the TensorCore count, not the batch: each step processes a
    # batch chunk folded into the matmul lane axis (one wide lane-dense matmul).
    if batch_tile is None:
        cores = _tensorcores_per_chip()
        batch_tile = N // cores if (cores > 1 and N % cores == 0) else N
    assert N % batch_tile == 0, (N, batch_tile)
    bt = batch_tile
    steps = N // bt

    # Smallest tap group whose row count (group*Cin) is a multiple of 8 sublanes,
    # so patch-matrix stores are unmasked on the sublane axis.
    tap_group = next((g for g in range(1, kSize * kSize + 1) if (g * Cin) % 8 == 0),
                     kSize * kSize)

    kernel = partial(_cdilated_kernel, k=kSize, d=d, stride=stride, pad=pad,
                     H=H, W=W, Ho=Ho, Wo=Wo, tap_group=tap_group)

    out = pl.pallas_call(
        kernel,
        out_shape=jax.ShapeDtypeStruct((N, Cout, L), x_nchw.dtype),
        grid=(steps,),
        in_specs=[
            pl.BlockSpec((bt, Cin, H, W), lambda n: (n, 0, 0, 0)),  # one DMA / chunk
            pl.BlockSpec((Cout, KK), lambda n: (0, 0)),
            pl.BlockSpec((Cout, 1), lambda n: (0, 0)),
        ],
        out_specs=pl.BlockSpec((bt, Cout, L), lambda n: (n, 0, 0)),
        scratch_shapes=[
            pltpu.VMEM((bt, Cin, Hp, Wp), x_nchw.dtype),  # zero-padded input
            pltpu.VMEM((KK, bt * L), x_nchw.dtype),       # im2col patch matrix
        ],
        compiler_params=pltpu.CompilerParams(
            dimension_semantics=("parallel",)),
    )(x_nchw, w2, b2)

    # NCHW-flat -> NCHW; pure reshape (metadata only), no transpose.
    return out.reshape(N, Cout, Ho, Wo)


def cdilated_forward(x_nchw, weight_oihw, bias, *, kSize, stride=1, d=1,
                     batch_tile=None):
    """Pallas implementation of CDilated.forward (nn.Conv2d, padding=((k-1)//2)*d, dilation=d)."""
    w2, b2 = prepare_cdilated_params(weight_oihw, bias)
    return cdilated_apply(x_nchw, w2, b2, kSize=kSize, stride=stride, d=d,
                          batch_tile=batch_tile)


if __name__ == "__main__":
    # Module config: CDilated(nIn=4, nOut=8, kSize=3, stride=1, d=2)
    nIn, nOut, kSize, stride, d = 4, 8, 3, 1, 2
    N, H, W = 2, 16, 16

    key = jax.random.PRNGKey(0)
    kx, kw_, kb = jax.random.split(key, 3)
    x = jax.random.normal(kx, (N, nIn, H, W), dtype=jnp.float32)
    # Deterministic synthetic parameters (Conv2d weight is OIHW, bias is (Cout,))
    weight = jax.random.normal(kw_, (nOut, nIn, kSize, kSize), dtype=jnp.float32) * 0.1
    bias = jax.random.normal(kb, (nOut,), dtype=jnp.float32) * 0.1

    # Parameter repacking hoisted out of the per-call path (done once).
    w2, b2 = prepare_cdilated_params(weight, bias)
    out = cdilated_apply(x, w2, b2, kSize=kSize, stride=stride, d=d)
    out = jax.block_until_ready(out)

    # Reference check against XLA's dilated conv (same semantics as nn.Conv2d).
    pad = ((kSize - 1) // 2) * d
    ref = jax.lax.conv_general_dilated(
        x, weight,
        window_strides=(stride, stride),
        padding=[(pad, pad), (pad, pad)],
        rhs_dilation=(d, d),
        dimension_numbers=("NCHW", "OIHW", "NCHW"),
    ) + bias.reshape(1, -1, 1, 1)

    assert out.shape == ref.shape, (out.shape, ref.shape)
    assert jnp.allclose(out, ref, atol=1e-4, rtol=1e-4), float(
        jnp.max(jnp.abs(out - ref)))

    print("KERNEL_OK")
</pallas_src>

<mosaic_0001>
module attributes {stable_mosaic.version = 11 : i64} {
  func.func @_cdilated_kernel(%arg0: i32, %arg1: memref<2x4x16x16xf32, #tpu.memory_space<vmem>>, %arg2: memref<8x36xf32, #tpu.memory_space<vmem>>, %arg3: memref<8x1xf32, #tpu.memory_space<vmem>>, %arg4: memref<2x8x256xf32, #tpu.memory_space<vmem>>, %arg5: memref<2x4x20x20xf32, #tpu.memory_space<vmem>>, %arg6: memref<36x512xf32, #tpu.memory_space<vmem>>) attributes {dimension_semantics = [#tpu.dimension_semantics<parallel>], iteration_bounds = array<i64: 1>, scalar_prefetch = 0 : i64, scratch_operands = 2 : i64, tpu.core_type = #tpu.core_type<tc>, window_params = [{transform_indices = @transform_0, window_bounds = array<i64: 2, 4, 16, 16>}, {pipeline_mode = #tpu.pipeline_mode<synchronous>, transform_indices = @transform_1, window_bounds = array<i64: 8, 36>}, {pipeline_mode = #tpu.pipeline_mode<synchronous>, transform_indices = @transform_2, window_bounds = array<i64: 8, 1>}, {transform_indices = @transform_3, window_bounds = array<i64: 2, 8, 256>}]} {
    %cst = arith.constant 0.000000e+00 : f32
    %0 = vector.broadcast %cst : f32 to vector<2x4x20x20xf32>
    %c0 = arith.constant 0 : index
    %c0_0 = arith.constant 0 : index
    %c0_1 = arith.constant 0 : index
    %c0_2 = arith.constant 0 : index
    %1 = vector.load %arg5[%c0, %c0_0, %c0_1, %c0_2] : memref<2x4x20x20xf32, #tpu.memory_space<vmem>>, vector<2x4x20x20xf32>
    tpu.vector_store %arg5[%c0, %c0_0, %c0_1, %c0_2], %0 {strides = array<i32>} : memref<2x4x20x20xf32, #tpu.memory_space<vmem>>, vector<2x4x20x20xf32>,
    %c0_3 = arith.constant 0 : index
    %c0_4 = arith.constant 0 : index
    %c0_5 = arith.constant 0 : index
    %c0_6 = arith.constant 0 : index
    %2 = vector.load %arg1[%c0_3, %c0_4, %c0_5, %c0_6] : memref<2x4x16x16xf32, #tpu.memory_space<vmem>>, vector<2x4x16x16xf32>
    %c0_7 = arith.constant 0 : index
    %c0_8 = arith.constant 0 : index
    %c2 = arith.constant 2 : index
    %c2_9 = arith.constant 2 : index
    %3 = vector.load %arg5[%c0_7, %c0_8, %c2, %c2_9] : memref<2x4x20x20xf32, #tpu.memory_space<vmem>>, vector<2x4x16x16xf32>
    tpu.vector_store %arg5[%c0_7, %c0_8, %c2, %c2_9], %2 {strides = array<i32>} : memref<2x4x20x20xf32, #tpu.memory_space<vmem>>, vector<2x4x16x16xf32>,
    %c0_10 = arith.constant 0 : index
    %c0_11 = arith.constant 0 : index
    %c0_12 = arith.constant 0 : index
    %c0_13 = arith.constant 0 : index
    %4 = vector.load %arg5[%c0_10, %c0_11, %c0_12, %c0_13] : memref<2x4x20x20xf32, #tpu.memory_space<vmem>>, vector<1x4x16x16xf32>
    %5 = vector.shape_cast %4 : vector<1x4x16x16xf32> to vector<4x16x16xf32>
    %6 = vector.shape_cast %5 : vector<4x16x16xf32> to vector<4x256xf32>
    %c0_14 = arith.constant 0 : index
    %c0_15 = arith.constant 0 : index
    %c0_16 = arith.constant 0 : index
    %c2_17 = arith.constant 2 : index
    %7 = vector.load %arg5[%c0_14, %c0_15, %c0_16, %c2_17] : memref<2x4x20x20xf32, #tpu.memory_space<vmem>>, vector<1x4x16x16xf32>
    %8 = vector.shape_cast %7 : vector<1x4x16x16xf32> to vector<4x16x16xf32>
    %9 = vector.shape_cast %8 : vector<4x16x16xf32> to vector<4x256xf32>
    %10 = tpu.concatenate %6, %9 in 0 : vector<4x256xf32>, vector<4x256xf32> -> vector<8x256xf32>
    %c0_18 = arith.constant 0 : index
    %c0_19 = arith.constant 0 : index
    %11 = vector.load %arg6[%c0_18, %c0_19] : memref<36x512xf32, #tpu.memory_space<vmem>>, vector<8x256xf32>
    tpu.vector_store %arg6[%c0_18, %c0_19], %10 {strides = array<i32>} : memref<36x512xf32, #tpu.memory_space<vmem>>, vector<8x256xf32>,
    %c0_20 = arith.constant 0 : index
    %c0_21 = arith.constant 0 : index
    %c0_22 = arith.constant 0 : index
    %c4 = arith.constant 4 : index
    %12 = vector.load %arg5[%c0_20, %c0_21, %c0_22, %c4] : memref<2x4x20x20xf32, #tpu.memory_space<vmem>>, vector<1x4x16x16xf32>
    %13 = vector.shape_cast %12 : vector<1x4x16x16xf32> to vector<4x16x16xf32>
    %14 = vector.shape_cast %13 : vector<4x16x16xf32> to vector<4x256xf32>
    %c0_23 = arith.constant 0 : index
    %c0_24 = arith.constant 0 : index
    %c2_25 = arith.constant 2 : index
    %c0_26 = arith.constant 0 : index
    %15 = vector.load %arg5[%c0_23, %c0_24, %c2_25, %c0_26] : memref<2x4x20x20xf32, #tpu.memory_space<vmem>>, vector<1x4x16x16xf32>
    %16 = vector.shape_cast %15 : vector<1x4x16x16xf32> to vector<4x16x16xf32>
    %17 = vector.shape_cast %16 : vector<4x16x16xf32> to vector<4x256xf32>
    %18 = tpu.concatenate %14, %17 in 0 : vector<4x256xf32>, vector<4x256xf32> -> vector<8x256xf32>
    %c8 = arith.constant 8 : index
    %c0_27 = arith.constant 0 : index
    %19 = vector.load %arg6[%c8, %c0_27] : memref<36x512xf32, #tpu.memory_space<vmem>>, vector<8x256xf32>
    tpu.vector_store %arg6[%c8, %c0_27], %18 {strides = array<i32>} : memref<36x512xf32, #tpu.memory_space<vmem>>, vector<8x256xf32>,
    %c0_28 = arith.constant 0 : index
    %c0_29 = arith.constant 0 : index
    %c2_30 = arith.constant 2 : index
    %c2_31 = arith.constant 2 : index
    %20 = vector.load %arg5[%c0_28, %c0_29, %c2_30, %c2_31] : memref<2x4x20x20xf32, #tpu.memory_space<vmem>>, vector<1x4x16x16xf32>
    %21 = vector.shape_cast %20 : vector<1x4x16x16xf32> to vector<4x16x16xf32>
    %22 = vector.shape_cast %21 : vector<4x16x16xf32> to vector<4x256xf32>
    %c0_32 = arith.constant 0 : index
    %c0_33 = arith.constant 0 : index
    %c2_34 = arith.constant 2 : index
    %c4_35 = arith.constant 4 : index
    %23 = vector.load %arg5[%c0_32, %c0_33, %c2_34, %c4_35] : memref<2x4x20x20xf32, #tpu.memory_space<vmem>>, vector<1x4x16x16xf32>
    %24 = vector.shape_cast %23 : vector<1x4x16x16xf32> to vector<4x16x16xf32>
    %25 = vector.shape_cast %24 : vector<4x16x16xf32> to vector<4x256xf32>
    %26 = tpu.concatenate %22, %25 in 0 : vector<4x256xf32>, vector<4x256xf32> -> vector<8x256xf32>
    %c16 = arith.constant 16 : index
    %c0_36 = arith.constant 0 : index
    %27 = vector.load %arg6[%c16, %c0_36] : memref<36x512xf32, #tpu.memory_space<vmem>>, vector<8x256xf32>
    tpu.vector_store %arg6[%c16, %c0_36], %26 {strides = array<i32>} : memref<36x512xf32, #tpu.memory_space<vmem>>, vector<8x256xf32>,
    %c0_37 = arith.constant 0 : index
    %c0_38 = arith.constant 0 : index
    %c4_39 = arith.constant 4 : index
    %c0_40 = arith.constant 0 : index
    %28 = vector.load %arg5[%c0_37, %c0_38, %c4_39, %c0_40] : memref<2x4x20x20xf32, #tpu.memory_space<vmem>>, vector<1x4x16x16xf32>
    %29 = vector.shape_cast %28 : vector<1x4x16x16xf32> to vector<4x16x16xf32>
    %30 = vector.shape_cast %29 : vector<4x16x16xf32> to vector<4x256xf32>
    %c0_41 = arith.constant 0 : index
    %c0_42 = arith.constant 0 : index
    %c4_43 = arith.constant 4 : index
    %c2_44 = arith.constant 2 : index
    %31 = vector.load %arg5[%c0_41, %c0_42, %c4_43, %c2_44] : memref<2x4x20x20xf32, #tpu.memory_space<vmem>>, vector<1x4x16x16xf32>
    %32 = vector.shape_cast %31 : vector<1x4x16x16xf32> to vector<4x16x16xf32>
    %33 = vector.shape_cast %32 : vector<4x16x16xf32> to vector<4x256xf32>
    %34 = tpu.concatenate %30, %33 in 0 : vector<4x256xf32>, vector<4x256xf32> -> vector<8x256xf32>
    %c24 = arith.constant 24 : index
    %c0_45 = arith.constant 0 : index
    %35 = vector.load %arg6[%c24, %c0_45] : memref<36x512xf32, #tpu.memory_space<vmem>>, vector<8x256xf32>
    tpu.vector_store %arg6[%c24, %c0_45], %34 {strides = array<i32>} : memref<36x512xf32, #tpu.memory_space<vmem>>, vector<8x256xf32>,
    %c0_46 = arith.constant 0 : index
    %c0_47 = arith.constant 0 : index
    %c4_48 = arith.constant 4 : index
    %c4_49 = arith.constant 4 : index
    %36 = vector.load %arg5[%c0_46, %c0_47, %c4_48, %c4_49] : memref<2x4x20x20xf32, #tpu.memory_space<vmem>>, vector<1x4x16x16xf32>
    %37 = vector.shape_cast %36 : vector<1x4x16x16xf32> to vector<4x16x16xf32>
    %38 = vector.shape_cast %37 : vector<4x16x16xf32> to vector<4x256xf32>
    %c32 = arith.constant 32 : index
    %c0_50 = arith.constant 0 : index
    %39 = vector.load %arg6[%c32, %c0_50] : memref<36x512xf32, #tpu.memory_space<vmem>>, vector<4x256xf32>
    tpu.vector_store %arg6[%c32, %c0_50], %38 {strides = array<i32>} : memref<36x512xf32, #tpu.memory_space<vmem>>, vector<4x256xf32>,
    %c1 = arith.constant 1 : index
    %c0_51 = arith.constant 0 : index
    %c0_52 = arith.constant 0 : index
    %c0_53 = arith.constant 0 : index
    %40 = vector.load %arg5[%c1, %c0_51, %c0_52, %c0_53] : memref<2x4x20x20xf32, #tpu.memory_space<vmem>>, vector<1x4x16x16xf32>
    %41 = vector.shape_cast %40 : vector<1x4x16x16xf32> to vector<4x16x16xf32>
    %42 = vector.shape_cast %41 : vector<4x16x16xf32> to vector<4x256xf32>
    %c1_54 = arith.constant 1 : index
    %c0_55 = arith.constant 0 : index
    %c0_56 = arith.constant 0 : index
    %c2_57 = arith.constant 2 : index
    %43 = vector.load %arg5[%c1_54, %c0_55, %c0_56, %c2_57] : memref<2x4x20x20xf32, #tpu.memory_space<vmem>>, vector<1x4x16x16xf32>
    %44 = vector.shape_cast %43 : vector<1x4x16x16xf32> to vector<4x16x16xf32>
    %45 = vector.shape_cast %44 : vector<4x16x16xf32> to vector<4x256xf32>
    %46 = tpu.concatenate %42, %45 in 0 : vector<4x256xf32>, vector<4x256xf32> -> vector<8x256xf32>
    %c0_58 = arith.constant 0 : index
    %c256 = arith.constant 256 : index
    %47 = vector.load %arg6[%c0_58, %c256] : memref<36x512xf32, #tpu.memory_space<vmem>>, vector<8x256xf32>
    tpu.vector_store %arg6[%c0_58, %c256], %46 {strides = array<i32>} : memref<36x512xf32, #tpu.memory_space<vmem>>, vector<8x256xf32>,
    %c1_59 = arith.constant 1 : index
    %c0_60 = arith.constant 0 : index
    %c0_61 = arith.constant 0 : index
    %c4_62 = arith.constant 4 : index
    %48 = vector.load %arg5[%c1_59, %c0_60, %c0_61, %c4_62] : memref<2x4x20x20xf32, #tpu.memory_space<vmem>>, vector<1x4x16x16xf32>
    %49 = vector.shape_cast %48 : vector<1x4x16x16xf32> to vector<4x16x16xf32>
    %50 = vector.shape_cast %49 : vector<4x16x16xf32> to vector<4x256xf32>
    %c1_63 = arith.constant 1 : index
    %c0_64 = arith.constant 0 : index
    %c2_65 = arith.constant 2 : index
    %c0_66 = arith.constant 0 : index
    %51 = vector.load %arg5[%c1_63, %c0_64, %c2_65, %c0_66] : memref<2x4x20x20xf32, #tpu.memory_space<vmem>>, vector<1x4x16x16xf32>
    %52 = vector.shape_cast %51 : vector<1x4x16x16xf32> to vector<4x16x16xf32>
    %53 = vector.shape_cast %52 : vector<4x16x16xf32> to vector<4x256xf32>
    %54 = tpu.concatenate %50, %53 in 0 : vector<4x256xf32>, vector<4x256xf32> -> vector<8x256xf32>
    %c8_67 = arith.constant 8 : index
    %c256_68 = arith.constant 256 : index
    %55 = vector.load %arg6[%c8_67, %c256_68] : memref<36x512xf32, #tpu.memory_space<vmem>>, vector<8x256xf32>
    tpu.vector_store %arg6[%c8_67, %c256_68], %54 {strides = array<i32>} : memref<36x512xf32, #tpu.memory_space<vmem>>, vector<8x256xf32>,
    %c1_69 = arith.constant 1 : index
    %c0_70 = arith.constant 0 : index
    %c2_71 = arith.constant 2 : index
    %c2_72 = arith.constant 2 : index
    %56 = vector.load %arg5[%c1_69, %c0_70, %c2_71, %c2_72] : memref<2x4x20x20xf32, #tpu.memory_space<vmem>>, vector<1x4x16x16xf32>
    %57 = vector.shape_cast %56 : vector<1x4x16x16xf32> to vector<4x16x16xf32>
    %58 = vector.shape_cast %57 : vector<4x16x16xf32> to vector<4x256xf32>
    %c1_73 = arith.constant 1 : index
    %c0_74 = arith.constant 0 : index
    %c2_75 = arith.constant 2 : index
    %c4_76 = arith.constant 4 : index
    %59 = vector.load %arg5[%c1_73, %c0_74, %c2_75, %c4_76] : memref<2x4x20x20xf32, #tpu.memory_space<vmem>>, vector<1x4x16x16xf32>
    %60 = vector.shape_cast %59 : vector<1x4x16x16xf32> to vector<4x16x16xf32>
    %61 = vector.shape_cast %60 : vector<4x16x16xf32> to vector<4x256xf32>
    %62 = tpu.concatenate %58, %61 in 0 : vector<4x256xf32>, vector<4x256xf32> -> vector<8x256xf32>
    %c16_77 = arith.constant 16 : index
    %c256_78 = arith.constant 256 : index
    %63 = vector.load %arg6[%c16_77, %c256_78] : memref<36x512xf32, #tpu.memory_space<vmem>>, vector<8x256xf32>
    tpu.vector_store %arg6[%c16_77, %c256_78], %62 {strides = array<i32>} : memref<36x512xf32, #tpu.memory_space<vmem>>, vector<8x256xf32>,
    %c1_79 = arith.constant 1 : index
    %c0_80 = arith.constant 0 : index
    %c4_81 = arith.constant 4 : index
    %c0_82 = arith.constant 0 : index
    %64 = vector.load %arg5[%c1_79, %c0_80, %c4_81, %c0_82] : memref<2x4x20x20xf32, #tpu.memory_space<vmem>>, vector<1x4x16x16xf32>
    %65 = vector.shape_cast %64 : vector<1x4x16x16xf32> to vector<4x16x16xf32>
    %66 = vector.shape_cast %65 : vector<4x16x16xf32> to vector<4x256xf32>
    %c1_83 = arith.constant 1 : index
    %c0_84 = arith.constant 0 : index
    %c4_85 = arith.constant 4 : index
    %c2_86 = arith.constant 2 : index
    %67 = vector.load %arg5[%c1_83, %c0_84, %c4_85, %c2_86] : memref<2x4x20x20xf32, #tpu.memory_space<vmem>>, vector<1x4x16x16xf32>
    %68 = vector.shape_cast %67 : vector<1x4x16x16xf32> to vector<4x16x16xf32>
    %69 = vector.shape_cast %68 : vector<4x16x16xf32> to vector<4x256xf32>
    %70 = tpu.concatenate %66, %69 in 0 : vector<4x256xf32>, vector<4x256xf32> -> vector<8x256xf32>
    %c24_87 = arith.constant 24 : index
    %c256_88 = arith.constant 256 : index
    %71 = vector.load %arg6[%c24_87, %c256_88] : memref<36x512xf32, #tpu.memory_space<vmem>>, vector<8x256xf32>
    tpu.vector_store %arg6[%c24_87, %c256_88], %70 {strides = array<i32>} : memref<36x512xf32, #tpu.memory_space<vmem>>, vector<8x256xf32>,
    %c1_89 = arith.constant 1 : index
    %c0_90 = arith.constant 0 : index
    %c4_91 = arith.constant 4 : index
    %c4_92 = arith.constant 4 : index
    %72 = vector.load %arg5[%c1_89, %c0_90, %c4_91, %c4_92] : memref<2x4x20x20xf32, #tpu.memory_space<vmem>>, vector<1x4x16x16xf32>
    %73 = vector.shape_cast %72 : vector<1x4x16x16xf32> to vector<4x16x16xf32>
    %74 = vector.shape_cast %73 : vector<4x16x16xf32> to vector<4x256xf32>
    %c32_93 = arith.constant 32 : index
    %c256_94 = arith.constant 256 : index
    %75 = vector.load %arg6[%c32_93, %c256_94] : memref<36x512xf32, #tpu.memory_space<vmem>>, vector<4x256xf32>
    tpu.vector_store %arg6[%c32_93, %c256_94], %74 {strides = array<i32>} : memref<36x512xf32, #tpu.memory_space<vmem>>, vector<4x256xf32>,
    %c0_95 = arith.constant 0 : index
    %c0_96 = arith.constant 0 : index
    %76 = vector.load %arg2[%c0_95, %c0_96] : memref<8x36xf32, #tpu.memory_space<vmem>>, vector<8x36xf32>
    %c0_97 = arith.constant 0 : index
    %c0_98 = arith.constant 0 : index
    %77 = vector.load %arg6[%c0_97, %c0_98] : memref<36x512xf32, #tpu.memory_space<vmem>>, vector<36x512xf32>
    %cst_99 = arith.constant dense<0.000000e+00> : vector<8x512xf32>
    %78 = tpu.matmul %76, %77, %cst_99 {dimension_numbers = #tpu.dot_dimension_numbers<[1], [0], [0], [1], [0, 0, 1, 1], [], []>} : vector<8x36xf32>, vector<36x512xf32>, vector<8x512xf32> -> vector<8x512xf32>
    %c0_100 = arith.constant 0 : index
    %c0_101 = arith.constant 0 : index
    %79 = vector.load %arg3[%c0_100, %c0_101] : memref<8x1xf32, #tpu.memory_space<vmem>>, vector<8x1xf32>
    %80 = vector.broadcast %79 : vector<8x1xf32> to vector<8x512xf32>
    %81 = arith.addf %78, %80 : vector<8x512xf32>
    %82 = vector.extract_strided_slice %81 {offsets = [0, 0], sizes = [8, 256], strides = [1, 1]} : vector<8x512xf32> to vector<8x256xf32>
    %c0_102 = arith.constant 0 : index
    %c0_103 = arith.constant 0 : index
    %c0_104 = arith.constant 0 : index
    %83 = vector.load %arg4[%c0_102, %c0_103, %c0_104] : memref<2x8x256xf32, #tpu.memory_space<vmem>>, vector<1x8x256xf32>
    %84 = vector.shape_cast %83 : vector<1x8x256xf32> to vector<8x256xf32>
    %85 = vector.shape_cast %82 : vector<8x256xf32> to vector<1x8x256xf32>
    tpu.vector_store %arg4[%c0_102, %c0_103, %c0_104], %85 {strides = array<i32>} : memref<2x8x256xf32, #tpu.memory_space<vmem>>, vector<1x8x256xf32>,
    %86 = vector.extract_strided_slice %81 {offsets = [0, 256], sizes = [8, 256], strides = [1, 1]} : vector<8x512xf32> to vector<8x256xf32>
    %c1_105 = arith.constant 1 : index
    %c0_106 = arith.constant 0 : index
    %c0_107 = arith.constant 0 : index
    %87 = vector.load %arg4[%c1_105, %c0_106, %c0_107] : memref<2x8x256xf32, #tpu.memory_space<vmem>>, vector<1x8x256xf32>
    %88 = vector.shape_cast %87 : vector<1x8x256xf32> to vector<8x256xf32>
    %89 = vector.shape_cast %86 : vector<8x256xf32> to vector<1x8x256xf32>
    tpu.vector_store %arg4[%c1_105, %c0_106, %c0_107], %89 {strides = array<i32>} : memref<2x8x256xf32, #tpu.memory_space<vmem>>, vector<1x8x256xf32>,
    return
  }
  func.func @transform_0(%arg0: i32) -> (i32, i32, i32, i32) {
    %c0_i32 = arith.constant 0 : i32
    %c0_i32_0 = arith.constant 0 : i32
    %c0_i32_1 = arith.constant 0 : i32
    %c0_i32_2 = arith.constant 0 : i32
    return %arg0, %c0_i32, %c0_i32_0, %c0_i32_1 : i32, i32, i32, i32
  }
  func.func @transform_1(%arg0: i32) -> (i32, i32) {
    %c0_i32 = arith.constant 0 : i32
    %c0_i32_0 = arith.constant 0 : i32
    %c0_i32_1 = arith.constant 0 : i32
    return %c0_i32, %c0_i32_0 : i32, i32
  }
  func.func @transform_2(%arg0: i32) -> (i32, i32) {
    %c0_i32 = arith.constant 0 : i32
    %c0_i32_0 = arith.constant 0 : i32
    %c0_i32_1 = arith.constant 0 : i32
    return %c0_i32, %c0_i32_0 : i32, i32
  }
  func.func @transform_3(%arg0: i32) -> (i32, i32, i32) {
    %c0_i32 = arith.constant 0 : i32
    %c0_i32_0 = arith.constant 0 : i32
    %c0_i32_1 = arith.constant 0 : i32
    return %arg0, %c0_i32, %c0_i32_0 : i32, i32, i32
  }
}

</mosaic_0001>

<bundles_post_ra>
// kernel: tpu_custom_call.1
= control target key start
LH: loop header
LB: loop body
LE: loop exit
PB: predicated region body
PF: predicated region fallthrough
CT: control target
= control target key end

     0   :  { %8 = vsyncpa [#allocation5], 0  ;;  %s6686_s0 = inlined_call_operand.hbm [shape: f32[2,4,16,16], index: 0, kind: input, shape index: {}]   ;;  %s6687_s1 = inlined_call_operand.vmem [shape: f32[8,36], index: 1, kind: input, shape index: {}]   ;;  %s6688_s2 = inlined_call_operand.vmem [shape: f32[8,1], index: 2, kind: input, shape index: {}]   ;;  %s6689_s3 = inlined_call_operand.hbm [shape: f32[2,8,256], index: 3, kind: output, shape index: {}]  }
   0x1   :  { %9 = vsyncpa [#allocation6], 0  ;;  %s14_s14 = sshll.u32 %s6686_s0, 4  ;;  %s4216_s15 = smov [#allocation4]   ;;  %s15_s14 = int_to_ptr.hbm [resolvable:$true] %s14_s14 }
   0x2   :  { %s16_s16 = sshll.u32 %s4216_s15, 4  ;;  %s4217_s17 = smov 128   ;;  %s17_s16 = int_to_ptr.vmem [resolvable:$true] %s16_s16 }
   0x3   :  { %s4218_s18 = smov 8  }
   0x4   :  { %22 = dma.hbm_to_vmem [thread:$0]  %s15_s14, 2048, %s17_s16, [#allocation5], %s4217_s17, %s4217_s17, %s4218_s18  }
   0x5   :  { %4212 = dma.done.wait [#allocation5], 2048  }
   0x6   :  { %4213 = vsyncadd [#allocation5], 4294965248  ;;  %v59_v0 = vld [vmem:[#allocation4 + $0x10] sm:$0xff]  ;;  %v57_v1 = vld [vmem:[#allocation4] sm:$0xff]  ;;  %s4219_s19 = smov 2   ;;  %vm31_vm0 = vcmask 162816  }
   0x7   :  { %93 = vrot.lane.b32.xlu1 %v59_v0, %s4219_s19  ;;  %89 = vrot.lane.b32.xlu0 %v57_v1, %s4219_s19  ;;  %v61_v2 = vld [vmem:[#allocation4 + $0x20] sm:$0xff]  ;;  %v60_v3 = vld [vmem:[#allocation4 + $0x18] sm:$0xff]  ;;  %v58_v4 = vld [vmem:[#allocation4 + $0x8] sm:$0xff]  ;;  %v4220_v6 = vmov 0.0   ;;  %vm34_vm1 = vcmask 158720   ;;  %vm137_vm2 = vcmask 146448  }
   0x8   :  { %97 = vrot.lane.b32.xlu2 %v61_v2, %s4219_s19  ;;  %v62_v5 = vld [vmem:[#allocation4 + $0x28] sm:$0xff]  ;;  %39 = vst.msk [vmem:[#allocation2 + $0x30] sm:$0xff] %vm31_vm0, %v4220_v6  ;;  %v64_v7 = vld [vmem:[#allocation4 + $0x38] sm:$0xff]  ;;  %v63_v8 = vld [vmem:[#allocation4 + $0x30] sm:$0xff]  ;;  %s4221_s0 = smov 126   ;;  %s4222_s20 = smov 124  }
   0x9   :  { %40 = vst.msk [vmem:[#allocation2 + $0x38] sm:$0xff] %vm31_vm0, %v4220_v6  ;;  %v65_v9 = vld [vmem:[#allocation4 + $0x40] sm:$0xff]  ;;  %v66_v10 = vld [vmem:[#allocation4 + $0x48] sm:$0xff]  ;;  %v67_v11 = vld [vmem:[#allocation4 + $0x50] sm:$0xff]  ;;  %v4223_v32 = vmov 1983009808  }
   0xa   :  { %32 = vst.msk [vmem:[#allocation2] sm:$0xff] %vm31_vm0, %v4220_v6  ;;  %v68_v12 = vld [vmem:[#allocation4 + $0x58] sm:$0xff]  ;;  %v69_v13 = vld [vmem:[#allocation4 + $0x60] sm:$0xff]  ;;  %v70_v14 = vld [vmem:[#allocation4 + $0x68] sm:$0xff]  ;;  %v168_v33 = vunpack.c.l.s4 %v4223_v32  ;;  %vm163_vm3 = vcmask 1047556   ;;  %s4225_s21 = smov 32  }
   0xb   :  { %33 = vst.msk [vmem:[#allocation2 + $0x8] sm:$0xff] %vm31_vm0, %v4220_v6  ;;  %v72_v15 = vld [vmem:[#allocation4 + $0x78] sm:$0xff]  ;;  %v71_v16 = vld [vmem:[#allocation4 + $0x70] sm:$0xff]  ;;  %v4224_v48 = vmov 1934713408   ;;  %s4226_s22 = smov 96  }
   0xc   :  { %36 = vst.msk [vmem:[#allocation2 + $0x18] sm:$0xff] %vm31_vm0, %v4220_v6  ;;  %v4314_v38 = vunpack.c.0.s8 %v168_v33  ;;  %v192_v49 = vunpack.c.l.s4 %v4224_v48  ;;  %s4227_s23 = smov 64   ;;  %s4228_s24 = smov 80   ;;  %vm331_vm4 = vcmask 130048   ;;  %vm333_vm5 = vcmask 261120  }
   0xd   :  { %37 = vst.msk [vmem:[#allocation2 + $0x20] sm:$0xff] %vm31_vm0, %v4220_v6  ;;  %s4229_s25 = smov 16   ;;  %s4230_s26 = smov 48   ;;  %vm335_vm6 = vcmask 392192   ;;  %vm337_vm7 = vcmask 523264   ;;  %vm339_vm8 = vcmask 654336  }
   0xe   :  { %42 = vst.msk [vmem:[#allocation2 + $0x48] sm:$0xff] %vm31_vm0, %v4220_v6  ;;  %v4347_v60 = vunpack.c.0.s8 %v192_v49  ;;  %s4231_s27 = smov 112   ;;  %vm341_vm9 = vcmask 785408   ;;  %vm343_vm10 = vcmask 916480   ;;  %vm572_vm11 = vcmask 1043456   ;;  %s4122_s5 = sshll.u32 %s6689_s3, 4  ;;  %s4123_s5 = int_to_ptr.hbm [resolvable:$true] %s4122_s5 }
   0xf   :  { %95 = vrot.lane.b32.xlu1 %v60_v3, %s4219_s19  ;;  %91 = vrot.lane.b32.xlu0 %v58_v4, %s4219_s19  ;;  %43 = vst.msk [vmem:[#allocation2 + $0x50] sm:$0xff] %vm31_vm0, %v4220_v6  ;;  %vm4015_vm12 = vcmask 293888   ;;  %s4233_s6 = smov [#allocation7]   ;;  %s4234_s8 = smov 256  }
  0x10   :  { %99 = vrot.lane.b32.xlu2 %v62_v5, %s4219_s19  ;;  %45 = vst.msk [vmem:[#allocation2 + $0x60] sm:$0xff] %vm31_vm0, %v4220_v6  ;;  %s4120_s7 = sshll.u32 %s4233_s6, 4  ;;  %s4121_s7 = int_to_ptr.vmem [resolvable:$true] %s4120_s7 }
  0x11   :  { %46 = vst.msk [vmem:[#allocation2 + $0x68] sm:$0xff] %vm31_vm0, %v4220_v6 }
  0x12   :  { %48 = vst.msk [vmem:[#allocation2 + $0x78] sm:$0xff] %vm31_vm0, %v4220_v6 }
  0x13   :  { %49 = vst.msk [vmem:[#allocation2 + $0x80] sm:$0xff] %vm31_vm0, %v4220_v6 }
  0x14   :  { %51 = vst.msk [vmem:[#allocation2 + $0x90] sm:$0xff] %vm31_vm0, %v4220_v6 }
  0x15   :  { %52 = vst.msk [vmem:[#allocation2 + $0x98] sm:$0xff] %vm31_vm0, %v4220_v6 }
  0x16   :  { %54 = vst.msk [vmem:[#allocation2 + $0xa8] sm:$0xff] %vm31_vm0, %v4220_v6 }
  0x17   :  { %103 = vrot.lane.b32.xlu1 %v64_v7, %s4219_s19  ;;  %101 = vrot.lane.b32.xlu0 %v63_v8, %s4219_s19  ;;  %55 = vst.msk [vmem:[#allocation2 + $0xb0] sm:$0xff] %vm31_vm0, %v4220_v6 }
  0x18   :  { %105 = vrot.lane.b32.xlu2 %v65_v9, %s4219_s19  ;;  %41 = vst.msk [vmem:[#allocation2 + $0x40] sm:$0xf] %vm34_vm1, %v4220_v6 }
  0x19   :  { %35 = vst.msk [vmem:[#allocation2 + $0x10] sm:$0xf] %vm34_vm1, %v4220_v6 }
  0x1a   :  { %38 = vst.msk [vmem:[#allocation2 + $0x28] sm:$0xf] %vm34_vm1, %v4220_v6 }
  0x1b   :  { %44 = vst.msk [vmem:[#allocation2 + $0x58] sm:$0xf] %vm34_vm1, %v4220_v6 }
  0x1c   :  { %47 = vst.msk [vmem:[#allocation2 + $0x70] sm:$0xf] %vm34_vm1, %v4220_v6 }
  0x1d   :  { %50 = vst.msk [vmem:[#allocation2 + $0x88] sm:$0xf] %vm34_vm1, %v4220_v6 }
  0x1e   :  { %53 = vst.msk [vmem:[#allocation2 + $0xa0] sm:$0xf] %vm34_vm1, %v4220_v6 }
  0x1f   :  { %107 = vrot.lane.b32.xlu0 %v66_v10, %s4219_s19  ;;  %109 = vrot.lane.b32.xlu1 %v67_v11, %s4219_s19  ;;  %56 = vst.msk [vmem:[#allocation2 + $0xb8] sm:$0xf] %vm34_vm1, %v4220_v6 }
  0x20   :  { %111 = vrot.lane.b32.xlu2 %v68_v12, %s4219_s19 }
  0x27   :  { %113 = vrot.lane.b32.xlu0 %v69_v13, %s4219_s19  ;;  %115 = vrot.lane.b32.xlu1 %v70_v14, %s4219_s19 }
  0x28   :  { %117 = vrot.lane.b32.xlu2 %v71_v16, %s4219_s19 }
  0x2f   :  { %119 = vrot.lane.b32.xlu0 %v72_v15, %s4219_s19 }
  0x62   :  { %v98_v17 = vpop.permute.xlu2 %97 }
  0x63   :  { %142 = vst.msk [vmem:[#allocation2 + $0x32] sm:$0xff] %vm137_vm2, %v98_v17 }
  0x6a   :  { %v100_v18 = vpop.permute.xlu2 %99  ;;  %v158_v30 = vld [vmem:[#allocation2 + $0x30] sm:$0xff] }
  0x6b   :  { %143 = vst.msk [vmem:[#allocation2 + $0x3a] sm:$0xff] %vm137_vm2, %v100_v18  ;;  %v162_v34 = vrot.slane %v158_v30, 4  ;;  %v4355_v0 = vld [vmem:[#allocation2 + $0x32] sm:$0xff] }
  0x6c   :  { %v807_v10 = vrot.slane %v4355_v0, 4 }
  0x72   :  { %v159_v27 = vld [vmem:[#allocation2 + $0x38] sm:$0xff]  ;;  %v106_v55 = vpop.permute.xlu2 %105 }
  0x73   :  { %v219_v47 = vrot.slane %v159_v27, 4  ;;  %146 = vst.msk [vmem:[#allocation2 + $0x62] sm:$0xff] %vm137_vm2, %v106_v55  ;;  %v4446_v48 = vld [vmem:[#allocation2 + $0x3a] sm:$0xff] }
  0x79   :  { %v94_v19 = vpop.permute.xlu1 %93  ;;  %v90_v20 = vpop.permute.xlu0 %89 }
  0x7a   :  { %140 = vst.msk [vmem:[#allocation2 + $0x1a] sm:$0xff] %vm137_vm2, %v94_v19  ;;  %v112_v15 = vpop.permute.xlu2 %111 }
  0x7b   :  { %138 = vst.msk [vmem:[#allocation2 + $0x2] sm:$0xff] %vm137_vm2, %v90_v20 }
  0x7c   :  { %149 = vst.msk [vmem:[#allocation2 + $0x82] sm:$0xff] %vm137_vm2, %v112_v15 }
  0x81   :  { %v96_v21 = vpop.permute.xlu1 %95  ;;  %v92_v22 = vpop.permute.xlu0 %91  ;;  %v156_v23 = vld [vmem:[#allocation2 + $0x18] sm:$0xff] }
  0x82   :  { %141 = vst.msk [vmem:[#allocation2 + $0x22] sm:$0xff] %vm137_vm2, %v96_v21  ;;  %364 = vrot.lane.b32.xlu2 %v156_v23, %s4221_s0  ;;  %v154_v24 = vld [vmem:[#allocation2] sm:$0xff]  ;;  %v177_v40 = vrot.slane %v156_v23, 4 }
  0x83   :  { %139 = vst.msk [vmem:[#allocation2 + $0xa] sm:$0xff] %vm137_vm2, %v92_v22  ;;  %360 = vrot.lane.b32.xlu0 %v154_v24, %s4221_s0  ;;  %v165_v35 = vrot.slane %v154_v24, 4  ;;  %v164_v39 = vsel %vm163_vm3, %v162_v34, %v154_v24  ;;  %v4351_v62 = vld [vmem:[#allocation2 + $0x1a] sm:$0xff]  ;;  %v4373_v9 = vld [vmem:[#allocation2 + $0x2] sm:$0xff] }
  0x84   :  { %v4322_v43 = vperm.slane %v164_v39, %v4314_v38  ;;  %v821_v6 = vrot.slane %v4351_v62, 4  ;;  %v809_v17 = vrot.slane %v4373_v9, 4  ;;  %v808_v20 = vsel %vm163_vm3, %v807_v10, %v4373_v9 }
  0x85   :  { %v166_v41 = vsel %vm163_vm3, %v158_v30, %v165_v35 }
  0x86   :  { %v4328_v46 = vperm.slane %v166_v41, %v4314_v38  ;;  %v189_v54 = vrot.slane %v4322_v43, 4 }
  0x88   :  { %v201_v57 = vrot.slane %v4328_v46, 4 }
  0x89   :  { %v104_v25 = vpop.permute.xlu1 %103  ;;  %v102_v26 = vpop.permute.xlu0 %101  ;;  %v4298_v28 = vld [vmem:[#allocation2 + $0x20] sm:$0xff] }
  0x8a   :  { %145 = vst.msk [vmem:[#allocation2 + $0x52] sm:$0xff] %vm137_vm2, %v104_v25  ;;  %370 = vrot.lane.b32.xlu2 %v159_v27, %s4221_s0  ;;  %v155_v29 = vld [vmem:[#allocation2 + $0x8] sm:$0xff]  ;;  %v233_v45 = vrot.slane %v4298_v28, 4 }
  0x8b   :  { %144 = vst.msk [vmem:[#allocation2 + $0x4a] sm:$0xff] %vm137_vm2, %v102_v26  ;;  %362 = vrot.lane.b32.xlu1 %v155_v29, %s4221_s0  ;;  %366 = vrot.lane.b32.xlu0 %v4298_v28, %s4221_s0  ;;  %v221_v56 = vrot.slane %v155_v29, 4  ;;  %v220_v58 = vsel %vm163_vm3, %v219_v47, %v155_v29  ;;  %v4389_v18 = vld [vmem:[#allocation2 + $0x22] sm:$0xff]  ;;  %v4406_v26 = vperm.slane %v808_v20, %v4314_v38  ;;  %v4422_v34 = vld [vmem:[#allocation2 + $0xa] sm:$0xff] }
  0x8c   :  { %v4363_v4 = vperm.slane %v220_v58, %v4314_v38  ;;  %v865_v41 = vrot.slane %v4422_v34, 4 }
  0x8d   :  { %v222_v3 = vsel %vm163_vm3, %v159_v27, %v221_v56  ;;  %v833_v39 = vrot.slane %v4406_v26, 4 }
  0x8e   :  { %v230_v13 = vperm.slane %v222_v3, %v4314_v38  ;;  %v245_v16 = vrot.slane %v4363_v4, 4  ;;  %v863_v3 = vrot.slane %v4446_v48, 4 }
  0x90   :  { %v257_v55 = vrot.slane %v230_v13, 4 }
  0x91   :  { %v110_v58 = vpop.permute.xlu1 %109 }
  0x92   :  { %595 = vrot.lane.b32.xlu2 %v155_v29, %s4222_s20  ;;  %v4307_v31 = vld [vmem:[#allocation2 + $0x48] sm:$0xff]  ;;  %v161_v37 = vld [vmem:[#allocation2 + $0x50] sm:$0xff]  ;;  %148 = vst.msk [vmem:[#allocation2 + $0x7a] sm:$0xff] %vm137_vm2, %v110_v58 }
  0x93   :  { %368 = vrot.lane.b32.xlu1 %v158_v30, %s4221_s0  ;;  %372 = vrot.lane.b32.xlu0 %v4307_v31, %s4221_s0  ;;  %v175_v36 = vrot.slane %v4307_v31, 4  ;;  %v178_v44 = vsel %vm163_vm3, %v4307_v31, %v177_v40  ;;  %v234_v52 = vsel %vm163_vm3, %v161_v37, %v233_v45  ;;  %v231_v53 = vrot.slane %v161_v37, 4  ;;  %v4359_v2 = vld [vmem:[#allocation2 + $0x4a] sm:$0xff] }
  0x94   :  { %v4334_v51 = vperm.slane %v178_v44, %v4314_v38  ;;  %v4345_v59 = vperm.slane %v234_v52, %v4314_v38  ;;  %v822_v12 = vsel %vm163_vm3, %v4359_v2, %v821_v6  ;;  %v819_v14 = vrot.slane %v4359_v2, 4 }
  0x95   :  { %v176_v42 = vsel %vm163_vm3, %v175_v36, %v156_v23  ;;  %v232_v1 = vsel %vm163_vm3, %v231_v53, %v4298_v28  ;;  %v4396_v21 = vperm.slane %v822_v12, %v4314_v38  ;;  %v866_v52 = vsel %vm163_vm3, %v4446_v48, %v865_v41 }
  0x96   :  { %v4331_v50 = vperm.slane %v176_v42, %v4314_v38  ;;  %v202_v63 = vsel %vm163_vm3, %v4334_v51, %v201_v57  ;;  %v255_v7 = vrot.slane %v4345_v59, 4  ;;  %v238_v11 = vperm.slane %v232_v1, %v4314_v38  ;;  %v118_v42 = vpop.permute.xlu2 %117 }
  0x97   :  { %v4371_v8 = vperm.slane %v202_v63, %v4347_v60  ;;  %v199_v32 = vrot.slane %v4334_v51, 4  ;;  %152 = vst.msk [vmem:[#allocation2 + $0xaa] sm:$0xff] %vm137_vm2, %v118_v42  ;;  %v258_v63 = vsel %vm163_vm3, %v4345_v59, %v257_v55 }
  0x98   :  { %v190_v61 = vsel %vm163_vm3, %v4331_v50, %v189_v54  ;;  %v256_v19 = vsel %vm163_vm3, %v255_v7, %v230_v13  ;;  %v246_v22 = vsel %vm163_vm3, %v238_v11, %v245_v16  ;;  %v243_v53 = vrot.slane %v238_v11, 4 }
  0x99   :  { %v4366_v5 = vperm.slane %v190_v61, %v4347_v60  ;;  %v4403_v25 = vperm.slane %v256_v19, %v4347_v60  ;;  %v4413_v29 = vperm.slane %v246_v22, %v4347_v60  ;;  %v200_v44 = vsel %vm163_vm3, %v199_v32, %v4328_v46  ;;  %v116_v15 = vpop.permute.xlu1 %115 }
  0x9a   :  { %601 = vrot.lane.b32.xlu2 %v158_v30, %s4222_s20  ;;  %v843_v30 = vrot.slane %v4396_v21, 4  ;;  %v206_v51 = vperm.slane %v200_v44, %v4347_v60  ;;  %v4461_v54 = vperm.slane %v866_v52, %v4314_v38  ;;  %v244_v1 = vsel %vm163_vm3, %v243_v53, %v4363_v4  ;;  %151 = vst.msk [vmem:[#allocation2 + $0x9a] sm:$0xff] %vm137_vm2, %v116_v15 }
  0x9b   :  { %374 = vrot.lane.b32.xlu1 %v161_v37, %s4221_s0  ;;  %597 = vrot.lane.b32.xlu0 %v156_v23, %s4222_s20  ;;  %v820_v23 = vsel %vm163_vm3, %v819_v14, %v4351_v62  ;;  %v266_v7 = vperm.slane %v258_v63, %v4347_v60  ;;  %v4478_v11 = vperm.slane %v244_v1, %v4347_v60  ;;  %v217_v58 = vrot.slane %v4371_v8, 4 }
  0x9c   :  { %v4420_v33 = vperm.slane %v820_v23, %v4314_v38  ;;  %v215_v56 = vrot.slane %v206_v51, 4  ;;  %v864_v13 = vsel %vm163_vm3, %v863_v3, %v4422_v34 }
  0x9d   :  { %v267_v12 = vrot.slane %v4478_v11, 4  ;;  %v870_v20 = vperm.slane %v864_v13, %v4314_v38  ;;  %v273_v32 = vrot.slane %v266_v7, 4  ;;  %v218_v3 = vsel %vm163_vm3, 0.0, %v217_v58 }
  0x9e   :  { %v216_v10 = vsel %vm163_vm3, 0.0, %v215_v56  ;;  %v901_v56 = vrot.slane %v4461_v54, 4 }
  0x9f   :  { %v268_v23 = vsel %vm163_vm3, 0.0, %v267_v12 }
  0xa2   :  { %607 = vrot.lane.b32.xlu2 %v161_v37, %s4222_s20  ;;  %v108_v37 = vpop.permute.xlu0 %107 }
  0xa3   :  { %593 = vrot.lane.b32.xlu1 %v154_v24, %s4222_s20  ;;  %603 = vrot.lane.b32.xlu0 %v159_v27, %s4222_s20  ;;  %v877_v24 = vrot.slane %v4389_v18, 4  ;;  %v810_v27 = vsel %vm163_vm3, %v4355_v0, %v809_v17  ;;  %147 = vst.msk [vmem:[#allocation2 + $0x6a] sm:$0xff] %vm137_vm2, %v108_v37  ;;  %v213_v17 = vrot.slane %v4366_v5, 4 }
  0xa4   :  { %v818_v35 = vperm.slane %v810_v27, %v4314_v38  ;;  %v187_v27 = vrot.slane %v4331_v50, 4 }
  0xa6   :  { %v844_v40 = vsel %vm163_vm3, %v843_v30, %v818_v35  ;;  %v845_v4 = vrot.slane %v818_v35, 4  ;;  %v889_v30 = vrot.slane %v870_v20, 4 }
  0xa7   :  { %v4444_v47 = vperm.slane %v844_v40, %v4347_v60  ;;  %v274_v40 = vsel %vm163_vm3, 0.0, %v273_v32 }
  0xa8   :  { %v846_v16 = vsel %vm163_vm3, %v4396_v21, %v845_v4  ;;  %v214_v21 = vsel %vm163_vm3, 0.0, %v213_v17 }
  0xa9   :  { %v854_v22 = vperm.slane %v846_v16, %v4347_v60  ;;  %v859_v42 = vrot.slane %v4444_v47, 4 }
  0xaa   :  { %280 = vrot.lane.b32.xlu2 %v4366_v5, %s4225_s21  ;;  %v114_v57 = vpop.permute.xlu0 %113 }
  0xab   :  { %599 = vrot.lane.b32.xlu1 %v4298_v28, %s4222_s20  ;;  %296 = vrot.lane.b32.xlu0 %v4371_v8, %s4226_s22  ;;  %v4410_v28 = vld [vmem:[#allocation2 + $0x52] sm:$0xff]  ;;  %150 = vst.msk [vmem:[#allocation2 + $0x92] sm:$0xff] %vm137_vm2, %v114_v57  ;;  %v860_v52 = vsel %vm163_vm3, 0.0, %v859_v42  ;;  %v861_v55 = vrot.slane %v854_v22, 4 }
  0xac   :  { %v878_v36 = vsel %vm163_vm3, %v4410_v28, %v877_v24  ;;  %v875_v59 = vrot.slane %v4410_v28, 4  ;;  %v831_v24 = vrot.slane %v4420_v33, 4 }
  0xad   :  { %v4440_v45 = vperm.slane %v878_v36, %v4314_v38  ;;  %v271_v36 = vrot.slane %v4403_v25, 4  ;;  %v862_v63 = vsel %vm163_vm3, 0.0, %v861_v55 }
  0xae   :  { %v876_v19 = vsel %vm163_vm3, %v875_v59, %v4389_v18  ;;  %v832_v37 = vsel %vm163_vm3, %v831_v24, %v4406_v26 }
  0xaf   :  { %v899_v46 = vrot.slane %v4440_v45, 4  ;;  %v882_v5 = vperm.slane %v876_v19, %v4314_v38  ;;  %v4514_v41 = vperm.slane %v832_v37, %v4347_v60  ;;  %v272_v50 = vsel %vm163_vm3, 0.0, %v271_v36 }
  0xb1   :  { %v900_v61 = vsel %vm163_vm3, %v899_v46, %v4461_v54  ;;  %v890_v35 = vsel %vm163_vm3, %v882_v5, %v889_v30  ;;  %v855_v26 = vrot.slane %v4514_v41, 4 }
  0xb2   :  { %316 = vrot.lane.b32.xlu2 %v4403_v25, %s4227_s23  ;;  %v4473_v6 = vperm.slane %v900_v61, %v4347_v60  ;;  %v120_v14 = vpop.permute.xlu0 %119  ;;  %v902_v61 = vsel %vm163_vm3, %v4440_v45, %v901_v56  ;;  %v269_v45 = vrot.slane %v4413_v29, 4 }
  0xb3   :  { %605 = vrot.lane.b32.xlu1 %v4307_v31, %s4222_s20  ;;  %308 = vrot.lane.b32.xlu0 %v4413_v29, %s4225_s21  ;;  %v834_v31 = vsel %vm163_vm3, %v4420_v33, %v833_v39  ;;  %153 = vst.msk [vmem:[#allocation2 + $0xb2] sm:$0xff] %vm137_vm2, %v120_v14  ;;  %v188_v39 = vsel %vm163_vm3, %v187_v27, %v4322_v43  ;;  %v887_v43 = vrot.slane %v882_v5, 4 }
  0xb4   :  { %v4449_v49 = vperm.slane %v834_v31, %v4347_v60  ;;  %v898_v33 = vperm.slane %v890_v35, %v4347_v60  ;;  %v4519_v25 = vperm.slane %v188_v39, %v4347_v60  ;;  %v270_v12 = vsel %vm163_vm3, 0.0, %v269_v45 }
  0xb5   :  { %v888_v44 = vsel %vm163_vm3, %v887_v43, %v870_v20  ;;  %v915_v16 = vrot.slane %v4473_v6, 4 }
  0xb6   :  { %v211_v31 = vrot.slane %v4519_v25, 4  ;;  %v4532_v53 = vperm.slane %v888_v44, %v4347_v60  ;;  %v913_v54 = vrot.slane %v898_v33, 4  ;;  %v857_v13 = vrot.slane %v4449_v49, 4 }
  0xb8   :  { %v212_v46 = vsel %vm163_vm3, 0.0, %v211_v31  ;;  %v911_v57 = vrot.slane %v4532_v53, 4  ;;  %v914_v59 = vsel %vm163_vm3, 0.0, %v913_v54  ;;  %v858_v29 = vsel %vm163_vm3, 0.0, %v857_v13 }
  0xba   :  { %932 = vrot.lane.b32.xlu2 %v4444_v47, %s4227_s23  ;;  %v912_v1 = vsel %vm163_vm3, 0.0, %v911_v57 }
  0xbb   :  { %924 = vrot.lane.b32.xlu0 %v4449_v49, %s4225_s21  ;;  %288 = vrot.lane.b32.xlu1 %v206_v51, %s4227_s23  ;;  %v856_v51 = vsel %vm163_vm3, 0.0, %v855_v26  ;;  %v916_v49 = vsel %vm163_vm3, 0.0, %v915_v16 }
  0xc2   :  { %292 = vrot.lane.b32.xlu2 %v216_v10, %s4228_s24 }
  0xc3   :  { %960 = vrot.lane.b32.xlu0 %v4473_v6, %s4227_s23  ;;  %324 = vrot.lane.b32.xlu1 %v266_v7, %s4226_s22  ;;  %v910_v7 = vperm.slane %v902_v61, %v4347_v60 }
  0xc5   :  { %v917_v8 = vrot.slane %v910_v7, 4 }
  0xc7   :  { %v918_v4 = vsel %vm163_vm3, 0.0, %v917_v8 }
  0xca   :  { %304 = vrot.lane.b32.xlu2 %v268_v23, %s4229_s25 }
  0xcb   :  { %940 = vrot.lane.b32.xlu1 %v854_v22, %s4226_s22  ;;  %284 = vrot.lane.b32.xlu0 %v214_v21, %s4230_s26 }
  0xd2   :  { %328 = vrot.lane.b32.xlu2 %v274_v40, %s4231_s27 }
  0xd3   :  { %952 = vrot.lane.b32.xlu1 %v898_v33, %s4225_s21  ;;  %320 = vrot.lane.b32.xlu0 %v272_v50, %s4228_s24 }
  0xda   :  { %920 = vrot.lane.b32.xlu2 %v856_v51, %s4229_s25 }
  0xdb   :  { %936 = vrot.lane.b32.xlu0 %v860_v52, %s4228_s24  ;;  %276 = vrot.lane.b32.xlu1 %v212_v46, %s4229_s25 }
  0xdc   :  { %v365_v47 = vpop.permute.xlu2 %364 }
  0xdd   :  { %v398_v6 = vrot.slane %v365_v47, 4 }
  0xe2   :  { %944 = vrot.lane.b32.xlu2 %v862_v63, %s4231_s27 }
  0xe3   :  { %948 = vrot.lane.b32.xlu0 %v912_v1, %s4229_s25  ;;  %300 = vrot.lane.b32.xlu1 %v218_v3, %s4231_s27 }
  0xe4   :  { %v4548_v10 = vpop.permute.xlu2 %370 }
  0xe5   :  { %v440_v3 = vrot.slane %v4548_v10, 4 }
  0xea   :  { %956 = vrot.lane.b32.xlu2 %v914_v59, %s4230_s26 }
  0xeb   :  { %972 = vrot.lane.b32.xlu0 %v918_v4, %s4231_s27  ;;  %312 = vrot.lane.b32.xlu1 %v270_v12, %s4230_s26 }
  0xec   :  { %v4558_v14 = vpop.permute.xlu2 %595 }
  0xf2   :  { %968 = vrot.lane.b32.xlu2 %v910_v7, %s4226_s22 }
  0xf3   :  { %1019 = vrot.lane.b32.xlu0 %v4351_v62, %s4221_s0  ;;  %928 = vrot.lane.b32.xlu1 %v858_v29, %s4230_s26 }
  0xf4   :  { %v4566_v17 = vpop.permute.xlu2 %601 }
  0xf5   :  { %v361_v15 = vpop.permute.xlu0 %360 }
  0xf6   :  { %v386_v5 = vrot.slane %v361_v15, 4 }
  0xfa   :  { %1017 = vrot.lane.b32.xlu2 %v4422_v34, %s4221_s0 }
  0xfb   :  { %1025 = vrot.lane.b32.xlu0 %v4446_v48, %s4221_s0  ;;  %964 = vrot.lane.b32.xlu1 %v916_v49, %s4228_s24 }
  0xfc   :  { %v4578_v22 = vpop.permute.xlu2 %607 }
  0xfd   :  { %v363_v19 = vpop.permute.xlu1 %362  ;;  %v367_v20 = vpop.permute.xlu0 %366 }
  0xfe   :  { %v442_v35 = vrot.slane %v363_v19, 4  ;;  %v454_v31 = vrot.slane %v367_v20, 4  ;;  %v441_v45 = vsel %vm163_vm3, %v440_v3, %v363_v19 }
 0x100   :  { %v443_v42 = vsel %vm163_vm3, %v4548_v10, %v442_v35  ;;  %v617_v35 = vrot.slane %v4566_v17, 4 }
 0x101   :  { %v451_v56 = vperm.slane %v443_v42, %v4314_v38 }
 0x102   :  { %1023 = vrot.lane.b32.xlu2 %v4355_v0, %s4221_s0 }
 0x103   :  { %1015 = vrot.lane.b32.xlu1 %v4373_v9, %s4221_s0  ;;  %v478_v8 = vrot.slane %v451_v56, 4 }
 0x104   :  { %v4609_v57 = vpop.permute.xlu2 %280 }
 0x105   :  { %v369_v23 = vpop.permute.xlu1 %368  ;;  %v373_v21 = vpop.permute.xlu0 %372 }
 0x106   :  { %v384_v24 = vrot.slane %v369_v23, 4  ;;  %v396_v27 = vrot.slane %v373_v21, 4  ;;  %v399_v30 = vsel %vm163_vm3, %v373_v21, %v398_v6  ;;  %v387_v37 = vsel %vm163_vm3, %v369_v23, %v386_v5 }
 0x107   :  { %v407_v32 = vperm.slane %v399_v30, %v4314_v38  ;;  %v395_v50 = vperm.slane %v387_v37, %v4314_v38 }
 0x108   :  { %v385_v36 = vsel %vm163_vm3, %v384_v24, %v361_v15  ;;  %v397_v39 = vsel %vm163_vm3, %v396_v27, %v365_v47  ;;  %v4631_v15 = vperm.slane %v441_v45, %v4314_v38 }
 0x109   :  { %v4586_v33 = vperm.slane %v385_v36, %v4314_v38  ;;  %v420_v40 = vrot.slane %v407_v32, 4  ;;  %v4592_v43 = vperm.slane %v397_v39, %v4314_v38  ;;  %v422_v1 = vrot.slane %v395_v50, 4 }
 0x10a   :  { %1029 = vrot.lane.b32.xlu2 %v4410_v28, %s4221_s0  ;;  %v466_v21 = vrot.slane %v4631_v15, 4 }
 0x10b   :  { %1021 = vrot.lane.b32.xlu1 %v4389_v18, %s4221_s0  ;;  %v410_v26 = vrot.slane %v4586_v33, 4  ;;  %v421_v46 = vsel %vm163_vm3, %v420_v40, %v395_v50  ;;  %v423_v13 = vsel %vm163_vm3, %v407_v32, %v422_v1 }
 0x10c   :  { %v4615_v61 = vperm.slane %v421_v46, %v4347_v60  ;;  %v4638_v49 = vpop.permute.xlu2 %316  ;;  %v4641_v19 = vperm.slane %v423_v13, %v4347_v60 }
 0x10d   :  { %v375_v44 = vpop.permute.xlu1 %374  ;;  %v4599_v51 = vpop.permute.xlu0 %597  ;;  %v411_v52 = vsel %vm163_vm3, %v4592_v43, %v410_v26 }
 0x10e   :  { %v455_v47 = vsel %vm163_vm3, %v375_v44, %v454_v31  ;;  %v4606_v55 = vperm.slane %v411_v52, %v4347_v60  ;;  %v452_v7 = vrot.slane %v375_v44, 4 }
 0x10f   :  { %v463_v58 = vperm.slane %v455_v47, %v4314_v38 }
 0x110   :  { %501 = vrot.lane.b32.xlu0 %v4606_v55, %s4225_s21  ;;  %v453_v29 = vsel %vm163_vm3, %v452_v7, %v367_v20  ;;  %v685_v20 = vrot.slane %v4578_v22, 4 }
 0x111   :  { %v476_v63 = vrot.slane %v463_v58, 4  ;;  %v479_v4 = vsel %vm163_vm3, %v463_v58, %v478_v8  ;;  %v4644_v6 = vperm.slane %v453_v29, %v4314_v38 }
 0x112   :  { %509 = vrot.lane.b32.xlu2 %v4615_v61, %s4227_s23  ;;  %v4636_v16 = vperm.slane %v479_v4, %v4347_v60 }
 0x113   :  { %1027 = vrot.lane.b32.xlu1 %v4359_v2, %s4221_s0  ;;  %v477_v54 = vsel %vm163_vm3, %v476_v63, %v451_v56  ;;  %v467_v32 = vsel %vm163_vm3, %v4644_v6, %v466_v21  ;;  %v675_v56 = vrot.slane %v4558_v14, 4  ;;  %v408_v21 = vrot.slane %v4592_v43, 4 }
 0x114   :  { %v4626_v12 = vperm.slane %v477_v54, %v4347_v60  ;;  %v4664_v26 = vperm.slane %v467_v32, %v4347_v60  ;;  %v4667_v44 = vpop.permute.xlu2 %932 }
 0x115   :  { %v594_v59 = vpop.permute.xlu1 %593  ;;  %v604_v10 = vpop.permute.xlu0 %603 }
 0x116   :  { %v673_v23 = vrot.slane %v604_v10, 4  ;;  %v619_v5 = vrot.slane %v594_v59, 4  ;;  %v618_v39 = vsel %vm163_vm3, %v617_v35, %v594_v59  ;;  %v676_v8 = vsel %vm163_vm3, %v604_v10, %v675_v56 }
 0x117   :  { %v4676_v46 = vperm.slane %v618_v39, %v4314_v38 }
 0x118   :  { %537 = vrot.lane.b32.xlu0 %v4626_v12, %s4227_s23  ;;  %v674_v27 = vsel %vm163_vm3, %v673_v23, %v4558_v14  ;;  %v620_v37 = vsel %vm163_vm3, %v4566_v17, %v619_v5  ;;  %v631_v17 = vrot.slane %v4599_v51, 4  ;;  %v684_v23 = vperm.slane %v676_v8, %v4314_v38 }
 0x119   :  { %v680_v40 = vperm.slane %v674_v27, %v4314_v38  ;;  %v628_v31 = vperm.slane %v620_v37, %v4314_v38  ;;  %v643_v54 = vrot.slane %v4676_v46, 4  ;;  %v409_v37 = vsel %vm163_vm3, %v408_v21, %v4586_v33 }
 0x11a   :  { %545 = vrot.lane.b32.xlu2 %v4636_v16, %s4226_s22  ;;  %v711_v43 = vrot.slane %v684_v23, 4  ;;  %v464_v33 = vrot.slane %v4644_v6, 4 }
 0x11b   :  { %517 = vrot.lane.b32.xlu1 %v4641_v19, %s4226_s22  ;;  %v655_v7 = vrot.slane %v628_v31, 4 }
 0x11d   :  { %v600_v24 = vpop.permute.xlu1 %599  ;;  %v4685_v45 = vpop.permute.xlu0 %296 }
 0x11e   :  { %v686_v30 = vsel %vm163_vm3, %v685_v20, %v600_v24  ;;  %v687_v42 = vrot.slane %v600_v24, 4  ;;  %v4705_v24 = vpop.permute.xlu2 %292 }
 0x11f   :  { %v692_v36 = vperm.slane %v686_v30, %v4314_v38  ;;  %v699_v30 = vrot.slane %v680_v40, 4 }
 0x120   :  { %v688_v58 = vsel %vm163_vm3, %v4578_v22, %v687_v42 }
 0x121   :  { %v697_v50 = vrot.slane %v692_v36, 4  ;;  %v696_v14 = vperm.slane %v688_v58, %v4314_v38  ;;  %v700_v35 = vsel %vm163_vm3, %v692_v36, %v699_v30 }
 0x123   :  { %529 = vrot.lane.b32.xlu1 %v4664_v26, %s4225_s21  ;;  %v4672_v52 = vsel %vm163_vm3, %v697_v50, %v680_v40  ;;  %v709_v32 = vrot.slane %v696_v14, 4  ;;  %v712_v39 = vsel %vm163_vm3, %v696_v14, %v711_v43  ;;  %v708_v40 = vperm.slane %v700_v35, %v4347_v60 }
 0x125   :  { %v606_v47 = vpop.permute.xlu1 %605  ;;  %v710_v50 = vsel %vm163_vm3, %v709_v32, %v684_v23  ;;  %v4717_v42 = vpop.permute.xlu0 %308 }
 0x126   :  { %v629_v63 = vrot.slane %v606_v47, 4  ;;  %v632_v1 = vsel %vm163_vm3, %v606_v47, %v631_v17  ;;  %v4725_v17 = vperm.slane %v712_v39, %v4347_v60  ;;  %v716_v36 = vperm.slane %v710_v50, %v4347_v60  ;;  %v4734_v56 = vpop.permute.xlu2 %304 }
 0x127   :  { %v640_v3 = vperm.slane %v632_v1, %v4314_v38  ;;  %v465_v1 = vsel %vm163_vm3, %v464_v33, %v4631_v15 }
 0x128   :  { %v630_v59 = vsel %vm163_vm3, %v629_v63, %v4599_v51  ;;  %v436_v63 = vrot.slane %v4615_v61, 4  ;;  %v4748_v8 = vperm.slane %v465_v1, %v4347_v60  ;;  %v438_v61 = vrot.slane %v4641_v19, 4 }
 0x129   :  { %v636_v4 = vperm.slane %v630_v59, %v4314_v38  ;;  %v653_v22 = vrot.slane %v640_v3, 4  ;;  %v656_v13 = vsel %vm163_vm3, %v640_v3, %v655_v7  ;;  %v494_v19 = vrot.slane %v4636_v16, 4 }
 0x12a   :  { %v4693_v29 = vperm.slane %v656_v13, %v4347_v60  ;;  %v488_v15 = vrot.slane %v4748_v8, 4  ;;  %v439_v14 = vsel %vm163_vm3, 0.0, %v438_v61 }
 0x12b   :  { %v654_v20 = vsel %vm163_vm3, %v653_v22, %v628_v31  ;;  %v644_v10 = vsel %vm163_vm3, %v636_v4, %v643_v54  ;;  %v4721_v31 = vperm.slane %v409_v37, %v4347_v60  ;;  %v437_v54 = vsel %vm163_vm3, 0.0, %v436_v63 }
 0x12c   :  { %750 = vrot.lane.b32.xlu2 %v4693_v29, %s4226_s22  ;;  %v4702_v51 = vperm.slane %v654_v20, %v4347_v60  ;;  %v652_v5 = vperm.slane %v644_v10, %v4347_v60  ;;  %v489_v13 = vsel %vm163_vm3, 0.0, %v488_v15  ;;  %v641_v23 = vrot.slane %v636_v4, 4 }
 0x12d   :  { %v4707_v27 = vpop.permute.xlu1 %288  ;;  %v432_v58 = vrot.slane %v4721_v31, 4  ;;  %v4741_v7 = vpop.permute.xlu0 %924  ;;  %v490_v10 = vrot.slane %v4664_v26, 4  ;;  %v495_v4 = vsel %vm163_vm3, 0.0, %v494_v19  ;;  %v671_v63 = vrot.slane %v4693_v29, 4 }
 0x12e   :  { %742 = vrot.lane.b32.xlu0 %v4702_v51, %s4227_s23  ;;  %734 = vrot.lane.b32.xlu1 %v652_v5, %s4225_s21  ;;  %v4752_v59 = vpop.permute.xlu2 %328  ;;  %v642_v21 = vsel %vm163_vm3, %v641_v23, %v4676_v46  ;;  %v667_v26 = vrot.slane %v652_v5, 4  ;;  %v723_v15 = vrot.slane %v708_v40, 4 }
 0x12f   :  { %v433_v3 = vsel %vm163_vm3, 0.0, %v432_v58  ;;  %v491_v32 = vsel %vm163_vm3, 0.0, %v490_v10  ;;  %v4775_v35 = vperm.slane %v642_v21, %v4347_v60  ;;  %v725_v58 = vrot.slane %v716_v36, 4 }
 0x130   :  { %v668_v37 = vsel %vm163_vm3, 0.0, %v667_v26  ;;  %v724_v29 = vsel %vm163_vm3, 0.0, %v723_v15 }
 0x131   :  { %v665_v46 = vrot.slane %v4775_v35, 4  ;;  %v726_v1 = vsel %vm163_vm3, 0.0, %v725_v58 }
 0x133   :  { %v666_v33 = vsel %vm163_vm3, 0.0, %v665_v46 }
 0x134   :  { %762 = vrot.lane.b32.xlu2 %v708_v40, %s4225_s21 }
 0x135   :  { %v4728_v47 = vpop.permute.xlu1 %324  ;;  %v4760_v20 = vpop.permute.xlu0 %960 }
 0x136   :  { %778 = vrot.lane.b32.xlu0 %v4725_v17, %s4226_s22  ;;  %770 = vrot.lane.b32.xlu1 %v716_v36, %s4227_s23  ;;  %6691 = vst [vmem:[#allocation11_spill] sm:$0xff] %v4760_v20  ;;  %v4767_v30 = vpop.permute.xlu2 %920 }
 0x13c   :  { %497 = vrot.lane.b32.xlu2 %v433_v3, %s4229_s25 }
 0x13d   :  { %v4744_v6 = vpop.permute.xlu1 %940  ;;  %v4778_v16 = vpop.permute.xlu0 %284 }
 0x13e   :  { %513 = vrot.lane.b32.xlu0 %v437_v54, %s4228_s24  ;;  %v4783_v39 = vpop.permute.xlu2 %944  ;;  %v672_v54 = vsel %vm163_vm3, 0.0, %v671_v63 }
 0x13f   :  { %6692 = vst [vmem:[#allocation12_spill] sm:$0xff] %v4783_v39 }
 0x144   :  { %521 = vrot.lane.b32.xlu2 %v439_v14, %s4231_s27 }
 0x145   :  { %v4757_v22 = vpop.permute.xlu1 %952  ;;  %v4790_v5 = vpop.permute.xlu0 %320 }
 0x146   :  { %6690 = vst [vmem:[#allocation10_spill] sm:$0xff] %v4757_v22  ;;  %525 = vrot.lane.b32.xlu0 %v489_v13, %s4229_s25  ;;  %v4798_v61 = vpop.permute.xlu2 %956 }
 0x147   :  { %6693 = vst [vmem:[#allocation13_spill] sm:$0xff] %v4798_v61 }
 0x14c   :  { %533 = vrot.lane.b32.xlu2 %v491_v32, %s4230_s26 }
 0x14d   :  { %v4771_v43 = vpop.permute.xlu1 %276  ;;  %v4800_v14 = vpop.permute.xlu0 %936 }
 0x14e   :  { %549 = vrot.lane.b32.xlu0 %v495_v4, %s4231_s27  ;;  %v4806_v13 = vpop.permute.xlu2 %968 }
 0x14f   :  { %6694 = vst [vmem:[#allocation14_spill] sm:$0xff] %v4806_v13 }
 0x154   :  { %738 = vrot.lane.b32.xlu2 %v668_v37, %s4230_s26 }
 0x155   :  { %v4785_v50 = vpop.permute.xlu1 %300  ;;  %v4810_v10 = vpop.permute.xlu0 %948 }
 0x156   :  { %730 = vrot.lane.b32.xlu0 %v666_v33, %s4229_s25  ;;  %v1018_v19 = vpop.permute.xlu2 %1017 }
 0x15c   :  { %774 = vrot.lane.b32.xlu2 %v726_v1, %s4228_s24 }
 0x15d   :  { %v4794_v3 = vpop.permute.xlu1 %312  ;;  %v4812_v32 = vpop.permute.xlu0 %972 }
 0x15e   :  { %754 = vrot.lane.b32.xlu0 %v672_v54, %s4231_s27  ;;  %6696 = vst [vmem:[#allocation16_spill] sm:$0xff] %v4812_v32  ;;  %v1024_v4 = vpop.permute.xlu2 %1023 }
 0x15f   :  { %v1039_v26 = vrot.slane %v1024_v4, 4 }
 0x165   :  { %v4802_v36 = vpop.permute.xlu1 %928  ;;  %v1020_v46 = vpop.permute.xlu0 %1019 }
 0x166   :  { %766 = vrot.lane.b32.xlu0 %v724_v29, %s4230_s26  ;;  %v1053_v15 = vrot.slane %v1020_v46, 4 }
 0x16d   :  { %v4808_v23 = vpop.permute.xlu1 %964  ;;  %v1026_v22 = vpop.permute.xlu0 %1025 }
 0x16e   :  { %6695 = vst [vmem:[#allocation15_spill] sm:$0xff] %v4808_v23 }
 0x175   :  { %v1016_v21 = vpop.permute.xlu1 %1015 }
 0x176   :  { %v1040_v37 = vsel %vm163_vm3, %v1039_v26, %v1016_v21  ;;  %v1041_v63 = vrot.slane %v1016_v21, 4 }
 0x177   :  { %v1046_v33 = vperm.slane %v1040_v37, %v4314_v38 }
 0x178   :  { %v1042_v23 = vsel %vm163_vm3, %v1024_v4, %v1041_v63  ;;  %v1030_v63 = vpop.permute.xlu2 %1029 }
 0x179   :  { %v1065_v29 = vrot.slane %v1046_v33, 4  ;;  %v1050_v37 = vperm.slane %v1042_v23, %v4314_v38 }
 0x17d   :  { %v1022_v40 = vpop.permute.xlu1 %1021 }
 0x17e   :  { %v1109_v39 = vrot.slane %v1022_v40, 4 }
 0x185   :  { %v1028_v58 = vpop.permute.xlu1 %1027 }
 0x186   :  { %v1051_v1 = vrot.slane %v1028_v58, 4  ;;  %v1054_v32 = vsel %vm163_vm3, %v1028_v58, %v1053_v15  ;;  %v1095_v58 = vrot.slane %v1026_v22, 4  ;;  %v1107_v15 = vrot.slane %v1030_v63, 4 }
 0x188   :  { %v1052_v54 = vsel %vm163_vm3, %v1051_v1, %v1020_v46  ;;  %v1062_v46 = vperm.slane %v1054_v32, %v4314_v38 }
 0x189   :  { %v1058_v13 = vperm.slane %v1052_v54, %v4314_v38 }
 0x18a   :  { %v1075_v23 = vrot.slane %v1062_v46, 4 }
 0x18b   :  { %v1063_v20 = vrot.slane %v1058_v13, 4  ;;  %v1066_v61 = vsel %vm163_vm3, %v1058_v13, %v1065_v29  ;;  %v1096_v29 = vsel %vm163_vm3, %v1095_v58, %v1018_v19 }
 0x18c   :  { %v1074_v26 = vperm.slane %v1066_v61, %v4347_v60  ;;  %v434_v61 = vrot.slane %v4606_v55, 4  ;;  %v1097_v55 = vrot.slane %v1018_v19, 4 }
 0x18d   :  { %v1064_v21 = vsel %vm163_vm3, %v1063_v20, %v1046_v33  ;;  %v1110_v20 = vsel %vm163_vm3, %v1030_v63, %v1109_v39  ;;  %v1077_v33 = vrot.slane %v1050_v37, 4  ;;  %v1102_v39 = vperm.slane %v1096_v29, %v4314_v38 }
 0x18e   :  { %1156 = vrot.lane.b32.xlu1 %v1074_v26, %s4225_s21  ;;  %v1089_v1 = vrot.slane %v1074_v26, 4  ;;  %v4827_v4 = vperm.slane %v1064_v21, %v4347_v60  ;;  %v1108_v21 = vsel %vm163_vm3, %v1107_v15, %v1022_v40  ;;  %v1098_v58 = vsel %vm163_vm3, %v1026_v22, %v1097_v55 }
 0x18f   :  { %v1078_v26 = vsel %vm163_vm3, %v1062_v46, %v1077_v33  ;;  %v1121_v19 = vrot.slane %v1102_v39, 4  ;;  %v4865_v55 = vperm.slane %v4672_v52, %v4347_v60 }
 0x190   :  { %v1090_v13 = vsel %vm163_vm3, 0.0, %v1089_v1  ;;  %v1087_v54 = vrot.slane %v4827_v4, 4  ;;  %v1118_v1 = vperm.slane %v1110_v20, %v4314_v38  ;;  %v1086_v63 = vperm.slane %v1078_v26, %v4347_v60 }
 0x191   :  { %1160 = vrot.lane.b32.xlu2 %v1090_v13, %s4230_s26  ;;  %v435_v13 = vsel %vm163_vm3, 0.0, %v434_v61  ;;  %v492_v61 = vrot.slane %v4626_v12, 4  ;;  %v1106_v20 = vperm.slane %v1098_v58, %v4314_v38  ;;  %v669_v12 = vrot.slane %v4702_v51, 4 }
 0x192   :  { %v1088_v32 = vsel %vm163_vm3, 0.0, %v1087_v54  ;;  %v1076_v54 = vsel %vm163_vm3, %v1075_v23, %v1050_v37  ;;  %v1131_v46 = vrot.slane %v1118_v1, 4  ;;  %v1093_v33 = vrot.slane %v1086_v63, 4 }
 0x193   :  { %1152 = vrot.lane.b32.xlu0 %v1088_v32, %s4229_s25  ;;  %v1114_v32 = vperm.slane %v1108_v21, %v4314_v38  ;;  %v1082_v40 = vperm.slane %v1076_v54, %v4347_v60  ;;  %v493_v23 = vsel %vm163_vm3, 0.0, %v492_v61  ;;  %v721_v51 = vrot.slane %v4865_v55, 4 }
 0x194   :  { %v1132_v22 = vsel %vm163_vm3, %v1131_v46, %v1106_v20  ;;  %v1094_v26 = vsel %vm163_vm3, 0.0, %v1093_v33  ;;  %v1133_v61 = vrot.slane %v1106_v20, 4 }
 0x195   :  { %v1122_v37 = vsel %vm163_vm3, %v1114_v32, %v1121_v19  ;;  %v1138_v29 = vperm.slane %v1132_v22, %v4347_v60  ;;  %v722_v19 = vsel %vm163_vm3, 0.0, %v721_v51  ;;  %v1119_v20 = vrot.slane %v1114_v32, 4 }
 0x196   :  { %505 = vrot.lane.b32.xlu1 %v435_v13, %s4230_s26  ;;  %v1130_v15 = vperm.slane %v1122_v37, %v4347_v60  ;;  %v670_v13 = vsel %vm163_vm3, 0.0, %v669_v12  ;;  %v1134_v52 = vsel %vm163_vm3, %v1118_v1, %v1133_v61  ;;  %v1091_v1 = vrot.slane %v1082_v40, 4 }
 0x197   :  { %v1147_v21 = vrot.slane %v1138_v29, 4  ;;  %v1142_v37 = vperm.slane %v1134_v52, %v4347_v60  ;;  %v1120_v12 = vsel %vm163_vm3, %v1119_v20, %v1102_v39 }
 0x198   :  { %v1145_v54 = vrot.slane %v1130_v15, 4 }
 0x199   :  { %1172 = vrot.lane.b32.xlu2 %v1086_v63, %s4226_s22  ;;  %v4868_v63 = vpop.permute.xlu0 %501  ;;  %v1148_v58 = vsel %vm163_vm3, 0.0, %v1147_v21 }
 0x19a   :  { %v1146_v46 = vsel %vm163_vm3, 0.0, %v1145_v54 }
 0x19b   :  { %1164 = vrot.lane.b32.xlu0 %v1082_v40, %s4227_s23 }
 0x19e   :  { %541 = vrot.lane.b32.xlu1 %v493_v23, %s4228_s24  ;;  %v727_v23 = vrot.slane %v4725_v17, 4  ;;  %v1092_v17 = vsel %vm163_vm3, 0.0, %v1091_v1 }
 0x1a0   :  { %v728_v33 = vsel %vm163_vm3, 0.0, %v727_v23 }
 0x1a1   :  { %1184 = vrot.lane.b32.xlu2 %v1130_v15, %s4225_s21  ;;  %v4882_v22 = vpop.permute.xlu0 %537  ;;  %v4887_v15 = vpop.permute.xlu2 %509 }
 0x1a3   :  { %1176 = vrot.lane.b32.xlu0 %v1094_v26, %s4231_s27  ;;  %v4898_v26 = vperm.slane %v1120_v12, %v4347_v60  ;;  %v345_v12 = vsel %vm331_vm4, %v4478_v11, %v4734_v56 }
 0x1a4   :  { %v346_v11 = vsel %vm333_vm5, %v345_v12, %v4717_v42  ;;  %v982_v12 = vsel %vm331_vm4, %v4532_v53, %v4810_v10 }
 0x1a6   :  { %746 = vrot.lane.b32.xlu1 %v670_v13, %s4228_s24 }
 0x1a9   :  { %1196 = vrot.lane.b32.xlu2 %v1148_v58, %s4228_s24  ;;  %v4904_v32 = vpop.permute.xlu2 %545  ;;  %v518_v58 = vpop.permute.xlu1 %517 }
 0x1ab   :  { %1188 = vrot.lane.b32.xlu0 %v1146_v46, %s4230_s26 }
 0x1ae   :  { %758 = vrot.lane.b32.xlu1 %v722_v19, %s4229_s25 }
 0x1b1   :  { %1221 = vrot.lane.b32.xlu2 %v4373_v9, %s4222_s20  ;;  %v4891_v9 = vpop.permute.xlu0 %742  ;;  %v4912_v40 = vpop.permute.xlu2 %750 }
 0x1b2   :  { %v530_v61 = vpop.permute.xlu1 %529 }
 0x1b3   :  { %1200 = vrot.lane.b32.xlu0 %v1142_v37, %s4226_s22 }
 0x1b6   :  { %782 = vrot.lane.b32.xlu1 %v728_v33, %s4231_s27 }
 0x1b9   :  { %1227 = vrot.lane.b32.xlu2 %v4389_v18, %s4222_s20  ;;  %v1143_v18 = vrot.slane %v4898_v26, 4  ;;  %v4908_v39 = vpop.permute.xlu0 %778  ;;  %v4917_v13 = vpop.permute.xlu2 %762 }
 0x1ba   :  { %v735_v19 = vpop.permute.xlu1 %734 }
 0x1bb   :  { %1223 = vrot.lane.b32.xlu0 %v4422_v34, %s4222_s20  ;;  %v1144_v34 = vsel %vm163_vm3, 0.0, %v1143_v18 }
 0x1be   :  { %1168 = vrot.lane.b32.xlu1 %v1092_v17, %s4228_s24 }
 0x1c1   :  { %1233 = vrot.lane.b32.xlu2 %v4359_v2, %s4222_s20  ;;  %v514_v21 = vpop.permute.xlu0 %513  ;;  %v1149_v2 = vrot.slane %v1142_v37, 4  ;;  %v498_v51 = vpop.permute.xlu2 %497 }
 0x1c2   :  { %v4929_v23 = vpop.permute.xlu1 %770 }
 0x1c3   :  { %1229 = vrot.lane.b32.xlu0 %v4355_v0, %s4222_s20  ;;  %v1150_v54 = vsel %vm163_vm3, 0.0, %v1149_v2 }
 0x1c6   :  { %1180 = vrot.lane.b32.xlu1 %v1144_v34, %s4229_s25 }
 0x1c9   :  { %v526_v0 = vpop.permute.xlu0 %525 }
 0x1cb   :  { %1235 = vrot.lane.b32.xlu0 %v4410_v28, %s4222_s20  ;;  %v522_v28 = vpop.permute.xlu2 %521 }
 0x1ce   :  { %1192 = vrot.lane.b32.xlu1 %v1138_v29, %s4227_s23 }
 0x1d1   :  { %v4923_v46 = vpop.permute.xlu0 %549 }
 0x1d3   :  { %v534_v52 = vpop.permute.xlu2 %533 }
 0x1d6   :  { %1204 = vrot.lane.b32.xlu1 %v1150_v54, %s4231_s27 }
 0x1d9   :  { %v731_v29 = vpop.permute.xlu0 %730 }
 0x1db   :  { %v739_v33 = vpop.permute.xlu2 %738 }
 0x1de   :  { %1225 = vrot.lane.b32.xlu1 %v4351_v62, %s4222_s20  ;;  %v332_v62 = vsel %vm331_vm4, %v4519_v25, %v4771_v43  ;;  %v552_v25 = vsel %vm331_vm4, %v4721_v31, %v498_v51  ;;  %v975_v43 = vsel %vm331_vm4, %v4514_v41, %v4767_v30  ;;  %v347_v41 = vsel %vm335_vm6, %v346_v11, %v4794_v3 }
 0x1df   :  { %v553_v31 = vsel %vm333_vm5, %v552_v25, %v4868_v63  ;;  %v348_v3 = vsel %vm337_vm7, %v347_v41, %v4638_v49  ;;  %v6697_v25 = vld [vmem:[#allocation12_spill] sm:$0xff] }
 0x1e0   :  { %v349_v49 = vsel %vm339_vm8, %v348_v3, %v4790_v5 }
 0x1e1   :  { %v4927_v37 = vpop.permute.xlu0 %754  ;;  %v350_v5 = vsel %vm341_vm9, %v349_v49, %v4728_v47 }
 0x1e2   :  { %v351_v47 = vsel %vm343_vm10, %v350_v5, %v4752_v59 }
 0x1e3   :  { %v4950_v18 = vpop.permute.xlu2 %774 }
 0x1e6   :  { %1231 = vrot.lane.b32.xlu1 %v4446_v48, %s4222_s20  ;;  %v334_v48 = vsel %vm333_vm5, %v332_v62, %v4609_v57  ;;  %v559_v57 = vsel %vm331_vm4, %v4748_v8, %v526_v0  ;;  %v976_v8 = vsel %vm333_vm5, %v975_v43, %v4741_v7 }
 0x1e7   :  { %v336_v17 = vsel %vm335_vm6, %v334_v48, %v4778_v16  ;;  %v977_v63 = vsel %vm335_vm6, %v976_v8, %v4802_v36  ;;  %v6701_v8 = vld [vmem:[#allocation15_spill] sm:$0xff] }
 0x1e8   :  { %v338_v34 = vsel %vm337_vm7, %v336_v17, %v4707_v27  ;;  %v560_v27 = vsel %vm333_vm5, %v559_v57, %v530_v61  ;;  %v978_v51 = vsel %vm337_vm7, %v977_v63, %v4667_v44 }
 0x1e9   :  { %v4934_v20 = vpop.permute.xlu0 %766  ;;  %v340_v42 = vsel %vm339_vm8, %v338_v34, %v4705_v24  ;;  %v979_v44 = vsel %vm339_vm8, %v978_v51, %v4800_v14 }
 0x1ea   :  { %v342_v24 = vsel %vm341_vm9, %v340_v42, %v4685_v45  ;;  %v980_v48 = vsel %vm341_vm9, %v979_v44, %v4744_v6  ;;  %v6702_v42 = vld [vmem:[#allocation14_spill] sm:$0xff] }
 0x1eb   :  { %v4990_v61 = vpop.permute.xlu2 %1160 }
 0x1f3   :  { %v5023_v34 = vpop.permute.xlu2 %1172 }
 0x1fb   :  { %v5046_v3 = vpop.permute.xlu2 %1184 }
 0x200   :  { %v4936_v1 = vpop.permute.xlu1 %1156 }
 0x203   :  { %v5060_v49 = vpop.permute.xlu2 %1196 }
 0x205   :  { %v4958_v56 = vpop.permute.xlu0 %1152 }
 0x208   :  { %v506_v16 = vpop.permute.xlu1 %505 }
 0x209   :  { %v554_v30 = vsel %vm335_vm6, %v553_v31, %v506_v16 }
 0x20a   :  { %v555_v2 = vsel %vm337_vm7, %v554_v30, %v4887_v15  ;;  %v561_v15 = vsel %vm335_vm6, %v560_v27, %v534_v52 }
 0x20b   :  { %v556_v54 = vsel %vm339_vm8, %v555_v2, %v514_v21  ;;  %v344_v21 = vsel %vm343_vm10, %v342_v24, %v4785_v50  ;;  %v562_v45 = vsel %vm337_vm7, %v561_v15, %v4882_v22 }
 0x20c   :  { %v557_v7 = vsel %vm341_vm9, %v556_v54, %v518_v58  ;;  %v785_v58 = vsel %vm331_vm4, %v4775_v35, %v731_v29 }
 0x20d   :  { %v558_v0 = vsel %vm343_vm10, %v557_v7, %v522_v28  ;;  %v786_v62 = vsel %vm333_vm5, %v785_v58, %v735_v19  ;;  %v5001_v35 = vpop.permute.xlu0 %1164 }
 0x20e   :  { %v568_v36 = vrot.slane %v558_v0, 4  ;;  %v787_v19 = vsel %vm335_vm6, %v786_v62, %v739_v33  ;;  %v6699_v33 = vld [vmem:[#allocation13_spill] sm:$0xff]  ;;  %v6703_v0 = vld [vmem:[#allocation16_spill] sm:$0xff] }
 0x20f   :  { %v788_v6 = vsel %vm337_vm7, %v787_v19, %v4891_v9  ;;  %v6700_v9 = vld [vmem:[#allocation11_spill] sm:$0xff] }
 0x210   :  { %v573_v28 = vsel %vm572_vm11, %v344_v21, %v568_v36  ;;  %v542_v52 = vpop.permute.xlu1 %541 }
 0x211   :  { %575 = vst [vmem:[#allocation3] sm:$0xff] %v573_v28  ;;  %v563_v50 = vsel %vm339_vm8, %v562_v45, %v542_v52  ;;  %v1222_v28 = vpop.permute.xlu2 %1221 }
 0x212   :  { %v564_v29 = vsel %vm341_vm9, %v563_v50, %v4904_v32  ;;  %v981_v32 = vsel %vm343_vm10, %v980_v48, %v6697_v25 }
 0x213   :  { %v565_v22 = vsel %vm343_vm10, %v564_v29, %v4923_v46  ;;  %v6698_v46 = vld [vmem:[#allocation10_spill] sm:$0xff]  ;;  %v991_v10 = vrot.slane %v981_v32, 4 }
 0x214   :  { %v569_v14 = vrot.slane %v565_v22, 4  ;;  %v983_v43 = vsel %vm333_vm5, %v982_v12, %v6698_v46 }
 0x215   :  { %v984_v11 = vsel %vm335_vm6, %v983_v43, %v6699_v33  ;;  %v5031_v16 = vpop.permute.xlu0 %1176 }
 0x216   :  { %v574_v17 = vsel %vm572_vm11, %v351_v47, %v569_v14  ;;  %v985_v30 = vsel %vm337_vm7, %v984_v11, %v6700_v9  ;;  %v1247_v47 = vrot.slane %v1222_v28, 4 }
 0x217   :  { %576 = vst [vmem:[#allocation3 + $0x68] sm:$0xff] %v574_v17  ;;  %v986_v27 = vsel %vm339_vm8, %v985_v30, %v6701_v8 }
 0x218   :  { %v747_v57 = vpop.permute.xlu1 %746  ;;  %v987_v63 = vsel %vm341_vm9, %v986_v27, %v6702_v42 }
 0x219   :  { %v789_v53 = vsel %vm339_vm8, %v788_v6, %v747_v57  ;;  %v988_v15 = vsel %vm343_vm10, %v987_v63, %v6703_v0  ;;  %v1228_v44 = vpop.permute.xlu2 %1227 }
 0x21a   :  { %v790_v59 = vsel %vm341_vm9, %v789_v53, %v4912_v40  ;;  %v992_v51 = vrot.slane %v988_v15, 4 }
 0x21b   :  { %v791_v31 = vsel %vm343_vm10, %v790_v59, %v4927_v37 }
 0x21c   :  { %v995_v41 = vsel %vm572_vm11, %v791_v31, %v991_v10 }
 0x21d   :  { %997 = vst [vmem:[#allocation3 + $0x10] sm:$0xff] %v995_v41  ;;  %v5054_v24 = vpop.permute.xlu0 %1188 }
 0x220   :  { %v759_v2 = vpop.permute.xlu1 %758 }
 0x221   :  { %v792_v40 = vsel %vm331_vm4, %v4865_v55, %v759_v2  ;;  %v1234_v29 = vpop.permute.xlu2 %1233 }
 0x222   :  { %v793_v37 = vsel %vm333_vm5, %v792_v40, %v4917_v13  ;;  %v1257_v14 = vrot.slane %v1234_v29, 4 }
 0x223   :  { %v794_v54 = vsel %vm335_vm6, %v793_v37, %v4934_v20 }
 0x224   :  { %v795_v7 = vsel %vm337_vm7, %v794_v54, %v4929_v23  ;;  %v1315_v54 = vrot.slane %v1228_v44, 4 }
 0x225   :  { %v796_v55 = vsel %vm339_vm8, %v795_v7, %v4950_v18  ;;  %v5062_v23 = vpop.permute.xlu0 %1200 }
 0x226   :  { %v797_v13 = vsel %vm341_vm9, %v796_v55, %v4908_v39 }
 0x228   :  { %v783_v36 = vpop.permute.xlu1 %782 }
 0x229   :  { %v798_v20 = vsel %vm343_vm10, %v797_v13, %v783_v36  ;;  %v5098_v36 = vld [vmem:[#allocation2 + $0x4c] sm:$0xff] }
 0x22a   :  { %v996_v21 = vsel %vm572_vm11, %v798_v20, %v992_v51 }
 0x22b   :  { %998 = vst [vmem:[#allocation3 + $0x28] sm:$0xff] %v996_v21 }
 0x22d   :  { %v1224_v45 = vpop.permute.xlu0 %1223 }
 0x22e   :  { %v1303_v20 = vrot.slane %v1224_v45, 4 }
 0x230   :  { %v5064_v58 = vpop.permute.xlu1 %1168 }
 0x235   :  { %v1230_v39 = vpop.permute.xlu0 %1229 }
 0x236   :  { %v1245_v50 = vrot.slane %v1230_v39, 4  ;;  %v1248_v43 = vsel %vm163_vm3, %v1230_v39, %v1247_v47  ;;  %v5115_v47 = vld [vmem:[#allocation2 + $0x1c] sm:$0xff] }
 0x237   :  { %v1256_v11 = vperm.slane %v1248_v43, %v4314_v38 }
 0x238   :  { %v5066_v18 = vpop.permute.xlu1 %1180  ;;  %v1246_v62 = vsel %vm163_vm3, %v1245_v50, %v1222_v28 }
 0x239   :  { %v1252_v22 = vperm.slane %v1246_v62, %v4314_v38  ;;  %v1283_v7 = vrot.slane %v1256_v11, 4 }
 0x23b   :  { %v1271_v46 = vrot.slane %v1252_v22, 4 }
 0x23d   :  { %v1236_v48 = vpop.permute.xlu0 %1235 }
 0x23e   :  { %v1313_v19 = vrot.slane %v1236_v48, 4  ;;  %v1316_v21 = vsel %vm163_vm3, %v1236_v48, %v1315_v54 }
 0x240   :  { %v5068_v52 = vpop.permute.xlu1 %1192  ;;  %v1314_v59 = vsel %vm163_vm3, %v1313_v19, %v1228_v44  ;;  %v5117_v19 = vld [vmem:[#allocation2 + $0x34] sm:$0xff] }
 0x241   :  { %v1320_v8 = vperm.slane %v1314_v59, %v4314_v38 }
 0x243   :  { %v1325_v55 = vrot.slane %v1320_v8, 4 }
 0x248   :  { %v5070_v5 = vpop.permute.xlu1 %1204 }
 0x250   :  { %v1226_v12 = vpop.permute.xlu1 %1225 }
 0x251   :  { %v1258_v17 = vsel %vm163_vm3, %v1257_v14, %v1226_v12  ;;  %v1259_v25 = vrot.slane %v1226_v12, 4 }
 0x252   :  { %v1264_v32 = vperm.slane %v1258_v17, %v4314_v38 }
 0x253   :  { %v1260_v6 = vsel %vm163_vm3, %v1234_v29, %v1259_v25  ;;  %v1457_v29 = vrot.slane %v5098_v36, 4 }
 0x254   :  { %v1268_v57 = vperm.slane %v1260_v6, %v4314_v38  ;;  %v1269_v53 = vrot.slane %v1264_v32, 4  ;;  %v1272_v10 = vsel %vm163_vm3, %v1264_v32, %v1271_v46  ;;  %v1445_v46 = vrot.slane %v5117_v19, 4 }
 0x255   :  { %v1280_v33 = vperm.slane %v1272_v10, %v4347_v60  ;;  %v1458_v17 = vsel %vm163_vm3, %v1457_v29, %v5115_v47  ;;  %v5160_v29 = vld [vmem:[#allocation2 + $0x3c] sm:$0xff] }
 0x256   :  { %v1281_v31 = vrot.slane %v1268_v57, 4  ;;  %v1270_v41 = vsel %vm163_vm3, %v1269_v53, %v1252_v22  ;;  %v1284_v28 = vsel %vm163_vm3, %v1268_v57, %v1283_v7  ;;  %v1324_v22 = vperm.slane %v1316_v21, %v4314_v38  ;;  %v5126_v57 = vld [vmem:[#allocation2 + $0x4] sm:$0xff] }
 0x257   :  { %1362 = vrot.lane.b32.xlu2 %v1280_v33, %s4225_s21  ;;  %v1295_v9 = vrot.slane %v1280_v33, 4  ;;  %v5086_v30 = vperm.slane %v1270_v41, %v4347_v60  ;;  %v1464_v53 = vperm.slane %v1458_v17, %v4314_v38  ;;  %v1501_v17 = vrot.slane %v5160_v29, 4 }
 0x258   :  { %v1232_v27 = vpop.permute.xlu1 %1231  ;;  %v1282_v2 = vsel %vm163_vm3, %v1281_v31, %v1256_v11  ;;  %v1337_v25 = vrot.slane %v1324_v22, 4  ;;  %v1446_v31 = vsel %vm163_vm3, %v1445_v46, %v5126_v57  ;;  %v5172_v46 = vld [vmem:[#allocation2 + $0xc] sm:$0xff] }
 0x259   :  { %v1301_v40 = vrot.slane %v1232_v27, 4  ;;  %v1296_v42 = vsel %vm163_vm3, 0.0, %v1295_v9  ;;  %v1293_v63 = vrot.slane %v5086_v30, 4  ;;  %v1288_v37 = vperm.slane %v1282_v2, %v4347_v60 }
 0x25a   :  { %1366 = vrot.lane.b32.xlu0 %v1296_v42, %s4230_s26  ;;  %v1304_v50 = vsel %vm163_vm3, %v1232_v27, %v1303_v20  ;;  %v1469_v41 = vrot.slane %v1464_v53, 4  ;;  %v1452_v27 = vperm.slane %v1446_v31, %v4314_v38 }
 0x25b   :  { %v1302_v0 = vsel %vm163_vm3, %v1301_v40, %v1224_v45  ;;  %v1294_v15 = vsel %vm163_vm3, 0.0, %v1293_v63  ;;  %v1297_v13 = vrot.slane %v1288_v37, 4  ;;  %v1292_v45 = vperm.slane %v1284_v28, %v4347_v60 }
 0x25c   :  { %v1308_v51 = vperm.slane %v1302_v0, %v4314_v38  ;;  %1358 = vrot.lane.b32.xlu1 %v1294_v15, %s4229_s25  ;;  %v1312_v14 = vperm.slane %v1304_v50, %v4314_v38  ;;  %v1470_v42 = vsel %vm163_vm3, %v1469_v41, %v1452_v27  ;;  %v1471_v0 = vrot.slane %v1452_v27, 4 }
 0x25d   :  { %v1298_v44 = vsel %vm163_vm3, 0.0, %v1297_v13  ;;  %v1299_v59 = vrot.slane %v1292_v45, 4  ;;  %v5145_v7 = vperm.slane %v1470_v42, %v4347_v60  ;;  %v1447_v15 = vrot.slane %v5126_v57, 4 }
 0x25e   :  { %v1326_v39 = vsel %vm163_vm3, %v1325_v55, %v1308_v51  ;;  %v1327_v48 = vrot.slane %v1308_v51, 4  ;;  %v1338_v6 = vsel %vm163_vm3, %v1337_v25, %v1312_v14  ;;  %v1339_v10 = vrot.slane %v1312_v14, 4 }
 0x25f   :  { %1374 = vrot.lane.b32.xlu2 %v1298_v44, %s4228_s24  ;;  %v5107_v62 = vperm.slane %v1326_v39, %v4347_v60  ;;  %v1344_v11 = vperm.slane %v1338_v6, %v4347_v60  ;;  %v1300_v9 = vsel %vm163_vm3, 0.0, %v1299_v59  ;;  %v1472_v20 = vsel %vm163_vm3, %v1464_v53, %v1471_v0 }
 0x260   :  { %v1328_v32 = vsel %vm163_vm3, %v1320_v8, %v1327_v48  ;;  %v1340_v8 = vsel %vm163_vm3, %v1324_v22, %v1339_v10  ;;  %v1493_v21 = vrot.slane %v5145_v7, 4  ;;  %v1448_v28 = vsel %vm163_vm3, %v5117_v19, %v1447_v15  ;;  %v5162_v22 = vld [vmem:[#allocation2 + $0x54] sm:$0xff] }
 0x261   :  { %v1349_v12 = vrot.slane %v5107_v62, 4  ;;  %v1336_v33 = vperm.slane %v1328_v32, %v4347_v60  ;;  %v1353_v2 = vrot.slane %v1344_v11, 4  ;;  %v1348_v40 = vperm.slane %v1340_v8, %v4347_v60 }
 0x262   :  { %1378 = vrot.lane.b32.xlu0 %v1292_v45, %s4226_s22  ;;  %v1480_v50 = vperm.slane %v1472_v20, %v4347_v60  ;;  %v1456_v45 = vperm.slane %v1448_v28, %v4314_v38  ;;  %v1494_v48 = vsel %vm163_vm3, 0.0, %v1493_v21  ;;  %v1513_v25 = vrot.slane %v5162_v22, 4 }
 0x263   :  { %v1350_v43 = vsel %vm163_vm3, 0.0, %v1349_v12  ;;  %v1351_v63 = vrot.slane %v1336_v33, 4  ;;  %v1354_v54 = vsel %vm163_vm3, 0.0, %v1353_v2  ;;  %v1355_v55 = vrot.slane %v1348_v40, 4  ;;  %v5167_v12 = vld [vmem:[#allocation2 + $0x24] sm:$0xff] }
 0x264   :  { %1370 = vrot.lane.b32.xlu1 %v1288_v37, %s4227_s23  ;;  %v1459_v37 = vrot.slane %v5115_v47, 4  ;;  %v1495_v32 = vrot.slane %v1480_v50, 4  ;;  %v1515_v6 = vrot.slane %v5167_v12, 4  ;;  %v1502_v10 = vsel %vm163_vm3, %v1501_v17, %v5172_v46 }
 0x265   :  { %v1352_v13 = vsel %vm163_vm3, 0.0, %v1351_v63  ;;  %v1356_v39 = vsel %vm163_vm3, 0.0, %v1355_v55  ;;  %v1514_v59 = vsel %vm163_vm3, %v1513_v25, %v5167_v12  ;;  %v1508_v41 = vperm.slane %v1502_v10, %v4314_v38 }
 0x266   :  { %v1460_v51 = vsel %vm163_vm3, %v5098_v36, %v1459_v37  ;;  %v1516_v8 = vsel %vm163_vm3, %v5162_v22, %v1515_v6  ;;  %v1503_v2 = vrot.slane %v5172_v46, 4 }
 0x267   :  { %1386 = vrot.lane.b32.xlu2 %v1350_v43, %s4229_s25  ;;  %v1468_v44 = vperm.slane %v1460_v51, %v4314_v38  ;;  %v1483_v43 = vrot.slane %v1456_v45, 4  ;;  %v1527_v42 = vrot.slane %v1508_v41, 4 }
 0x268   :  { %v1504_v0 = vsel %vm163_vm3, %v5160_v29, %v1503_v2  ;;  %v1207_v2 = vsel %vm331_vm4, %v4827_v4, %v4958_v56 }
 0x269   :  { %v1481_v14 = vrot.slane %v1468_v44, 4  ;;  %v1512_v21 = vperm.slane %v1504_v0, %v4314_v38 }
 0x26a   :  { %1390 = vrot.lane.b32.xlu0 %v1336_v33, %s4225_s21  ;;  %v1496_v33 = vsel %vm163_vm3, 0.0, %v1495_v32 }
 0x26b   :  { %v1482_v53 = vsel %vm163_vm3, %v1481_v14, %v1456_v45  ;;  %v1539_v32 = vrot.slane %v1512_v21, 4 }
 0x26c   :  { %1382 = vrot.lane.b32.xlu1 %v1300_v9, %s4231_s27  ;;  %v1488_v31 = vperm.slane %v1482_v53, %v4347_v60  ;;  %v1520_v9 = vperm.slane %v1514_v59, %v4314_v38 }
 0x26e   :  { %v1525_v63 = vrot.slane %v1520_v9, 4  ;;  %v1497_v15 = vrot.slane %v1488_v31, 4 }
 0x26f   :  { %1398 = vrot.lane.b32.xlu2 %v1344_v11, %s4227_s23  ;;  %v1484_v11 = vsel %vm163_vm3, %v1468_v44, %v1483_v43 }
 0x270   :  { %v1492_v27 = vperm.slane %v1484_v11, %v4347_v60  ;;  %v1526_v51 = vsel %vm163_vm3, %v1525_v63, %v1508_v41  ;;  %v1498_v28 = vsel %vm163_vm3, 0.0, %v1497_v15 }
 0x271   :  { %v5205_v44 = vperm.slane %v1526_v51, %v4347_v60 }
 0x272   :  { %1402 = vrot.lane.b32.xlu0 %v1354_v54, %s4228_s24  ;;  %v1499_v37 = vrot.slane %v1492_v27, 4  ;;  %v1528_v54 = vsel %vm163_vm3, %v1520_v9, %v1527_v42 }
 0x273   :  { %v1536_v20 = vperm.slane %v1528_v54, %v4347_v60 }
 0x274   :  { %1394 = vrot.lane.b32.xlu1 %v1352_v13, %s4230_s26  ;;  %v1500_v13 = vsel %vm163_vm3, 0.0, %v1499_v37  ;;  %v1208_v37 = vsel %vm333_vm5, %v1207_v2, %v4936_v1 }
 0x277   :  { %1410 = vrot.lane.b32.xlu2 %v1356_v39, %s4231_s27 }
 0x27a   :  { %1558 = vrot.lane.b32.xlu0 %v1494_v48, %s4229_s25  ;;  %v1549_v48 = vrot.slane %v5205_v44, 4 }
 0x27c   :  { %1406 = vrot.lane.b32.xlu1 %v1348_v40, %s4226_s22  ;;  %v1524_v40 = vperm.slane %v1516_v8, %v4314_v38  ;;  %v1550_v25 = vsel %vm163_vm3, 0.0, %v1549_v48 }
 0x27e   :  { %v1537_v55 = vrot.slane %v1524_v40, 4  ;;  %v1540_v43 = vsel %vm163_vm3, %v1524_v40, %v1539_v32 }
 0x27f   :  { %1566 = vrot.lane.b32.xlu2 %v1496_v33, %s4230_s26  ;;  %v1548_v53 = vperm.slane %v1540_v43, %v4347_v60 }
 0x280   :  { %v1538_v39 = vsel %vm163_vm3, %v1537_v55, %v1512_v21  ;;  %v1209_v55 = vsel %vm335_vm6, %v1208_v37, %v4990_v61 }
 0x281   :  { %v1544_v45 = vperm.slane %v1538_v39, %v4347_v60  ;;  %v1555_v10 = vrot.slane %v1548_v53, 4 }
 0x282   :  { %1570 = vrot.lane.b32.xlu0 %v1488_v31, %s4227_s23 }
 0x283   :  { %v1553_v17 = vrot.slane %v1544_v45, 4  ;;  %v1556_v59 = vsel %vm163_vm3, 0.0, %v1555_v10 }
 0x284   :  { %1562 = vrot.lane.b32.xlu1 %v1480_v50, %s4225_s21  ;;  %v1551_v50 = vrot.slane %v1536_v20, 4 }
 0x285   :  { %v1554_v6 = vsel %vm163_vm3, 0.0, %v1553_v17 }
 0x286   :  { %v1552_v14 = vsel %vm163_vm3, 0.0, %v1551_v50 }
 0x287   :  { %1578 = vrot.lane.b32.xlu2 %v1492_v27, %s4226_s22 }
 0x28a   :  { %1582 = vrot.lane.b32.xlu0 %v1500_v13, %s4231_s27 }
 0x28c   :  { %1574 = vrot.lane.b32.xlu1 %v1498_v28, %s4228_s24 }
 0x28f   :  { %1590 = vrot.lane.b32.xlu2 %v1536_v20, %s4225_s21 }
 0x292   :  { %1594 = vrot.lane.b32.xlu0 %v1552_v14, %s4230_s26 }
 0x294   :  { %1586 = vrot.lane.b32.xlu1 %v1550_v25, %s4229_s25 }
 0x297   :  { %1602 = vrot.lane.b32.xlu2 %v1554_v6, %s4228_s24 }
 0x29a   :  { %1606 = vrot.lane.b32.xlu0 %v1548_v53, %s4226_s22 }
 0x29c   :  { %1598 = vrot.lane.b32.xlu1 %v1544_v45, %s4227_s23 }
 0x29f   :  { %1635 = vrot.lane.b32.xlu2 %v5126_v57, %s4221_s0 }
 0x2a2   :  { %1637 = vrot.lane.b32.xlu0 %v5172_v46, %s4221_s0 }
 0x2a4   :  { %1610 = vrot.lane.b32.xlu1 %v1556_v59, %s4231_s27 }
 0x2a7   :  { %1641 = vrot.lane.b32.xlu2 %v5167_v12, %s4221_s0 }
 0x2aa   :  { %1643 = vrot.lane.b32.xlu0 %v5117_v19, %s4221_s0 }
 0x2ac   :  { %1639 = vrot.lane.b32.xlu1 %v5115_v47, %s4221_s0 }
 0x2af   :  { %1647 = vrot.lane.b32.xlu2 %v5098_v36, %s4221_s0 }
 0x2b1   :  { %v1363_v33 = vpop.permute.xlu2 %1362 }
 0x2b2   :  { %1649 = vrot.lane.b32.xlu0 %v5162_v22, %s4221_s0 }
 0x2b4   :  { %1645 = vrot.lane.b32.xlu1 %v5160_v29, %s4221_s0 }
 0x2b9   :  { %v1375_v11 = vpop.permute.xlu2 %1374 }
 0x2c1   :  { %v1387_v31 = vpop.permute.xlu2 %1386 }
 0x2c9   :  { %v1399_v41 = vpop.permute.xlu2 %1398 }
 0x2cc   :  { %v1367_v9 = vpop.permute.xlu0 %1366 }
 0x2ce   :  { %v1359_v8 = vpop.permute.xlu1 %1358 }
 0x2cf   :  { %v1413_v27 = vsel %vm331_vm4, %v5086_v30, %v1359_v8  ;;  %v1210_v30 = vsel %vm337_vm7, %v1209_v55, %v5001_v35 }
 0x2d0   :  { %v1414_v40 = vsel %vm333_vm5, %v1413_v27, %v1363_v33  ;;  %v1211_v4 = vsel %vm339_vm8, %v1210_v30, %v5064_v58  ;;  %v1214_v58 = vsel %vm331_vm4, %v4898_v26, %v5066_v18 }
 0x2d1   :  { %v1411_v42 = vpop.permute.xlu2 %1410  ;;  %v1415_v0 = vsel %vm335_vm6, %v1414_v40, %v1367_v9  ;;  %v1212_v1 = vsel %vm341_vm9, %v1211_v4, %v5023_v34  ;;  %v1420_v34 = vsel %vm331_vm4, %v5107_v62, %v1387_v31  ;;  %v1215_v48 = vsel %vm333_vm5, %v1214_v58, %v5046_v3 }
 0x2d2   :  { %v1213_v35 = vsel %vm343_vm10, %v1212_v1, %v5031_v16  ;;  %v1216_v25 = vsel %vm335_vm6, %v1215_v48, %v5054_v24 }
 0x2d3   :  { %v1217_v26 = vsel %vm337_vm7, %v1216_v25, %v5068_v52 }
 0x2d4   :  { %v1379_v63 = vpop.permute.xlu0 %1378  ;;  %v1218_v62 = vsel %vm339_vm8, %v1217_v26, %v5060_v49 }
 0x2d5   :  { %v1219_v24 = vsel %vm341_vm9, %v1218_v62, %v5062_v23 }
 0x2d6   :  { %v1371_v54 = vpop.permute.xlu1 %1370  ;;  %v1220_v52 = vsel %vm343_vm10, %v1219_v24, %v5070_v5 }
 0x2d7   :  { %v1416_v15 = vsel %vm337_vm7, %v1415_v0, %v1371_v54 }
 0x2d8   :  { %v1417_v56 = vsel %vm339_vm8, %v1416_v15, %v1375_v11 }
 0x2d9   :  { %v5259_v13 = vpop.permute.xlu2 %1566  ;;  %v1418_v20 = vsel %vm341_vm9, %v1417_v56, %v1379_v63 }
 0x2dc   :  { %v1391_v51 = vpop.permute.xlu0 %1390 }
 0x2dd   :  { %v1421_v14 = vsel %vm333_vm5, %v1420_v34, %v1391_v51 }
 0x2de   :  { %v1383_v21 = vpop.permute.xlu1 %1382 }
 0x2df   :  { %v1419_v28 = vsel %vm343_vm10, %v1418_v20, %v1383_v21 }
 0x2e0   :  { %v1429_v61 = vrot.slane %v1419_v28, 4 }
 0x2e1   :  { %v5276_v17 = vpop.permute.xlu2 %1578 }
 0x2e2   :  { %v5266_v39 = vsel %vm572_vm11, %v1213_v35, %v1429_v61 }
 0x2e4   :  { %v1403_v50 = vpop.permute.xlu0 %1402 }
 0x2e6   :  { %v1395_v45 = vpop.permute.xlu1 %1394 }
 0x2e7   :  { %v1422_v16 = vsel %vm335_vm6, %v1421_v14, %v1395_v45 }
 0x2e8   :  { %v1423_v18 = vsel %vm337_vm7, %v1422_v16, %v1399_v41 }
 0x2e9   :  { %v1424_v3 = vsel %vm339_vm8, %v1423_v18, %v1403_v50  ;;  %v5295_v59 = vpop.permute.xlu2 %1590 }
 0x2ec   :  { %v5284_v32 = vpop.permute.xlu0 %1558 }
 0x2ee   :  { %v1407_v43 = vpop.permute.xlu1 %1406 }
 0x2ef   :  { %v1425_v6 = vsel %vm341_vm9, %v1424_v3, %v1407_v43 }
 0x2f0   :  { %v1426_v53 = vsel %vm343_vm10, %v1425_v6, %v1411_v42 }
 0x2f1   :  { %v1430_v10 = vrot.slane %v1426_v53, 4  ;;  %v5304_v31 = vpop.permute.xlu2 %1602 }
 0x2f3   :  { %v5298_v33 = vsel %vm572_vm11, %v1220_v52, %v1430_v10 }
 0x2f4   :  { %v5300_v49 = vpop.permute.xlu0 %1570 }
 0x2f6   :  { %v5302_v11 = vpop.permute.xlu1 %1562 }
 0x2f9   :  { %v1636_v8 = vpop.permute.xlu2 %1635 }
 0x2fa   :  { %v1661_v30 = vrot.slane %v1636_v8, 4 }
 0x2fc   :  { %v5306_v41 = vpop.permute.xlu0 %1582 }
 0x2fe   :  { %v5308_v9 = vpop.permute.xlu1 %1574 }
 0x301   :  { %v1642_v40 = vpop.permute.xlu2 %1641 }
 0x302   :  { %v1729_v10 = vrot.slane %v1642_v40, 4 }
 0x304   :  { %v5310_v23 = vpop.permute.xlu0 %1594 }
 0x306   :  { %v5312_v27 = vpop.permute.xlu1 %1586 }
 0x309   :  { %v1648_v37 = vpop.permute.xlu2 %1647 }
 0x30a   :  { %v1671_v0 = vrot.slane %v1648_v37, 4 }
 0x30c   :  { %v5314_v5 = vpop.permute.xlu0 %1606 }
 0x30e   :  { %v5316_v2 = vpop.permute.xlu1 %1598 }
 0x314   :  { %v1638_v42 = vpop.permute.xlu0 %1637 }
 0x316   :  { %v5318_v63 = vpop.permute.xlu1 %1610 }
 0x31c   :  { %v1644_v54 = vpop.permute.xlu0 %1643 }
 0x31d   :  { %v1659_v15 = vrot.slane %v1644_v54, 4  ;;  %v1662_v21 = vsel %vm163_vm3, %v1644_v54, %v1661_v30 }
 0x31e   :  { %v1640_v55 = vpop.permute.xlu1 %1639  ;;  %v1670_v50 = vperm.slane %v1662_v21, %v4314_v38 }
 0x31f   :  { %v1660_v4 = vsel %vm163_vm3, %v1659_v15, %v1636_v8  ;;  %v1672_v56 = vsel %vm163_vm3, %v1671_v0, %v1640_v55  ;;  %v1673_v51 = vrot.slane %v1640_v55, 4 }
 0x320   :  { %v1666_v1 = vperm.slane %v1660_v4, %v4314_v38  ;;  %v1678_v20 = vperm.slane %v1672_v56, %v4314_v38  ;;  %v1697_v55 = vrot.slane %v1670_v50, 4  ;;  %v1717_v56 = vrot.slane %v1638_v42, 4 }
 0x321   :  { %v1674_v28 = vsel %vm163_vm3, %v1648_v37, %v1673_v51 }
 0x322   :  { %v1685_v61 = vrot.slane %v1666_v1, 4  ;;  %v1682_v35 = vperm.slane %v1674_v28, %v4314_v38  ;;  %v1683_v58 = vrot.slane %v1678_v20, 4 }
 0x324   :  { %v1695_v34 = vrot.slane %v1682_v35, 4  ;;  %v1650_v45 = vpop.permute.xlu0 %1649  ;;  %v1686_v48 = vsel %vm163_vm3, %v1678_v20, %v1685_v61  ;;  %v1684_v14 = vsel %vm163_vm3, %v1683_v58, %v1666_v1  ;;  %v1698_v51 = vsel %vm163_vm3, %v1682_v35, %v1697_v55 }
 0x325   :  { %v1727_v16 = vrot.slane %v1650_v45, 4  ;;  %v1694_v25 = vperm.slane %v1686_v48, %v4347_v60  ;;  %v5332_v26 = vperm.slane %v1684_v14, %v4347_v60  ;;  %v1730_v30 = vsel %vm163_vm3, %v1650_v45, %v1729_v10 }
 0x326   :  { %v1646_v18 = vpop.permute.xlu1 %1645  ;;  %v1696_v62 = vsel %vm163_vm3, %v1695_v34, %v1670_v50  ;;  %v1738_v1 = vperm.slane %v1730_v30, %v4314_v38  ;;  %v1706_v61 = vperm.slane %v1698_v51, %v4347_v60 }
 0x327   :  { %v1728_v3 = vsel %vm163_vm3, %v1727_v16, %v1642_v40  ;;  %v1715_v43 = vrot.slane %v1646_v18, 4  ;;  %1776 = vrot.lane.b32.xlu2 %v1694_v25, %s4225_s21  ;;  %v1709_v6 = vrot.slane %v1694_v25, 4  ;;  %v1707_v24 = vrot.slane %v5332_v26, 4 }
 0x328   :  { %v1734_v53 = vperm.slane %v1728_v3, %v4314_v38  ;;  %v1702_v37 = vperm.slane %v1696_v62, %v4347_v60  ;;  %v1718_v28 = vsel %vm163_vm3, %v1646_v18, %v1717_v56  ;;  %v1751_v50 = vrot.slane %v1738_v1, 4 }
 0x329   :  { %v1716_v52 = vsel %vm163_vm3, %v1715_v43, %v1638_v42  ;;  %v1710_v8 = vsel %vm163_vm3, 0.0, %v1709_v6  ;;  %v1708_v15 = vsel %vm163_vm3, 0.0, %v1707_v24  ;;  %v1726_v34 = vperm.slane %v1718_v28, %v4314_v38 }
 0x32a   :  { %v1739_v54 = vrot.slane %v1734_v53, 4  ;;  %v1722_v0 = vperm.slane %v1716_v52, %v4314_v38  ;;  %1780 = vrot.lane.b32.xlu0 %v1710_v8, %s4230_s26  ;;  %1772 = vrot.lane.b32.xlu1 %v1708_v15, %s4229_s25  ;;  %v1711_v4 = vrot.slane %v1702_v37, 4  ;;  %v1713_v48 = vrot.slane %v1706_v61, 4 }
 0x32b   :  { %v1752_v14 = vsel %vm163_vm3, %v1751_v50, %v1726_v34  ;;  %v1753_v16 = vrot.slane %v1726_v34, 4 }
 0x32c   :  { %v1740_v40 = vsel %vm163_vm3, %v1739_v54, %v1722_v0  ;;  %v1712_v20 = vsel %vm163_vm3, 0.0, %v1711_v4  ;;  %v1741_v58 = vrot.slane %v1722_v0, 4  ;;  %v1758_v18 = vperm.slane %v1752_v14, %v4347_v60 }
 0x32d   :  { %v5352_v21 = vperm.slane %v1740_v40, %v4347_v60  ;;  %v1714_v62 = vsel %vm163_vm3, 0.0, %v1713_v48  ;;  %v1754_v3 = vsel %vm163_vm3, %v1738_v1, %v1753_v16 }
 0x32e   :  { %v1742_v35 = vsel %vm163_vm3, %v1734_v53, %v1741_v58  ;;  %v1767_v43 = vrot.slane %v1758_v18, 4  ;;  %v1762_v53 = vperm.slane %v1754_v3, %v4347_v60 }
 0x32f   :  { %1788 = vrot.lane.b32.xlu2 %v1712_v20, %s4228_s24  ;;  %v1763_v42 = vrot.slane %v5352_v21, 4  ;;  %v1750_v25 = vperm.slane %v1742_v35, %v4347_v60 }
 0x330   :  { %v1768_v24 = vsel %vm163_vm3, 0.0, %v1767_v43  ;;  %v1769_v52 = vrot.slane %v1762_v53, 4 }
 0x331   :  { %v1764_v45 = vsel %vm163_vm3, 0.0, %v1763_v42  ;;  %v1765_v6 = vrot.slane %v1750_v25, 4 }
 0x332   :  { %1792 = vrot.lane.b32.xlu0 %v1706_v61, %s4226_s22  ;;  %1784 = vrot.lane.b32.xlu1 %v1702_v37, %s4227_s23  ;;  %v1770_v8 = vsel %vm163_vm3, 0.0, %v1769_v52 }
 0x333   :  { %v1766_v10 = vsel %vm163_vm3, 0.0, %v1765_v6 }
 0x337   :  { %1800 = vrot.lane.b32.xlu2 %v1764_v45, %s4229_s25 }
 0x33a   :  { %1804 = vrot.lane.b32.xlu0 %v1750_v25, %s4225_s21  ;;  %1796 = vrot.lane.b32.xlu1 %v1714_v62, %s4231_s27 }
 0x33f   :  { %1812 = vrot.lane.b32.xlu2 %v1758_v18, %s4227_s23 }
 0x342   :  { %1816 = vrot.lane.b32.xlu0 %v1768_v24, %s4228_s24  ;;  %1808 = vrot.lane.b32.xlu1 %v1766_v10, %s4230_s26 }
 0x347   :  { %1824 = vrot.lane.b32.xlu2 %v1770_v8, %s4231_s27 }
 0x34a   :  { %1867 = vrot.lane.b32.xlu0 %v5126_v57, %s4222_s20  ;;  %1820 = vrot.lane.b32.xlu1 %v1762_v53, %s4226_s22 }
 0x34f   :  { %1871 = vrot.lane.b32.xlu2 %v5115_v47, %s4222_s20 }
 0x352   :  { %1873 = vrot.lane.b32.xlu0 %v5167_v12, %s4222_s20  ;;  %1869 = vrot.lane.b32.xlu1 %v5172_v46, %s4222_s20 }
 0x357   :  { %1877 = vrot.lane.b32.xlu2 %v5160_v29, %s4222_s20  ;;  %v1613_v29 = vsel %vm331_vm4, %v5145_v7, %v5284_v32 }
 0x35a   :  { %1879 = vrot.lane.b32.xlu0 %v5098_v36, %s4222_s20  ;;  %1875 = vrot.lane.b32.xlu1 %v5117_v19, %s4222_s20  ;;  %v1614_v36 = vsel %vm333_vm5, %v1613_v29, %v5302_v11 }
 0x362   :  { %1881 = vrot.lane.b32.xlu1 %v5162_v22, %s4222_s20  ;;  %v1615_v22 = vsel %vm335_vm6, %v1614_v36, %v5259_v13 }
 0x381   :  { %v1777_v57 = vpop.permute.xlu2 %1776 }
 0x389   :  { %v1789_v54 = vpop.permute.xlu2 %1788 }
 0x391   :  { %v1801_v32 = vpop.permute.xlu2 %1800 }
 0x399   :  { %v1813_v20 = vpop.permute.xlu2 %1812 }
 0x39c   :  { %v1781_v47 = vpop.permute.xlu0 %1780  ;;  %v1773_v37 = vpop.permute.xlu1 %1772 }
 0x39d   :  { %v1827_v12 = vsel %vm331_vm4, %v5332_v26, %v1773_v37  ;;  %v1616_v26 = vsel %vm337_vm7, %v1615_v22, %v5300_v49 }
 0x39e   :  { %v1828_v46 = vsel %vm333_vm5, %v1827_v12, %v1777_v57  ;;  %v1617_v7 = vsel %vm339_vm8, %v1616_v26, %v5308_v9  ;;  %v1620_v9 = vsel %vm331_vm4, %v5205_v44, %v5312_v27 }
 0x39f   :  { %v1829_v15 = vsel %vm335_vm6, %v1828_v46, %v1781_v47  ;;  %v1618_v4 = vsel %vm341_vm9, %v1617_v7, %v5276_v17  ;;  %v1834_v17 = vsel %vm331_vm4, %v5352_v21, %v1801_v32  ;;  %v1621_v58 = vsel %vm333_vm5, %v1620_v9, %v5295_v59 }
 0x3a0   :  { %v1619_v1 = vsel %vm343_vm10, %v1618_v4, %v5306_v41  ;;  %v1622_v34 = vsel %vm335_vm6, %v1621_v58, %v5310_v23 }
 0x3a1   :  { %v1623_v42 = vsel %vm337_vm7, %v1622_v34, %v5316_v2  ;;  %v1825_v59 = vpop.permute.xlu2 %1824 }
 0x3a2   :  { %v1624_v21 = vsel %vm339_vm8, %v1623_v42, %v5304_v31 }
 0x3a3   :  { %v1625_v23 = vsel %vm341_vm9, %v1624_v21, %v5314_v5 }
 0x3a4   :  { %v1793_v19 = vpop.permute.xlu0 %1792  ;;  %v1785_v0 = vpop.permute.xlu1 %1784  ;;  %v1626_v2 = vsel %vm343_vm10, %v1625_v23, %v5318_v63 }
 0x3a5   :  { %v1830_v55 = vsel %vm337_vm7, %v1829_v15, %v1785_v0 }
 0x3a6   :  { %v1831_v11 = vsel %vm339_vm8, %v1830_v55, %v1789_v54 }
 0x3a7   :  { %v1832_v40 = vsel %vm341_vm9, %v1831_v11, %v1793_v19 }
 0x3a9   :  { %v1872_v62 = vpop.permute.xlu2 %1871 }
 0x3aa   :  { %v1905_v3 = vrot.slane %v1872_v62, 4 }
 0x3ac   :  { %v1805_v30 = vpop.permute.xlu0 %1804  ;;  %v1797_v13 = vpop.permute.xlu1 %1796 }
 0x3ad   :  { %v1833_v56 = vsel %vm343_vm10, %v1832_v40, %v1797_v13  ;;  %v1835_v50 = vsel %vm333_vm5, %v1834_v17, %v1805_v30 }
 0x3ae   :  { %v1843_v51 = vrot.slane %v1833_v56, 4 }
 0x3b0   :  { %v5420_v49 = vsel %vm572_vm11, %v1619_v1, %v1843_v51 }
 0x3b1   :  { %v1878_v36 = vpop.permute.xlu2 %1877 }
 0x3b2   :  { %v1947_v26 = vrot.slane %v1878_v36, 4 }
 0x3b4   :  { %v1817_v28 = vpop.permute.xlu0 %1816  ;;  %v1809_v61 = vpop.permute.xlu1 %1808 }
 0x3b5   :  { %v1836_v41 = vsel %vm335_vm6, %v1835_v50, %v1809_v61 }
 0x3b6   :  { %v1837_v44 = vsel %vm337_vm7, %v1836_v41, %v1813_v20  ;;  %v5476_v41 = vld [vmem:[#allocation2 + $0xa8] sm:$0xff] }
 0x3b7   :  { %v1838_v35 = vsel %vm339_vm8, %v1837_v44, %v1817_v28 }
 0x3bc   :  { %v1868_v27 = vpop.permute.xlu0 %1867  ;;  %v1821_v45 = vpop.permute.xlu1 %1820 }
 0x3bd   :  { %v1839_v48 = vsel %vm341_vm9, %v1838_v35, %v1821_v45  ;;  %v1893_v6 = vrot.slane %v1868_v27, 4  ;;  %v2096_v35 = vrot.slane %v5476_v41, 4 }
 0x3be   :  { %v1840_v14 = vsel %vm343_vm10, %v1839_v48, %v1825_v59  ;;  %v5487_v59 = vld [vmem:[#allocation2 + $0x78] sm:$0xff]  ;;  %v5489_v48 = vld [vmem:[#allocation2 + $0x90] sm:$0xff] }
 0x3bf   :  { %v1844_v16 = vrot.slane %v1840_v14, 4 }
 0x3c1   :  { %v5446_v25 = vsel %vm572_vm11, %v1626_v2, %v1844_v16 }
 0x3c4   :  { %v1874_v18 = vpop.permute.xlu0 %1873  ;;  %v1870_v31 = vpop.permute.xlu1 %1869 }
 0x3c5   :  { %v1948_v4 = vsel %vm163_vm3, %v1947_v26, %v1870_v31  ;;  %v1961_v1 = vrot.slane %v1874_v18, 4  ;;  %v1949_v34 = vrot.slane %v1870_v31, 4  ;;  %v2097_v31 = vsel %vm163_vm3, %v2096_v35, %v5487_v59 }
 0x3c6   :  { %v1954_v28 = vperm.slane %v1948_v4, %v4314_v38 }
 0x3c7   :  { %v1950_v14 = vsel %vm163_vm3, %v1878_v36, %v1949_v34 }
 0x3c8   :  { %v1973_v2 = vrot.slane %v1954_v28, 4 }
 0x3cc   :  { %v1880_v43 = vpop.permute.xlu0 %1879  ;;  %v1876_v10 = vpop.permute.xlu1 %1875 }
 0x3cd   :  { %v1903_v53 = vrot.slane %v1880_v43, 4  ;;  %v1906_v24 = vsel %vm163_vm3, %v1880_v43, %v1905_v3  ;;  %v1891_v5 = vrot.slane %v1876_v10, 4  ;;  %v1894_v63 = vsel %vm163_vm3, %v1876_v10, %v1893_v6  ;;  %v5499_v43 = vld [vmem:[#allocation2 + $0x60] sm:$0xff] }
 0x3ce   :  { %v1914_v52 = vperm.slane %v1906_v24, %v4314_v38  ;;  %v1902_v29 = vperm.slane %v1894_v63, %v4314_v38  ;;  %v2103_v10 = vperm.slane %v2097_v31, %v4314_v38 }
 0x3cf   :  { %v1904_v8 = vsel %vm163_vm3, %v1903_v53, %v1872_v62  ;;  %v1892_v37 = vsel %vm163_vm3, %v1891_v5, %v1868_v27  ;;  %v1958_v62 = vperm.slane %v1950_v14, %v4314_v38 }
 0x3d0   :  { %v1910_v57 = vperm.slane %v1904_v8, %v4314_v38  ;;  %v1927_v47 = vrot.slane %v1914_v52, 4  ;;  %v1898_v54 = vperm.slane %v1892_v37, %v4314_v38  ;;  %v1929_v9 = vrot.slane %v1902_v29, 4 }
 0x3d1   :  { %v1985_v63 = vrot.slane %v1958_v62, 4  ;;  %v2108_v37 = vrot.slane %v2103_v10, 4 }
 0x3d2   :  { %v1915_v12 = vrot.slane %v1910_v57, 4  ;;  %v1917_v46 = vrot.slane %v1898_v54, 4  ;;  %v1928_v0 = vsel %vm163_vm3, %v1927_v47, %v1902_v29  ;;  %v1930_v42 = vsel %vm163_vm3, %v1914_v52, %v1929_v9 }
 0x3d3   :  { %v1934_v30 = vperm.slane %v1928_v0, %v4347_v60  ;;  %v1938_v45 = vperm.slane %v1930_v42, %v4347_v60 }
 0x3d4   :  { %v1916_v19 = vsel %vm163_vm3, %v1915_v12, %v1898_v54  ;;  %v1882_v22 = vpop.permute.xlu1 %1881  ;;  %v1918_v15 = vsel %vm163_vm3, %v1910_v57, %v1917_v46 }
 0x3d5   :  { %v5460_v55 = vperm.slane %v1916_v19, %v4347_v60  ;;  %v1959_v7 = vrot.slane %v1882_v22, 4  ;;  %v1926_v32 = vperm.slane %v1918_v15, %v4347_v60  ;;  %v1943_v61 = vrot.slane %v1934_v30, 4 }
 0x3d6   :  { %v1962_v58 = vsel %vm163_vm3, %v1882_v22, %v1961_v1  ;;  %v1945_v3 = vrot.slane %v1938_v45, 4  ;;  %v2098_v19 = vrot.slane %v5487_v59, 4  ;;  %v2086_v22 = vrot.slane %v5499_v43, 4 }
 0x3d7   :  { %v1939_v11 = vrot.slane %v5460_v55, 4  ;;  %v1960_v40 = vsel %vm163_vm3, %v1959_v7, %v1874_v18  ;;  %2008 = vrot.lane.b32.xlu0 %v1926_v32, %s4225_s21  ;;  %v1941_v13 = vrot.slane %v1926_v32, 4  ;;  %v1970_v44 = vperm.slane %v1962_v58, %v4314_v38  ;;  %v5546_v58 = vld [vmem:[#allocation2 + $0x68] sm:$0xff] }
 0x3d8   :  { %v1966_v56 = vperm.slane %v1960_v40, %v4314_v38  ;;  %v1944_v27 = vsel %vm163_vm3, 0.0, %v1943_v61  ;;  %v2084_v18 = vrot.slane %v5489_v48, 4  ;;  %v1946_v5 = vsel %vm163_vm3, 0.0, %v1945_v3  ;;  %v5532_v40 = vld [vmem:[#allocation2 + $0xb0] sm:$0xff] }
 0x3d9   :  { %v1940_v51 = vsel %vm163_vm3, 0.0, %v1939_v11  ;;  %v1942_v20 = vsel %vm163_vm3, 0.0, %v1941_v13  ;;  %v1983_v23 = vrot.slane %v1970_v44, 4  ;;  %v1986_v54 = vsel %vm163_vm3, %v1970_v44, %v1985_v63  ;;  %v5534_v13 = vld [vmem:[#allocation2 + $0x98] sm:$0xff] }
 0x3da   :  { %2004 = vrot.lane.b32.xlu2 %v1940_v51, %s4229_s25  ;;  %v1971_v17 = vrot.slane %v1966_v56, 4  ;;  %2012 = vrot.lane.b32.xlu1 %v1942_v20, %s4230_s26  ;;  %v1974_v6 = vsel %vm163_vm3, %v1966_v56, %v1973_v2  ;;  %v2085_v52 = vsel %vm163_vm3, %v2084_v18, %v5499_v43  ;;  %v1994_v36 = vperm.slane %v1986_v54, %v4347_v60 }
 0x3db   :  { %v1984_v24 = vsel %vm163_vm3, %v1983_v23, %v1958_v62  ;;  %v1982_v8 = vperm.slane %v1974_v6, %v4347_v60  ;;  %v2091_v47 = vperm.slane %v2085_v52, %v4314_v38  ;;  %v2099_v11 = vsel %vm163_vm3, %v5476_v41, %v2098_v19 }
 0x3dc   :  { %v1972_v50 = vsel %vm163_vm3, %v1971_v17, %v1954_v28  ;;  %v1990_v57 = vperm.slane %v1984_v24, %v4347_v60  ;;  %v2001_v32 = vrot.slane %v1994_v36, 4  ;;  %v2087_v4 = vsel %vm163_vm3, %v5489_v48, %v2086_v22  ;;  %v5543_v17 = vld [vmem:[#allocation2 + $0x80] sm:$0xff] }
 0x3dd   :  { %v5482_v21 = vperm.slane %v1972_v50, %v4347_v60  ;;  %v1997_v12 = vrot.slane %v1982_v8, 4  ;;  %v2109_v46 = vsel %vm163_vm3, %v2108_v37, %v2091_v47  ;;  %v2110_v0 = vrot.slane %v2091_v47, 4 }
 0x3de   :  { %v1999_v29 = vrot.slane %v1990_v57, 4  ;;  %v5524_v7 = vperm.slane %v2109_v46, %v4347_v60  ;;  %v2107_v51 = vperm.slane %v2099_v11, %v4314_v38  ;;  %v2002_v1 = vsel %vm163_vm3, 0.0, %v2001_v32 }
 0x3df   :  { %2020 = vrot.lane.b32.xlu0 %v1944_v27, %s4228_s24  ;;  %v1995_v16 = vrot.slane %v5482_v21, 4  ;;  %v1998_v15 = vsel %vm163_vm3, 0.0, %v1997_v12  ;;  %v2095_v20 = vperm.slane %v2087_v4, %v4314_v38  ;;  %v2152_v28 = vrot.slane %v5532_v40, 4 }
 0x3e0   :  { %v2000_v26 = vsel %vm163_vm3, 0.0, %v1999_v29  ;;  %v2132_v56 = vrot.slane %v5524_v7, 4  ;;  %v2140_v61 = vrot.slane %v5534_v13, 4  ;;  %v2120_v34 = vrot.slane %v2107_v51, 4 }
 0x3e1   :  { %v1996_v53 = vsel %vm163_vm3, 0.0, %v1995_v16  ;;  %v2122_v44 = vrot.slane %v2095_v20, 4  ;;  %v2153_v27 = vsel %vm163_vm3, %v2152_v28, %v5543_v17  ;;  %v2142_v62 = vrot.slane %v5546_v58, 4 }
 0x3e2   :  { %2016 = vrot.lane.b32.xlu2 %v1934_v30, %s4227_s23  ;;  %2024 = vrot.lane.b32.xlu1 %v1938_v45, %s4226_s22  ;;  %v2111_v30 = vsel %vm163_vm3, %v2103_v10, %v2110_v0  ;;  %v2133_v50 = vsel %vm163_vm3, 0.0, %v2132_v56  ;;  %v2141_v35 = vsel %vm163_vm3, %v2140_v61, %v5546_v58  ;;  %v2154_v45 = vrot.slane %v5543_v17, 4 }
 0x3e3   :  { %v2119_v9 = vperm.slane %v2111_v30, %v4347_v60  ;;  %v2121_v14 = vsel %vm163_vm3, %v2120_v34, %v2095_v20  ;;  %v2159_v23 = vperm.slane %v2153_v27, %v4314_v38  ;;  %v2123_v2 = vsel %vm163_vm3, %v2107_v51, %v2122_v44 }
 0x3e4   :  { %v2147_v18 = vperm.slane %v2141_v35, %v4314_v38  ;;  %v2127_v31 = vperm.slane %v2121_v14, %v4347_v60  ;;  %v2155_v3 = vsel %vm163_vm3, %v5532_v40, %v2154_v45  ;;  %v2131_v6 = vperm.slane %v2123_v2, %v4347_v60 }
 0x3e5   :  { %v2134_v42 = vrot.slane %v2119_v9, 4  ;;  %v2163_v10 = vperm.slane %v2155_v3, %v4314_v38 }
 0x3e6   :  { %v2166_v24 = vrot.slane %v2147_v18, 4  ;;  %v2136_v52 = vrot.slane %v2127_v31, 4 }
 0x3e7   :  { %2032 = vrot.lane.b32.xlu0 %v1996_v53, %s4229_s25  ;;  %v2135_v16 = vsel %vm163_vm3, 0.0, %v2134_v42  ;;  %v2164_v53 = vrot.slane %v2159_v23, 4  ;;  %v2176_v37 = vrot.slane %v2163_v10, 4 }
 0x3e8   :  { %v2137_v54 = vsel %vm163_vm3, 0.0, %v2136_v52  ;;  %v3993_v52 = vld [vmem:[#allocation3 + $0x10] sm:$0xff] }
 0x3e9   :  { %v2165_v63 = vsel %vm163_vm3, %v2164_v53, %v2147_v18 }
 0x3ea   :  { %2028 = vrot.lane.b32.xlu2 %v1946_v5, %s4231_s27  ;;  %2036 = vrot.lane.b32.xlu1 %v1982_v8, %s4225_s21  ;;  %v2143_v5 = vsel %vm163_vm3, %v5534_v13, %v2142_v62  ;;  %v2138_v8 = vrot.slane %v2131_v6, 4  ;;  %v5578_v12 = vperm.slane %v2165_v63, %v4347_v60  ;;  %v3989_v63 = vld [vmem:[#allocation3] sm:$0xff] }
 0x3eb   :  { %v2151_v47 = vperm.slane %v2143_v5, %v4314_v38 }
 0x3ec   :  { %v2139_v29 = vsel %vm163_vm3, 0.0, %v2138_v8  ;;  %v2188_v19 = vrot.slane %v5578_v12, 4 }
 0x3ed   :  { %v2177_v46 = vsel %vm163_vm3, %v2176_v37, %v2151_v47  ;;  %v2178_v32 = vrot.slane %v2151_v47, 4 }
 0x3ee   :  { %v2183_v22 = vperm.slane %v2177_v46, %v4347_v60  ;;  %v3994_v46 = vld [vmem:[#allocation3 + $0x28] sm:$0xff] }
 0x3ef   :  { %2044 = vrot.lane.b32.xlu0 %v1990_v57, %s4227_s23  ;;  %v2167_v57 = vsel %vm163_vm3, %v2159_v23, %v2166_v24  ;;  %v2179_v30 = vsel %vm163_vm3, %v2163_v10, %v2178_v32 }
 0x3f0   :  { %v2192_v11 = vrot.slane %v2183_v22, 4  ;;  %v2187_v56 = vperm.slane %v2179_v30, %v4347_v60 }
 0x3f2   :  { %2040 = vrot.lane.b32.xlu2 %v1998_v15, %s4230_s26  ;;  %2048 = vrot.lane.b32.xlu1 %v2000_v26, %s4228_s24  ;;  %v2189_v15 = vsel %vm163_vm3, 0.0, %v2188_v19  ;;  %v2193_v4 = vsel %vm163_vm3, 0.0, %v2192_v11  ;;  %v2194_v51 = vrot.slane %v2187_v56, 4 }
 0x3f7   :  { %2056 = vrot.lane.b32.xlu0 %v2002_v1, %s4231_s27  ;;  %v2195_v1 = vsel %vm163_vm3, 0.0, %v2194_v51 }
 0x3fa   :  { %2052 = vrot.lane.b32.xlu2 %v1994_v36, %s4226_s22  ;;  %2197 = vrot.lane.b32.xlu1 %v2133_v50, %s4229_s25  ;;  %v2175_v36 = vperm.slane %v2167_v57, %v4347_v60 }
 0x3fc   :  { %v2190_v0 = vrot.slane %v2175_v36, 4 }
 0x3fe   :  { %v2191_v26 = vsel %vm163_vm3, 0.0, %v2190_v0  ;;  %v3990_v0 = vld [vmem:[#allocation3 + $0x68] sm:$0xff] }
 0x3ff   :  { %2205 = vrot.lane.b32.xlu0 %v2135_v16, %s4230_s26 }
 0x402   :  { %2201 = vrot.lane.b32.xlu2 %v2119_v9, %s4225_s21  ;;  %2209 = vrot.lane.b32.xlu1 %v2127_v31, %s4227_s23 }
 0x407   :  { %2217 = vrot.lane.b32.xlu0 %v2131_v6, %s4226_s22 }
 0x40a   :  { %2213 = vrot.lane.b32.xlu2 %v2137_v54, %s4228_s24  ;;  %2221 = vrot.lane.b32.xlu1 %v2139_v29, %s4231_s27 }
 0x40f   :  { %2229 = vrot.lane.b32.xlu0 %v2175_v36, %s4225_s21 }
 0x412   :  { %2225 = vrot.lane.b32.xlu2 %v2189_v15, %s4229_s25  ;;  %2233 = vrot.lane.b32.xlu1 %v2191_v26, %s4230_s26 }
 0x417   :  { %2241 = vrot.lane.b32.xlu0 %v2193_v4, %s4228_s24 }
 0x41a   :  { %2237 = vrot.lane.b32.xlu2 %v2183_v22, %s4227_s23  ;;  %2245 = vrot.lane.b32.xlu1 %v2187_v56, %s4226_s22 }
 0x41f   :  { %2274 = vrot.lane.b32.xlu0 %v5499_v43, %s4221_s0 }
 0x422   :  { %2249 = vrot.lane.b32.xlu2 %v2195_v1, %s4231_s27  ;;  %2276 = vrot.lane.b32.xlu1 %v5546_v58, %s4221_s0 }
 0x427   :  { %2280 = vrot.lane.b32.xlu0 %v5543_v17, %s4221_s0 }
 0x42a   :  { %2278 = vrot.lane.b32.xlu2 %v5487_v59, %s4221_s0  ;;  %2282 = vrot.lane.b32.xlu1 %v5489_v48, %s4221_s0 }
 0x42f   :  { %2286 = vrot.lane.b32.xlu0 %v5476_v41, %s4221_s0 }
 0x432   :  { %2284 = vrot.lane.b32.xlu2 %v5534_v13, %s4221_s0  ;;  %2288 = vrot.lane.b32.xlu1 %v5532_v40, %s4221_s0 }
 0x434   :  { %v2005_v9 = vpop.permute.xlu2 %2004 }
 0x435   :  { %v2059_v34 = vsel %vm331_vm4, %v5460_v55, %v2005_v9 }
 0x43c   :  { %v2017_v20 = vpop.permute.xlu2 %2016 }
 0x444   :  { %v2029_v28 = vpop.permute.xlu2 %2028 }
 0x449   :  { %v2009_v61 = vpop.permute.xlu0 %2008 }
 0x44a   :  { %v2060_v42 = vsel %vm333_vm5, %v2059_v34, %v2009_v61 }
 0x44c   :  { %v2013_v50 = vpop.permute.xlu1 %2012  ;;  %v2041_v35 = vpop.permute.xlu2 %2040 }
 0x44d   :  { %v2061_v44 = vsel %vm335_vm6, %v2060_v42, %v2013_v50 }
 0x44e   :  { %v2062_v45 = vsel %vm337_vm7, %v2061_v44, %v2017_v20 }
 0x451   :  { %v2021_v27 = vpop.permute.xlu0 %2020 }
 0x452   :  { %v2063_v14 = vsel %vm339_vm8, %v2062_v45, %v2021_v27 }
 0x454   :  { %v2025_v23 = vpop.permute.xlu1 %2024  ;;  %v2053_v62 = vpop.permute.xlu2 %2052 }
 0x455   :  { %v2064_v16 = vsel %vm341_vm9, %v2063_v14, %v2025_v23 }
 0x456   :  { %v2065_v2 = vsel %vm343_vm10, %v2064_v16, %v2029_v28 }
 0x457   :  { %2073 = vst [vmem:[#allocation3 + $0x8] sm:$0xf] %v2065_v2 }
 0x459   :  { %v2033_v18 = vpop.permute.xlu0 %2032 }
 0x45a   :  { %v2066_v3 = vsel %vm331_vm4, %v5482_v21, %v2033_v18 }
 0x45c   :  { %v2037_v31 = vpop.permute.xlu1 %2036  ;;  %v5633_v57 = vpop.permute.xlu2 %2201 }
 0x45d   :  { %v2067_v6 = vsel %vm333_vm5, %v2066_v3, %v2037_v31 }
 0x45e   :  { %v4005_v55 = vld [vmem:[#allocation3 + $0x8] sm:$0xf]  ;;  %v2068_v24 = vsel %vm335_vm6, %v2067_v6, %v2041_v35 }
 0x45f   :  { %4135 = vmatpush.msk.msra.mxu0 %vm572_vm11, %v4005_v55 }
 0x461   :  { %v2045_v53 = vpop.permute.xlu0 %2044  ;;  %4043 = vmatpush.msra.mxu0 %v5420_v49 }
 0x462   :  { %v2069_v5 = vsel %vm337_vm7, %v2068_v24, %v2045_v53 }
 0x463   :  { %4044 = vmatpush.msra.mxu0 %v5266_v39 }
 0x464   :  { %v2049_v10 = vpop.permute.xlu1 %2048  ;;  %v5639_v37 = vpop.permute.xlu2 %2213 }
 0x465   :  { %4045 = vmatpush.msra.mxu0 %v3993_v52  ;;  %v2070_v8 = vsel %vm339_vm8, %v2069_v5, %v2049_v10 }
 0x466   :  { %v2071_v47 = vsel %vm341_vm9, %v2070_v8, %v2053_v62 }
 0x467   :  { %4046 = vmatpush.msra.mxu0 %v3989_v63 }
 0x469   :  { %v2057_v21 = vpop.permute.xlu0 %2056 }
 0x46a   :  { %v2072_v49 = vsel %vm343_vm10, %v2071_v47, %v2057_v21 }
 0x46b   :  { %2074 = vst [vmem:[#allocation3 + $0x78] sm:$0xf] %v2072_v49 }
 0x46c   :  { %v5637_v39 = vpop.permute.xlu1 %2197  ;;  %v5650_v22 = vpop.permute.xlu2 %2225 }
 0x471   :  { %v5641_v54 = vpop.permute.xlu0 %2205 }
 0x472   :  { %v4006_v29 = vld [vmem:[#allocation3 + $0x78] sm:$0xf] }
 0x473   :  { %4137 = vmatpush.msk.msra.mxu1 %vm572_vm11, %v4006_v29 }
 0x474   :  { %v5644_v36 = vpop.permute.xlu1 %2209  ;;  %v5658_v11 = vpop.permute.xlu2 %2237 }
 0x475   :  { %4063 = vmatpush.msra.mxu1 %v5446_v25 }
 0x477   :  { %4064 = vmatpush.msra.mxu1 %v5298_v33 }
 0x479   :  { %v5648_v19 = vpop.permute.xlu0 %2217  ;;  %4065 = vmatpush.msra.mxu1 %v3994_v46 }
 0x47b   :  { %4066 = vmatpush.msra.mxu1 %v3990_v0 }
 0x47c   :  { %v5652_v15 = vpop.permute.xlu1 %2221  ;;  %v5664_v33 = vpop.permute.xlu2 %2249 }
 0x481   :  { %v5654_v26 = vpop.permute.xlu0 %2229 }
 0x484   :  { %v5656_v32 = vpop.permute.xlu1 %2233  ;;  %v2279_v51 = vpop.permute.xlu2 %2278 }
 0x485   :  { %v2312_v50 = vrot.slane %v2279_v51, 4 }
 0x489   :  { %v5660_v30 = vpop.permute.xlu0 %2241 }
 0x48c   :  { %v5662_v25 = vpop.permute.xlu1 %2245  ;;  %v2285_v45 = vpop.permute.xlu2 %2284 }
 0x48d   :  { %v2354_v3 = vrot.slane %v2285_v45, 4 }
 0x491   :  { %v2275_v4 = vpop.permute.xlu0 %2274 }
 0x492   :  { %v2300_v28 = vrot.slane %v2275_v4, 4 }
 0x494   :  { %v2277_v56 = vpop.permute.xlu1 %2276 }
 0x495   :  { %v2355_v8 = vsel %vm163_vm3, %v2354_v3, %v2277_v56 }
 0x496   :  { %v2361_v46 = vperm.slane %v2355_v8, %v4314_v38 }
 0x499   :  { %v2281_v1 = vpop.permute.xlu0 %2280 }
 0x49a   :  { %v2368_v0 = vrot.slane %v2281_v1, 4 }
 0x49c   :  { %v2283_v9 = vpop.permute.xlu1 %2282 }
 0x49d   :  { %v2298_v20 = vrot.slane %v2283_v9, 4  ;;  %v2301_v34 = vsel %vm163_vm3, %v2283_v9, %v2300_v28 }
 0x49e   :  { %v2309_v23 = vperm.slane %v2301_v34, %v4314_v38  ;;  %v2356_v34 = vrot.slane %v2277_v56, 4 }
 0x49f   :  { %v2299_v61 = vsel %vm163_vm3, %v2298_v20, %v2275_v4 }
 0x4a0   :  { %v2305_v42 = vperm.slane %v2299_v61, %v4314_v38  ;;  %v2336_v20 = vrot.slane %v2309_v23, 4 }
 0x4a1   :  { %v2287_v44 = vpop.permute.xlu0 %2286 }
 0x4a2   :  { %v2310_v27 = vrot.slane %v2287_v44, 4  ;;  %v2313_v35 = vsel %vm163_vm3, %v2287_v44, %v2312_v50  ;;  %v2324_v18 = vrot.slane %v2305_v42, 4 }
 0x4a3   :  { %v2321_v14 = vperm.slane %v2313_v35, %v4314_v38 }
 0x4a4   :  { %v2311_v16 = vsel %vm163_vm3, %v2310_v27, %v2279_v51  ;;  %v2289_v2 = vpop.permute.xlu1 %2288 }
 0x4a5   :  { %v2317_v31 = vperm.slane %v2311_v16, %v4314_v38  ;;  %v2334_v62 = vrot.slane %v2321_v14, 4  ;;  %v2366_v55 = vrot.slane %v2289_v2, 4  ;;  %v2369_v28 = vsel %vm163_vm3, %v2289_v2, %v2368_v0 }
 0x4a6   :  { %v2380_v2 = vrot.slane %v2361_v46, 4 }
 0x4a7   :  { %v2322_v6 = vrot.slane %v2317_v31, 4  ;;  %v2367_v53 = vsel %vm163_vm3, %v2366_v55, %v2281_v1  ;;  %v2325_v24 = vsel %vm163_vm3, %v2317_v31, %v2324_v18  ;;  %v2335_v10 = vsel %vm163_vm3, %v2334_v62, %v2309_v23 }
 0x4a8   :  { %v2373_v52 = vperm.slane %v2367_v53, %v4314_v38  ;;  %v2333_v5 = vperm.slane %v2325_v24, %v4347_v60  ;;  %v2341_v21 = vperm.slane %v2335_v10, %v4347_v60  ;;  %v2377_v1 = vperm.slane %v2369_v28, %v4314_v38 }
 0x4a9   :  { %v2323_v63 = vsel %vm163_vm3, %v2322_v6, %v2305_v42  ;;  %v2337_v42 = vsel %vm163_vm3, %v2321_v14, %v2336_v20  ;;  %v2357_v23 = vsel %vm163_vm3, %v2285_v45, %v2356_v34 }
 0x4aa   :  { %v2378_v47 = vrot.slane %v2373_v52, 4  ;;  %2415 = vrot.lane.b32.xlu0 %v2333_v5, %s4225_s21  ;;  %v2348_v49 = vrot.slane %v2333_v5, 4  ;;  %v5684_v29 = vperm.slane %v2323_v63, %v4347_v60  ;;  %v2350_v9 = vrot.slane %v2341_v21, 4 }
 0x4ab   :  { %v2345_v35 = vperm.slane %v2337_v42, %v4347_v60  ;;  %v2390_v16 = vrot.slane %v2377_v1, 4  ;;  %v2365_v14 = vperm.slane %v2357_v23, %v4314_v38  ;;  %v2381_v18 = vsel %vm163_vm3, %v2373_v52, %v2380_v2 }
 0x4ac   :  { %v2349_v4 = vsel %vm163_vm3, 0.0, %v2348_v49  ;;  %v2346_v51 = vrot.slane %v5684_v29, 4  ;;  %v2379_v50 = vsel %vm163_vm3, %v2378_v47, %v2361_v46  ;;  %v2351_v44 = vsel %vm163_vm3, 0.0, %v2350_v9 }
 0x4ad   :  { %2419 = vrot.lane.b32.xlu1 %v2349_v4, %s4230_s26  ;;  %v5698_v27 = vperm.slane %v2379_v50, %v4347_v60  ;;  %v2391_v62 = vsel %vm163_vm3, %v2390_v16, %v2365_v14  ;;  %v2352_v55 = vrot.slane %v2345_v35, 4  ;;  %v2389_v45 = vperm.slane %v2381_v18, %v4347_v60 }
 0x4ae   :  { %v2347_v61 = vsel %vm163_vm3, 0.0, %v2346_v51  ;;  %v2392_v3 = vrot.slane %v2365_v14, 4  ;;  %v2397_v6 = vperm.slane %v2391_v62, %v4347_v60 }
 0x4af   :  { %2411 = vrot.lane.b32.xlu2 %v2347_v61, %s4229_s25  ;;  %v2402_v56 = vrot.slane %v5698_v27, 4  ;;  %v2353_v53 = vsel %vm163_vm3, 0.0, %v2352_v55  ;;  %v2404_v5 = vrot.slane %v2389_v45, 4 }
 0x4b0   :  { %v2393_v24 = vsel %vm163_vm3, %v2377_v1, %v2392_v3  ;;  %v2406_v10 = vrot.slane %v2397_v6, 4 }
 0x4b1   :  { %v2403_v31 = vsel %vm163_vm3, 0.0, %v2402_v56  ;;  %v2401_v52 = vperm.slane %v2393_v24, %v4347_v60 }
 0x4b2   :  { %2427 = vrot.lane.b32.xlu0 %v2351_v44, %s4228_s24  ;;  %v2407_v8 = vsel %vm163_vm3, 0.0, %v2406_v10 }
 0x4b3   :  { %v2408_v63 = vrot.slane %v2401_v52, 4 }
 0x4b5   :  { %2431 = vrot.lane.b32.xlu1 %v2345_v35, %s4226_s22  ;;  %v2409_v47 = vsel %vm163_vm3, 0.0, %v2408_v63 }
 0x4b7   :  { %2423 = vrot.lane.b32.xlu2 %v2341_v21, %s4227_s23  ;;  %v2405_v21 = vsel %vm163_vm3, 0.0, %v2404_v5 }
 0x4ba   :  { %2439 = vrot.lane.b32.xlu0 %v2403_v31, %s4229_s25 }
 0x4bd   :  { %2443 = vrot.lane.b32.xlu1 %v2389_v45, %s4225_s21 }
 0x4bf   :  { %2435 = vrot.lane.b32.xlu2 %v2353_v53, %s4231_s27 }
 0x4c2   :  { %2451 = vrot.lane.b32.xlu0 %v2397_v6, %s4227_s23 }
 0x4c5   :  { %2455 = vrot.lane.b32.xlu1 %v2407_v8, %s4228_s24 }
 0x4c7   :  { %2447 = vrot.lane.b32.xlu2 %v2405_v21, %s4230_s26 }
 0x4ca   :  { %2463 = vrot.lane.b32.xlu0 %v2409_v47, %s4231_s27 }
 0x4cd   :  { %2506 = vrot.lane.b32.xlu1 %v5499_v43, %s4222_s20 }
 0x4cf   :  { %2459 = vrot.lane.b32.xlu2 %v2401_v52, %s4226_s22 }
 0x4d2   :  { %2510 = vrot.lane.b32.xlu0 %v5487_v59, %s4222_s20 }
 0x4d5   :  { %2512 = vrot.lane.b32.xlu1 %v5543_v17, %s4222_s20 }
 0x4d7   :  { %2508 = vrot.lane.b32.xlu2 %v5546_v58, %s4222_s20  ;;  %v2252_v58 = vsel %vm331_vm4, %v5524_v7, %v5637_v39 }
 0x4da   :  { %2516 = vrot.lane.b32.xlu0 %v5534_v13, %s4222_s20 }
 0x4dd   :  { %2518 = vrot.lane.b32.xlu1 %v5476_v41, %s4222_s20 }
 0x4df   :  { %2514 = vrot.lane.b32.xlu2 %v5489_v48, %s4222_s20  ;;  %v2253_v48 = vsel %vm333_vm5, %v2252_v58, %v5633_v57 }
 0x4e0   :  { %v2254_v4 = vsel %vm335_vm6, %v2253_v48, %v5641_v54 }
 0x4e1   :  { %v2255_v51 = vsel %vm337_vm7, %v2254_v4, %v5644_v36 }
 0x4e2   :  { %v2256_v28 = vsel %vm339_vm8, %v2255_v51, %v5639_v37 }
 0x4e3   :  { %v2257_v61 = vsel %vm341_vm9, %v2256_v28, %v5648_v19  ;;  %v2259_v19 = vsel %vm331_vm4, %v5578_v12, %v5650_v22 }
 0x4e4   :  { %v2258_v36 = vsel %vm343_vm10, %v2257_v61, %v5652_v15  ;;  %v2260_v23 = vsel %vm333_vm5, %v2259_v19, %v5654_v26 }
 0x4e5   :  { %v2261_v15 = vsel %vm335_vm6, %v2260_v23, %v5656_v32 }
 0x4e6   :  { %v2262_v14 = vsel %vm337_vm7, %v2261_v15, %v5658_v11 }
 0x4e7   :  { %2520 = vrot.lane.b32.xlu2 %v5532_v40, %s4222_s20  ;;  %v2263_v12 = vsel %vm339_vm8, %v2262_v14, %v5660_v30 }
 0x4e8   :  { %v2264_v22 = vsel %vm341_vm9, %v2263_v12, %v5662_v25  ;;  %v5834_v12 = vld [vmem:[#allocation2 + $0x7a] sm:$0xff] }
 0x4e9   :  { %v2265_v55 = vsel %vm343_vm10, %v2264_v22, %v5664_v33 }
 0x509   :  { %v2412_v43 = vpop.permute.xlu2 %2411 }
 0x50a   :  { %v2466_v13 = vsel %vm331_vm4, %v5684_v29, %v2412_v43 }
 0x511   :  { %v2424_v59 = vpop.permute.xlu2 %2423 }
 0x519   :  { %v2436_v49 = vpop.permute.xlu2 %2435 }
 0x51c   :  { %v2416_v46 = vpop.permute.xlu0 %2415 }
 0x51d   :  { %v2467_v41 = vsel %vm333_vm5, %v2466_v13, %v2416_v46 }
 0x51f   :  { %v2420_v17 = vpop.permute.xlu1 %2419 }
 0x520   :  { %v2468_v0 = vsel %vm335_vm6, %v2467_v41, %v2420_v17 }
 0x521   :  { %v2448_v9 = vpop.permute.xlu2 %2447  ;;  %v2469_v7 = vsel %vm337_vm7, %v2468_v0, %v2424_v59 }
 0x524   :  { %v2428_v40 = vpop.permute.xlu0 %2427 }
 0x525   :  { %v2470_v39 = vsel %vm339_vm8, %v2469_v7, %v2428_v40 }
 0x527   :  { %v2432_v29 = vpop.permute.xlu1 %2431 }
 0x528   :  { %v2471_v20 = vsel %vm341_vm9, %v2470_v39, %v2432_v29 }
 0x529   :  { %v2472_v57 = vsel %vm343_vm10, %v2471_v20, %v2436_v49  ;;  %v2460_v1 = vpop.permute.xlu2 %2459 }
 0x52a   :  { %v2482_v54 = vrot.slane %v2472_v57, 4 }
 0x52c   :  { %v2486_v50 = vsel %vm572_vm11, %v2258_v36, %v2482_v54  ;;  %v2440_v34 = vpop.permute.xlu0 %2439 }
 0x52d   :  { %2488 = vst [vmem:[#allocation3 + $0x48] sm:$0xff] %v2486_v50  ;;  %v2473_v44 = vsel %vm331_vm4, %v5698_v27, %v2440_v34 }
 0x52f   :  { %v2444_v42 = vpop.permute.xlu1 %2443 }
 0x530   :  { %v2474_v37 = vsel %vm333_vm5, %v2473_v44, %v2444_v42 }
 0x531   :  { %v2475_v16 = vsel %vm335_vm6, %v2474_v37, %v2448_v9  ;;  %v5781_v18 = vpop.permute.xlu2 %2508 }
 0x532   :  { %v2588_v19 = vrot.slane %v5781_v18, 4 }
 0x534   :  { %v2452_v35 = vpop.permute.xlu0 %2451 }
 0x535   :  { %v2476_v2 = vsel %vm337_vm7, %v2475_v16, %v2452_v35  ;;  %v5821_v35 = vld [vmem:[#allocation2 + $0xaa] sm:$0xff] }
 0x537   :  { %v2456_v56 = vpop.permute.xlu1 %2455 }
 0x538   :  { %v2477_v27 = vsel %vm339_vm8, %v2476_v2, %v2456_v56 }
 0x539   :  { %v2478_v32 = vsel %vm341_vm9, %v2477_v27, %v2460_v1  ;;  %v2515_v3 = vpop.permute.xlu2 %2514  ;;  %v2732_v27 = vrot.slane %v5821_v35, 4 }
 0x53a   :  { %v2530_v30 = vrot.slane %v2515_v3, 4 }
 0x53c   :  { %v2464_v26 = vpop.permute.xlu0 %2463 }
 0x53d   :  { %v2479_v31 = vsel %vm343_vm10, %v2478_v32, %v2464_v26 }
 0x53e   :  { %v2483_v62 = vrot.slane %v2479_v31, 4 }
 0x53f   :  { %v2507_v45 = vpop.permute.xlu1 %2506 }
 0x540   :  { %v2487_v11 = vsel %vm572_vm11, %v2265_v55, %v2483_v62  ;;  %v2531_v24 = vsel %vm163_vm3, %v2530_v30, %v2507_v45  ;;  %v2532_v25 = vrot.slane %v2507_v45, 4  ;;  %v2733_v55 = vsel %vm163_vm3, %v2732_v27, %v5834_v12  ;;  %v5845_v45 = vld [vmem:[#allocation2 + $0x62] sm:$0xff] }
 0x541   :  { %2489 = vst [vmem:[#allocation3 + $0x80] sm:$0xff] %v2487_v11  ;;  %v2521_v10 = vpop.permute.xlu2 %2520  ;;  %v2537_v5 = vperm.slane %v2531_v24, %v4314_v38 }
 0x542   :  { %v2533_v33 = vsel %vm163_vm3, %v2515_v3, %v2532_v25  ;;  %v2598_v47 = vrot.slane %v2521_v10, 4 }
 0x543   :  { %v2556_v17 = vrot.slane %v2537_v5, 4  ;;  %v2541_v41 = vperm.slane %v2533_v33, %v4314_v38 }
 0x544   :  { %v2511_v6 = vpop.permute.xlu0 %2510 }
 0x545   :  { %v2544_v8 = vrot.slane %v2511_v6, 4  ;;  %v2568_v42 = vrot.slane %v2541_v41, 4 }
 0x547   :  { %v2513_v53 = vpop.permute.xlu1 %2512 }
 0x548   :  { %v2599_v58 = vsel %vm163_vm3, %v2598_v47, %v2513_v53  ;;  %v2600_v20 = vrot.slane %v2513_v53, 4  ;;  %v2739_v53 = vperm.slane %v2733_v55, %v4314_v38 }
 0x549   :  { %v2605_v51 = vperm.slane %v2599_v58, %v4314_v38 }
 0x54a   :  { %v2601_v1 = vsel %vm163_vm3, %v2521_v10, %v2600_v20 }
 0x54b   :  { %v2610_v54 = vrot.slane %v2605_v51, 4  ;;  %v2609_v15 = vperm.slane %v2601_v1, %v4314_v38 }
 0x54c   :  { %v2517_v52 = vpop.permute.xlu0 %2516 }
 0x54d   :  { %v2586_v43 = vrot.slane %v2517_v52, 4  ;;  %v2589_v2 = vsel %vm163_vm3, %v2517_v52, %v2588_v19  ;;  %v2622_v26 = vrot.slane %v2609_v15, 4 }
 0x54e   :  { %v2597_v32 = vperm.slane %v2589_v2, %v4314_v38 }
 0x54f   :  { %v2519_v63 = vpop.permute.xlu1 %2518  ;;  %v2587_v48 = vsel %vm163_vm3, %v2586_v43, %v5781_v18  ;;  %v5836_v18 = vld [vmem:[#allocation2 + $0x92] sm:$0xff]  ;;  %v2734_v43 = vrot.slane %v5834_v12, 4 }
 0x550   :  { %v2542_v21 = vrot.slane %v2519_v63, 4  ;;  %v2545_v59 = vsel %vm163_vm3, %v2519_v63, %v2544_v8  ;;  %v2593_v28 = vperm.slane %v2587_v48, %v4314_v38  ;;  %v2720_v62 = vrot.slane %v5836_v18, 4 }
 0x551   :  { %v2553_v46 = vperm.slane %v2545_v59, %v4314_v38  ;;  %v2623_v3 = vsel %vm163_vm3, %v2622_v26, %v2597_v32  ;;  %v2624_v30 = vrot.slane %v2597_v32, 4  ;;  %v2744_v8 = vrot.slane %v2739_v53, 4 }
 0x552   :  { %v2543_v49 = vsel %vm163_vm3, %v2542_v21, %v2511_v6  ;;  %v2611_v37 = vsel %vm163_vm3, %v2610_v54, %v2593_v28  ;;  %v2612_v22 = vrot.slane %v2593_v28, 4  ;;  %v2721_v25 = vsel %vm163_vm3, %v2720_v62, %v5845_v45  ;;  %v5885_v28 = vld [vmem:[#allocation2 + $0xb2] sm:$0xff]  ;;  %v5889_v54 = vld [vmem:[#allocation2 + $0x6a] sm:$0xff] }
 0x553   :  { %v2549_v13 = vperm.slane %v2543_v49, %v4314_v38  ;;  %v2566_v0 = vrot.slane %v2553_v46, 4  ;;  %v2569_v23 = vsel %vm163_vm3, %v2553_v46, %v2568_v42  ;;  %v5828_v56 = vperm.slane %v2611_v37, %v4347_v60 }
 0x554   :  { %v2577_v14 = vperm.slane %v2569_v23, %v4347_v60  ;;  %v2613_v11 = vsel %vm163_vm3, %v2605_v51, %v2612_v22  ;;  %v2629_v52 = vperm.slane %v2623_v3, %v4347_v60  ;;  %v2625_v21 = vsel %vm163_vm3, %v2609_v15, %v2624_v30  ;;  %v5878_v51 = vld [vmem:[#allocation2 + $0x9a] sm:$0xff] }
 0x555   :  { %v2554_v40 = vrot.slane %v2549_v13, 4  ;;  %v2557_v4 = vsel %vm163_vm3, %v2549_v13, %v2556_v17  ;;  %v2567_v7 = vsel %vm163_vm3, %v2566_v0, %v2541_v41  ;;  %v2634_v31 = vrot.slane %v5828_v56, 4 }
 0x556   :  { %v2565_v9 = vperm.slane %v2557_v4, %v4347_v60  ;;  %v2573_v29 = vperm.slane %v2567_v7, %v4347_v60  ;;  %v2584_v24 = vrot.slane %v2577_v14, 4  ;;  %v2621_v10 = vperm.slane %v2613_v11, %v4347_v60 }
 0x557   :  { %v2555_v39 = vsel %vm163_vm3, %v2554_v40, %v2537_v5  ;;  %v2635_v6 = vsel %vm163_vm3, 0.0, %v2634_v31  ;;  %v2727_v5 = vperm.slane %v2721_v25, %v4314_v38  ;;  %v2638_v33 = vrot.slane %v2629_v52, 4 }
 0x558   :  { %2647 = vrot.lane.b32.xlu1 %v2565_v9, %s4225_s21  ;;  %v2580_v57 = vrot.slane %v2565_v9, 4  ;;  %v5812_v61 = vperm.slane %v2555_v39, %v4347_v60  ;;  %v2582_v34 = vrot.slane %v2573_v29, 4  ;;  %v2585_v63 = vsel %vm163_vm3, 0.0, %v2584_v24 }
 0x559   :  { %v2633_v47 = vperm.slane %v2625_v21, %v4347_v60  ;;  %v2745_v59 = vsel %vm163_vm3, %v2744_v8, %v2727_v5  ;;  %v2636_v49 = vrot.slane %v2621_v10, 4  ;;  %v2722_v46 = vrot.slane %v5845_v45, 4 }
 0x55a   :  { %v2581_v36 = vsel %vm163_vm3, 0.0, %v2580_v57  ;;  %v2578_v50 = vrot.slane %v5812_v61, 4  ;;  %v2583_v16 = vsel %vm163_vm3, 0.0, %v2582_v34  ;;  %v2746_v17 = vrot.slane %v2727_v5, 4  ;;  %v5892_v34 = vld [vmem:[#allocation2 + $0x82] sm:$0xff] }
 0x55b   :  { %2651 = vrot.lane.b32.xlu2 %v2581_v36, %s4230_s26  ;;  %v2639_v58 = vsel %vm163_vm3, 0.0, %v2638_v33  ;;  %v5868_v13 = vperm.slane %v2745_v59, %v4347_v60  ;;  %v2640_v41 = vrot.slane %v2633_v47, 4  ;;  %v2735_v0 = vsel %vm163_vm3, %v5821_v35, %v2734_v43 }
 0x55c   :  { %v2579_v44 = vsel %vm163_vm3, 0.0, %v2578_v50  ;;  %v2637_v48 = vsel %vm163_vm3, 0.0, %v2636_v49  ;;  %v2747_v40 = vsel %vm163_vm3, %v2739_v53, %v2746_v17  ;;  %v2723_v4 = vsel %vm163_vm3, %v5836_v18, %v2722_v46 }
 0x55d   :  { %2643 = vrot.lane.b32.xlu0 %v2579_v44, %s4229_s25  ;;  %v2768_v9 = vrot.slane %v5868_v13, 4  ;;  %v2743_v7 = vperm.slane %v2735_v0, %v4314_v38  ;;  %v2641_v39 = vsel %vm163_vm3, 0.0, %v2640_v41  ;;  %v2731_v20 = vperm.slane %v2723_v4, %v4314_v38 }
 0x55e   :  { %v2776_v57 = vrot.slane %v5878_v51, 4  ;;  %v2788_v42 = vrot.slane %v5885_v28, 4  ;;  %v2790_v19 = vrot.slane %v5892_v34, 4  ;;  %v2778_v62 = vrot.slane %v5889_v54, 4 }
 0x55f   :  { %v2769_v36 = vsel %vm163_vm3, 0.0, %v2768_v9  ;;  %v2756_v50 = vrot.slane %v2743_v7, 4  ;;  %v2758_v44 = vrot.slane %v2731_v20, 4 }
 0x560   :  { %2659 = vrot.lane.b32.xlu1 %v2583_v16, %s4228_s24  ;;  %v2777_v37 = vsel %vm163_vm3, %v2776_v57, %v5889_v54  ;;  %v2789_v15 = vsel %vm163_vm3, %v2788_v42, %v5892_v34  ;;  %v2791_v26 = vsel %vm163_vm3, %v5885_v28, %v2790_v19  ;;  %v2779_v53 = vsel %vm163_vm3, %v5878_v51, %v2778_v62 }
 0x561   :  { %v2757_v23 = vsel %vm163_vm3, %v2756_v50, %v2731_v20  ;;  %v2759_v2 = vsel %vm163_vm3, %v2743_v7, %v2758_v44  ;;  %v2783_v27 = vperm.slane %v2777_v37, %v4314_v38  ;;  %v2795_v22 = vperm.slane %v2789_v15, %v4314_v38 }
 0x562   :  { %v2767_v32 = vperm.slane %v2759_v2, %v4347_v60  ;;  %v2799_v55 = vperm.slane %v2791_v26, %v4314_v38  ;;  %v2787_v5 = vperm.slane %v2779_v53, %v4314_v38 }
 0x563   :  { %2663 = vrot.lane.b32.xlu2 %v2577_v14, %s4226_s22  ;;  %v2763_v14 = vperm.slane %v2757_v23, %v4347_v60  ;;  %v2802_v31 = vrot.slane %v2783_v27, 4  ;;  %v2800_v11 = vrot.slane %v2795_v22, 4 }
 0x564   :  { %v2774_v3 = vrot.slane %v2767_v32, 4  ;;  %v2812_v24 = vrot.slane %v2799_v55, 4  ;;  %v2814_v49 = vrot.slane %v2787_v5, 4 }
 0x565   :  { %2655 = vrot.lane.b32.xlu0 %v2573_v29, %s4227_s23  ;;  %v2755_v29 = vperm.slane %v2747_v40, %v4347_v60  ;;  %v2772_v30 = vrot.slane %v2763_v14, 4  ;;  %v2801_v25 = vsel %vm163_vm3, %v2800_v11, %v2783_v27 }
 0x566   :  { %v2813_v21 = vsel %vm163_vm3, %v2812_v24, %v2787_v5 }
 0x567   :  { %v2770_v1 = vrot.slane %v2755_v29, 4  ;;  %v2773_v8 = vsel %vm163_vm3, 0.0, %v2772_v30 }
 0x568   :  { %2671 = vrot.lane.b32.xlu1 %v2635_v6, %s4229_s25  ;;  %v2803_v6 = vsel %vm163_vm3, %v2795_v22, %v2802_v31 }
 0x569   :  { %v2771_v16 = vsel %vm163_vm3, 0.0, %v2770_v1 }
 0x56b   :  { %2675 = vrot.lane.b32.xlu2 %v2621_v10, %s4225_s21  ;;  %v2775_v10 = vsel %vm163_vm3, 0.0, %v2774_v3 }
 0x56d   :  { %2667 = vrot.lane.b32.xlu0 %v2585_v63, %s4231_s27  ;;  %v5927_v63 = vperm.slane %v2801_v25, %v4347_v60 }
 0x56f   :  { %v2824_v43 = vrot.slane %v5927_v63, 4 }
 0x570   :  { %2683 = vrot.lane.b32.xlu1 %v2629_v52, %s4227_s23  ;;  %v2811_v52 = vperm.slane %v2803_v6, %v4347_v60 }
 0x571   :  { %v2825_v17 = vsel %vm163_vm3, 0.0, %v2824_v43 }
 0x572   :  { %v2826_v33 = vrot.slane %v2811_v52, 4 }
 0x573   :  { %2687 = vrot.lane.b32.xlu2 %v2639_v58, %s4228_s24  ;;  %v2815_v58 = vsel %vm163_vm3, %v2799_v55, %v2814_v49 }
 0x574   :  { %v2827_v59 = vsel %vm163_vm3, 0.0, %v2826_v33  ;;  %v2823_v0 = vperm.slane %v2815_v58, %v4347_v60 }
 0x575   :  { %2679 = vrot.lane.b32.xlu0 %v2637_v48, %s4230_s26 }
 0x576   :  { %v2830_v48 = vrot.slane %v2823_v0, 4 }
 0x578   :  { %2695 = vrot.lane.b32.xlu1 %v2641_v39, %s4231_s27  ;;  %v2831_v40 = vsel %vm163_vm3, 0.0, %v2830_v48 }
 0x57b   :  { %2833 = vrot.lane.b32.xlu2 %v2769_v36, %s4229_s25 }
 0x57d   :  { %2691 = vrot.lane.b32.xlu0 %v2633_v47, %s4226_s22  ;;  %v2819_v47 = vperm.slane %v2813_v21, %v4347_v60 }
 0x57f   :  { %v2828_v46 = vrot.slane %v2819_v47, 4 }
 0x580   :  { %2841 = vrot.lane.b32.xlu1 %v2771_v16, %s4230_s26 }
 0x581   :  { %v2829_v41 = vsel %vm163_vm3, 0.0, %v2828_v46 }
 0x583   :  { %2845 = vrot.lane.b32.xlu2 %v2763_v14, %s4227_s23 }
 0x585   :  { %2837 = vrot.lane.b32.xlu0 %v2755_v29, %s4225_s21 }
 0x588   :  { %2853 = vrot.lane.b32.xlu1 %v2767_v32, %s4226_s22 }
 0x58b   :  { %2857 = vrot.lane.b32.xlu2 %v2775_v10, %s4231_s27 }
 0x58d   :  { %2849 = vrot.lane.b32.xlu0 %v2773_v8, %s4228_s24 }
 0x590   :  { %2865 = vrot.lane.b32.xlu1 %v2811_v52, %s4225_s21 }
 0x593   :  { %2869 = vrot.lane.b32.xlu2 %v2827_v59, %s4230_s26 }
 0x595   :  { %2861 = vrot.lane.b32.xlu0 %v2825_v17, %s4229_s25 }
 0x598   :  { %2877 = vrot.lane.b32.xlu1 %v2829_v41, %s4228_s24 }
 0x59b   :  { %2881 = vrot.lane.b32.xlu2 %v2823_v0, %s4226_s22 }
 0x59d   :  { %2873 = vrot.lane.b32.xlu0 %v2819_v47, %s4227_s23 }
 0x5a0   :  { %2928 = vrot.lane.b32.xlu1 %v5845_v45, %s4221_s0 }
 0x5a3   :  { %2930 = vrot.lane.b32.xlu2 %v5889_v54, %s4221_s0 }
 0x5a5   :  { %2885 = vrot.lane.b32.xlu0 %v2831_v40, %s4231_s27 }
 0x5a8   :  { %2934 = vrot.lane.b32.xlu1 %v5892_v34, %s4221_s0 }
 0x5ab   :  { %2936 = vrot.lane.b32.xlu2 %v5836_v18, %s4221_s0 }
 0x5ad   :  { %2932 = vrot.lane.b32.xlu0 %v5834_v12, %s4221_s0 }
 0x5b0   :  { %2940 = vrot.lane.b32.xlu1 %v5821_v35, %s4221_s0 }
 0x5b3   :  { %2942 = vrot.lane.b32.xlu2 %v5885_v28, %s4221_s0 }
 0x5b5   :  { %v2652_v4 = vpop.permute.xlu2 %2651  ;;  %2938 = vrot.lane.b32.xlu0 %v5878_v51, %s4221_s0 }
 0x5bd   :  { %v2664_v9 = vpop.permute.xlu2 %2663 }
 0x5c5   :  { %v2676_v7 = vpop.permute.xlu2 %2675 }
 0x5ca   :  { %v2648_v39 = vpop.permute.xlu1 %2647 }
 0x5cd   :  { %v2688_v20 = vpop.permute.xlu2 %2687 }
 0x5cf   :  { %v2644_v29 = vpop.permute.xlu0 %2643 }
 0x5d0   :  { %v2698_v27 = vsel %vm331_vm4, %v5812_v61, %v2644_v29 }
 0x5d1   :  { %v2699_v26 = vsel %vm333_vm5, %v2698_v27, %v2648_v39 }
 0x5d2   :  { %v2660_v57 = vpop.permute.xlu1 %2659  ;;  %v2700_v55 = vsel %vm335_vm6, %v2699_v26, %v2652_v4 }
 0x5d5   :  { %v2834_v42 = vpop.permute.xlu2 %2833 }
 0x5d6   :  { %v2888_v22 = vsel %vm331_vm4, %v5868_v13, %v2834_v42 }
 0x5d7   :  { %v2656_v36 = vpop.permute.xlu0 %2655 }
 0x5d8   :  { %v2701_v3 = vsel %vm337_vm7, %v2700_v55, %v2656_v36 }
 0x5d9   :  { %v2702_v61 = vsel %vm339_vm8, %v2701_v3, %v2660_v57 }
 0x5da   :  { %v2672_v50 = vpop.permute.xlu1 %2671  ;;  %v2703_v10 = vsel %vm341_vm9, %v2702_v61, %v2664_v9 }
 0x5db   :  { %v2705_v59 = vsel %vm331_vm4, %v5828_v56, %v2672_v50 }
 0x5dc   :  { %v2706_v17 = vsel %vm333_vm5, %v2705_v59, %v2676_v7 }
 0x5dd   :  { %v2846_v37 = vpop.permute.xlu2 %2845 }
 0x5df   :  { %v2668_v1 = vpop.permute.xlu0 %2667 }
 0x5e0   :  { %v2704_v8 = vsel %vm343_vm10, %v2703_v10, %v2668_v1 }
 0x5e2   :  { %v2684_v44 = vpop.permute.xlu1 %2683 }
 0x5e5   :  { %v2858_v15 = vpop.permute.xlu2 %2857 }
 0x5e7   :  { %v2680_v19 = vpop.permute.xlu0 %2679 }
 0x5e8   :  { %v2707_v41 = vsel %vm335_vm6, %v2706_v17, %v2680_v19 }
 0x5ea   :  { %v2696_v23 = vpop.permute.xlu1 %2695 }
 0x5ed   :  { %v2870_v32 = vpop.permute.xlu2 %2869 }
 0x5ef   :  { %v2692_v16 = vpop.permute.xlu0 %2691 }
 0x5f2   :  { %v2842_v2 = vpop.permute.xlu1 %2841 }
 0x5f5   :  { %v2882_v52 = vpop.permute.xlu2 %2881 }
 0x5f7   :  { %v2838_v14 = vpop.permute.xlu0 %2837 }
 0x5f8   :  { %v2889_v31 = vsel %vm333_vm5, %v2888_v22, %v2838_v14 }
 0x5f9   :  { %v2890_v11 = vsel %vm335_vm6, %v2889_v31, %v2842_v2 }
 0x5fa   :  { %v2854_v62 = vpop.permute.xlu1 %2853  ;;  %v2891_v6 = vsel %vm337_vm7, %v2890_v11, %v2846_v37 }
 0x5fd   :  { %v5983_v49 = vpop.permute.xlu2 %2930 }
 0x5ff   :  { %v2850_v53 = vpop.permute.xlu0 %2849 }
 0x600   :  { %v2892_v30 = vsel %vm339_vm8, %v2891_v6, %v2850_v53 }
 0x601   :  { %v2893_v13 = vsel %vm341_vm9, %v2892_v30, %v2854_v62 }
 0x602   :  { %v2894_v24 = vsel %vm343_vm10, %v2893_v13, %v2858_v15  ;;  %v2866_v25 = vpop.permute.xlu1 %2865 }
 0x603   :  { %v2904_v5 = vrot.slane %v2894_v24, 4 }
 0x605   :  { %v2908_v21 = vsel %vm572_vm11, %v2704_v8, %v2904_v5  ;;  %v2937_v39 = vpop.permute.xlu2 %2936 }
 0x606   :  { %2910 = vst [vmem:[#allocation3 + $0x18] sm:$0xff] %v2908_v21 }
 0x607   :  { %v2862_v33 = vpop.permute.xlu0 %2861 }
 0x608   :  { %v2895_v47 = vsel %vm331_vm4, %v5927_v63, %v2862_v33  ;;  %v2708_v63 = vsel %vm337_vm7, %v2707_v41, %v2684_v44  ;;  %v2952_v44 = vrot.slane %v2937_v39, 4 }
 0x609   :  { %v2896_v46 = vsel %vm333_vm5, %v2895_v47, %v2866_v25  ;;  %v2709_v56 = vsel %vm339_vm8, %v2708_v63, %v2688_v20 }
 0x60a   :  { %v2878_v43 = vpop.permute.xlu1 %2877  ;;  %v2897_v0 = vsel %vm335_vm6, %v2896_v46, %v2870_v32  ;;  %v2710_v9 = vsel %vm341_vm9, %v2709_v56, %v2692_v16 }
 0x60b   :  { %v2711_v50 = vsel %vm343_vm10, %v2710_v9, %v2696_v23 }
 0x60d   :  { %v2943_v16 = vpop.permute.xlu2 %2942 }
 0x60e   :  { %v3020_v26 = vrot.slane %v2943_v16, 4 }
 0x60f   :  { %v2874_v58 = vpop.permute.xlu0 %2873 }
 0x610   :  { %v2898_v48 = vsel %vm337_vm7, %v2897_v0, %v2874_v58 }
 0x611   :  { %v2899_v4 = vsel %vm339_vm8, %v2898_v48, %v2878_v43 }
 0x612   :  { %v2929_v40 = vpop.permute.xlu1 %2928  ;;  %v2900_v29 = vsel %vm341_vm9, %v2899_v4, %v2882_v52 }
 0x613   :  { %v2953_v37 = vsel %vm163_vm3, %v2952_v44, %v2929_v40  ;;  %v2954_v20 = vrot.slane %v2929_v40, 4  ;;  %v3010_v40 = vrot.slane %v5983_v49, 4 }
 0x614   :  { %v2959_v2 = vperm.slane %v2953_v37, %v4314_v38 }
 0x615   :  { %v2955_v23 = vsel %vm163_vm3, %v2937_v39, %v2954_v20 }
 0x616   :  { %v2978_v62 = vrot.slane %v2959_v2, 4  ;;  %v2963_v6 = vperm.slane %v2955_v23, %v4314_v38 }
 0x617   :  { %v2886_v7 = vpop.permute.xlu0 %2885 }
 0x618   :  { %v2901_v57 = vsel %vm343_vm10, %v2900_v29, %v2886_v7  ;;  %v2990_v41 = vrot.slane %v2963_v6, 4 }
 0x619   :  { %v2905_v36 = vrot.slane %v2901_v57, 4 }
 0x61a   :  { %v2935_v42 = vpop.permute.xlu1 %2934 }
 0x61b   :  { %v2909_v1 = vsel %vm572_vm11, %v2711_v50, %v2905_v36  ;;  %v3021_v55 = vsel %vm163_vm3, %v3020_v26, %v2935_v42  ;;  %v3022_v43 = vrot.slane %v2935_v42, 4  ;;  %v6055_v26 = vld [vmem:[#allocation2 + $0xac] sm:$0xff] }
 0x61c   :  { %2911 = vst [vmem:[#allocation3 + $0x20] sm:$0xff] %v2909_v1  ;;  %v3027_v24 = vperm.slane %v3021_v55, %v4314_v38  ;;  %v6079_v55 = vld [vmem:[#allocation2 + $0x84] sm:$0xff] }
 0x61d   :  { %v3023_v63 = vsel %vm163_vm3, %v2943_v16, %v3022_v43 }
 0x61e   :  { %v3032_v59 = vrot.slane %v3027_v24, 4  ;;  %v3031_v29 = vperm.slane %v3023_v63, %v4314_v38 }
 0x61f   :  { %v2933_v19 = vpop.permute.xlu0 %2932 }
 0x620   :  { %v2966_v15 = vrot.slane %v2933_v19, 4  ;;  %v3044_v50 = vrot.slane %v3031_v29, 4 }
 0x622   :  { %v2941_v27 = vpop.permute.xlu1 %2940 }
 0x623   :  { %v2964_v14 = vrot.slane %v2941_v27, 4  ;;  %v2967_v22 = vsel %vm163_vm3, %v2941_v27, %v2966_v15 }
 0x624   :  { %v2975_v32 = vperm.slane %v2967_v22, %v4314_v38 }
 0x625   :  { %v2965_v31 = vsel %vm163_vm3, %v2964_v14, %v2933_v19 }
 0x626   :  { %v2971_v11 = vperm.slane %v2965_v31, %v4314_v38  ;;  %v2988_v3 = vrot.slane %v2975_v32, 4  ;;  %v2991_v4 = vsel %vm163_vm3, %v2975_v32, %v2990_v41  ;;  %v6060_v32 = vld [vmem:[#allocation2 + $0xb4] sm:$0xff] }
 0x627   :  { %v2939_v53 = vpop.permute.xlu0 %2938  ;;  %v2999_v7 = vperm.slane %v2991_v4, %v4347_v60 }
 0x628   :  { %v2976_v61 = vrot.slane %v2971_v11, 4  ;;  %v3008_v30 = vrot.slane %v2939_v53, 4  ;;  %v2979_v13 = vsel %vm163_vm3, %v2971_v11, %v2978_v62  ;;  %v2989_v10 = vsel %vm163_vm3, %v2988_v3, %v2963_v6  ;;  %v6075_v62 = vld [vmem:[#allocation2 + $0x7c] sm:$0xff]  ;;  %v6111_v3 = vld [vmem:[#allocation2 + $0x6c] sm:$0xff] }
 0x629   :  { %v2987_v25 = vperm.slane %v2979_v13, %v4347_v60  ;;  %v2995_v8 = vperm.slane %v2989_v10, %v4347_v60  ;;  %v3011_v39 = vsel %vm163_vm3, %v2939_v53, %v3010_v40  ;;  %v3006_v19 = vrot.slane %v2999_v7, 4  ;;  %v6085_v11 = vld [vmem:[#allocation2 + $0x9c] sm:$0xff] }
 0x62a   :  { %v3009_v52 = vsel %vm163_vm3, %v3008_v30, %v5983_v49  ;;  %v2977_v5 = vsel %vm163_vm3, %v2976_v61, %v2959_v2  ;;  %v3019_v57 = vperm.slane %v3011_v39, %v4314_v38 }
 0x62b   :  { %v3015_v21 = vperm.slane %v3009_v52, %v4314_v38  ;;  %3069 = vrot.lane.b32.xlu1 %v2987_v25, %s4225_s21  ;;  %v3002_v33 = vrot.slane %v2987_v25, 4  ;;  %v6018_v47 = vperm.slane %v2977_v5, %v4347_v60  ;;  %v3004_v58 = vrot.slane %v2995_v8, 4 }
 0x62c   :  { %v3045_v1 = vsel %vm163_vm3, %v3044_v50, %v3019_v57  ;;  %v3007_v15 = vsel %vm163_vm3, 0.0, %v3006_v19  ;;  %v3046_v14 = vrot.slane %v3019_v57, 4 }
 0x62d   :  { %v3003_v46 = vsel %vm163_vm3, 0.0, %v3002_v33  ;;  %v3000_v17 = vrot.slane %v6018_v47, 4  ;;  %v3033_v0 = vsel %vm163_vm3, %v3032_v59, %v3015_v21  ;;  %v3005_v56 = vsel %vm163_vm3, 0.0, %v3004_v58 }
 0x62e   :  { %3073 = vrot.lane.b32.xlu2 %v3003_v46, %s4230_s26  ;;  %v6031_v9 = vperm.slane %v3033_v0, %v4347_v60  ;;  %v3034_v49 = vrot.slane %v3015_v21, 4  ;;  %v3051_v20 = vperm.slane %v3045_v1, %v4347_v60  ;;  %v3047_v23 = vsel %vm163_vm3, %v3031_v29, %v3046_v14 }
 0x62f   :  { %v3001_v48 = vsel %vm163_vm3, 0.0, %v3000_v17  ;;  %v6065_v31 = vperm.slane %v3047_v23, %v4347_v60 }
 0x630   :  { %3065 = vrot.lane.b32.xlu0 %v3001_v48, %s4229_s25  ;;  %v3056_v36 = vrot.slane %v6031_v9, 4  ;;  %v3035_v42 = vsel %vm163_vm3, %v3027_v24, %v3034_v49  ;;  %v3060_v16 = vrot.slane %v3051_v20, 4 }
 0x631   :  { %v3043_v37 = vperm.slane %v3035_v42, %v4347_v60 }
 0x632   :  { %v3057_v44 = vsel %vm163_vm3, 0.0, %v3056_v36  ;;  %v3061_v27 = vsel %vm163_vm3, 0.0, %v3060_v16 }
 0x633   :  { %3081 = vrot.lane.b32.xlu1 %v3005_v56, %s4228_s24  ;;  %v3058_v2 = vrot.slane %v3043_v37, 4 }
 0x635   :  { %v3059_v22 = vsel %vm163_vm3, 0.0, %v3058_v2 }
 0x636   :  { %3085 = vrot.lane.b32.xlu2 %v2999_v7, %s4226_s22 }
 0x638   :  { %3077 = vrot.lane.b32.xlu0 %v2995_v8, %s4227_s23 }
 0x63b   :  { %3093 = vrot.lane.b32.xlu1 %v3057_v44, %s4229_s25 }
 0x63e   :  { %3097 = vrot.lane.b32.xlu2 %v3043_v37, %s4225_s21 }
 0x640   :  { %3089 = vrot.lane.b32.xlu0 %v3007_v15, %s4231_s27 }
 0x643   :  { %3105 = vrot.lane.b32.xlu1 %v3051_v20, %s4227_s23 }
 0x646   :  { %3109 = vrot.lane.b32.xlu2 %v3061_v27, %s4228_s24 }
 0x648   :  { %3101 = vrot.lane.b32.xlu0 %v3059_v22, %s4230_s26 }
 0x64b   :  { %3560 = vrot.lane.b32.xlu1 %v6055_v26, %s4221_s0 }
 0x64e   :  { %3562 = vrot.lane.b32.xlu2 %v6060_v32, %s4221_s0 }
 0x650   :  { %3113 = vrot.lane.b32.xlu0 %v6065_v31, %s4226_s22 }
 0x653   :  { %3794 = vrot.lane.b32.xlu1 %v6060_v32, %s4222_s20 }
 0x656   :  { %3146 = vrot.lane.b32.xlu2 %v5821_v35, %s4222_s20  ;;  %v6091_v35 = vld [vmem:[#allocation2 + $0x94] sm:$0xff] }
 0x658   :  { %3792 = vrot.lane.b32.xlu0 %v6055_v26, %s4222_s20 }
 0x65b   :  { %3552 = vrot.lane.b32.xlu1 %v6075_v62, %s4221_s0 }
 0x65e   :  { %3554 = vrot.lane.b32.xlu2 %v6079_v55, %s4221_s0 }
 0x660   :  { %3148 = vrot.lane.b32.xlu0 %v5885_v28, %s4222_s20  ;;  %v6107_v28 = vld [vmem:[#allocation2 + $0x64] sm:$0xff] }
 0x663   :  { %3558 = vrot.lane.b32.xlu1 %v6085_v11, %s4221_s0 }
 0x666   :  { %3784 = vrot.lane.b32.xlu2 %v6075_v62, %s4222_s20 }
 0x668   :  { %3556 = vrot.lane.b32.xlu0 %v6091_v35, %s4221_s0 }
 0x66b   :  { %3788 = vrot.lane.b32.xlu1 %v6091_v35, %s4222_s20 }
 0x66e   :  { %3790 = vrot.lane.b32.xlu2 %v6085_v11, %s4222_s20 }
 0x670   :  { %3786 = vrot.lane.b32.xlu0 %v6079_v55, %s4222_s20 }
 0x673   :  { %3140 = vrot.lane.b32.xlu1 %v5892_v34, %s4222_s20 }
 0x676   :  { %3142 = vrot.lane.b32.xlu2 %v5836_v18, %s4222_s20 }
 0x678   :  { %3138 = vrot.lane.b32.xlu0 %v5834_v12, %s4222_s20 }
 0x67b   :  { %3548 = vrot.lane.b32.xlu1 %v6107_v28, %s4221_s0 }
 0x67e   :  { %3550 = vrot.lane.b32.xlu2 %v6111_v3, %s4221_s0 }
 0x680   :  { %3144 = vrot.lane.b32.xlu0 %v5878_v51, %s4222_s20 }
 0x683   :  { %3782 = vrot.lane.b32.xlu1 %v6111_v3, %s4222_s20 }
 0x686   :  { %3134 = vrot.lane.b32.xlu2 %v5845_v45, %s4222_s20 }
 0x688   :  { %v3074_v12 = vpop.permute.xlu2 %3073  ;;  %3780 = vrot.lane.b32.xlu0 %v6107_v28, %s4222_s20 }
 0x690   :  { %v3086_v18 = vpop.permute.xlu2 %3085  ;;  %3136 = vrot.lane.b32.xlu0 %v5889_v54, %s4222_s20 }
 0x698   :  { %v3098_v34 = vpop.permute.xlu2 %3097 }
 0x69d   :  { %v3070_v6 = vpop.permute.xlu1 %3069 }
 0x6a0   :  { %v3110_v53 = vpop.permute.xlu2 %3109 }
 0x6a2   :  { %v3066_v61 = vpop.permute.xlu0 %3065 }
 0x6a3   :  { %v3120_v51 = vsel %vm331_vm4, %v6018_v47, %v3066_v61 }
 0x6a4   :  { %v3121_v30 = vsel %vm333_vm5, %v3120_v51, %v3070_v6 }
 0x6a5   :  { %v3082_v13 = vpop.permute.xlu1 %3081  ;;  %v3122_v45 = vsel %vm335_vm6, %v3121_v30, %v3074_v12 }
 0x6a8   :  { %v3563_v24 = vpop.permute.xlu2 %3562 }
 0x6a9   :  { %v3640_v44 = vrot.slane %v3563_v24, 4 }
 0x6aa   :  { %v3078_v25 = vpop.permute.xlu0 %3077 }
 0x6ab   :  { %v3123_v10 = vsel %vm337_vm7, %v3122_v45, %v3078_v25 }
 0x6ac   :  { %v3124_v52 = vsel %vm339_vm8, %v3123_v10, %v3082_v13 }
 0x6ad   :  { %v3094_v5 = vpop.permute.xlu1 %3093  ;;  %v3125_v8 = vsel %vm341_vm9, %v3124_v52, %v3086_v18 }
 0x6ae   :  { %v3127_v54 = vsel %vm331_vm4, %v6031_v9, %v3094_v5 }
 0x6af   :  { %v3128_v21 = vsel %vm333_vm5, %v3127_v54, %v3098_v34 }
 0x6b0   :  { %v6135_v33 = vpop.permute.xlu2 %3146 }
 0x6b2   :  { %v3090_v47 = vpop.permute.xlu0 %3089 }
 0x6b3   :  { %v6138_v43 = vsel %vm343_vm10, %v3125_v8, %v3090_v47 }
 0x6b5   :  { %v3106_v59 = vpop.permute.xlu1 %3105 }
 0x6b8   :  { %v3555_v46 = vpop.permute.xlu2 %3554 }
 0x6b9   :  { %v3642_v17 = vrot.slane %v3555_v46, 4  ;;  %v3641_v37 = vsel %vm163_vm3, %v3640_v44, %v3555_v46 }
 0x6ba   :  { %v3102_v41 = vpop.permute.xlu0 %3101  ;;  %v6169_v15 = vperm.slane %v3641_v37, %v4314_v38 }
 0x6bb   :  { %v6141_v58 = vsel %vm163_vm3, %v3563_v24, %v3642_v17  ;;  %v3129_v0 = vsel %vm335_vm6, %v3128_v21, %v3102_v41  ;;  %v3370_v24 = vrot.slane %v6055_v26, 4  ;;  %v3426_v41 = vrot.slane %v6060_v32, 4 }
 0x6bc   :  { %v3130_v48 = vsel %vm337_vm7, %v3129_v0, %v3106_v59  ;;  %v3652_v22 = vrot.slane %v6169_v15, 4  ;;  %v3358_v59 = vrot.slane %v6091_v35, 4 }
 0x6bd   :  { %v3561_v40 = vpop.permute.xlu1 %3560  ;;  %v3131_v63 = vsel %vm339_vm8, %v3130_v48, %v3110_v53  ;;  %v3371_v8 = vsel %vm163_vm3, %v3370_v24, %v6075_v62 }
 0x6be   :  { %v3584_v25 = vrot.slane %v3561_v40, 4  ;;  %v6210_v0 = vperm.slane %v3371_v8, %v4314_v38  ;;  %v3359_v44 = vsel %vm163_vm3, %v3358_v59, %v6107_v28 }
 0x6c0   :  { %v6146_v4 = vpop.permute.xlu2 %3784 }
 0x6c1   :  { %v3818_v7 = vrot.slane %v6146_v4, 4 }
 0x6c2   :  { %v3114_v56 = vpop.permute.xlu0 %3113 }
 0x6c3   :  { %v6149_v9 = vsel %vm341_vm9, %v3131_v63, %v3114_v56 }
 0x6c5   :  { %v3795_v39 = vpop.permute.xlu1 %3794 }
 0x6c6   :  { %v3872_v63 = vrot.slane %v3795_v39, 4 }
 0x6c8   :  { %v6151_v29 = vpop.permute.xlu2 %3790 }
 0x6c9   :  { %v3860_v24 = vrot.slane %v6151_v29, 4 }
 0x6ca   :  { %v6154_v49 = vpop.permute.xlu0 %3792 }
 0x6cb   :  { %v6158_v57 = vsel %vm163_vm3, %v6154_v49, %v3818_v7 }
 0x6cd   :  { %v3553_v36 = vpop.permute.xlu1 %3552 }
 0x6ce   :  { %v3586_v50 = vrot.slane %v3553_v36, 4  ;;  %v3585_v5 = vsel %vm163_vm3, %v3584_v25, %v3553_v36 }
 0x6cf   :  { %v3591_v21 = vperm.slane %v3585_v5, %v4314_v38 }
 0x6d0   :  { %v6161_v42 = vsel %vm163_vm3, %v3561_v40, %v3586_v50  ;;  %v6163_v1 = vpop.permute.xlu2 %3142  ;;  %v3170_v40 = vrot.slane %v6135_v33, 4 }
 0x6d1   :  { %v3596_v36 = vrot.slane %v3591_v21, 4  ;;  %v3158_v25 = vrot.slane %v6163_v1, 4 }
 0x6d2   :  { %v6166_v19 = vpop.permute.xlu0 %3148 }
 0x6d5   :  { %v3559_v20 = vpop.permute.xlu1 %3558 }
 0x6d6   :  { %v3628_v16 = vrot.slane %v3559_v20, 4 }
 0x6d8   :  { %v3551_v2 = vpop.permute.xlu2 %3550 }
 0x6d9   :  { %v3629_v27 = vsel %vm163_vm3, %v3628_v16, %v3551_v2  ;;  %v3630_v14 = vrot.slane %v3551_v2, 4  ;;  %v3816_v16 = vrot.slane %v6154_v49, 4 }
 0x6da   :  { %v6174_v23 = vperm.slane %v3629_v27, %v4314_v38  ;;  %v6179_v18 = vpop.permute.xlu0 %3556  ;;  %v3427_v27 = vsel %vm163_vm3, %v3426_v41, %v6079_v55 }
 0x6db   :  { %v6177_v12 = vsel %vm163_vm3, %v3559_v20, %v3630_v14  ;;  %v3572_v46 = vrot.slane %v6179_v18, 4  ;;  %v3414_v14 = vrot.slane %v6085_v11, 4  ;;  %v6256_v8 = vperm.slane %v3427_v27, %v4314_v38 }
 0x6dc   :  { %v3653_v34 = vsel %vm163_vm3, %v3652_v22, %v6174_v23  ;;  %v3639_v27 = vperm.slane %v6177_v12, %v4314_v38 }
 0x6dd   :  { %v6183_v6 = vpop.permute.xlu1 %3788  ;;  %v6186_v53 = vperm.slane %v3653_v34, %v4347_v60  ;;  %v6236_v34 = vperm.slane %v3359_v44, %v4314_v38 }
 0x6df   :  { %v3676_v61 = vrot.slane %v6186_v53, 4 }
 0x6e1   :  { %v3677_v51 = vsel %vm163_vm3, 0.0, %v3676_v61  ;;  %v6238_v61 = vpop.permute.xlu2 %3134 }
 0x6e2   :  { %3713 = vrot.lane.b32.xlu2 %v3677_v51, %s4229_s25  ;;  %v3787_v30 = vpop.permute.xlu0 %3786 }
 0x6e3   :  { %v3874_v13 = vrot.slane %v3787_v30, 4  ;;  %v3873_v37 = vsel %vm163_vm3, %v3872_v63, %v3787_v30 }
 0x6e4   :  { %v6241_v49 = vperm.slane %v3873_v37, %v4314_v38 }
 0x6e5   :  { %v6191_v45 = vpop.permute.xlu1 %3140  ;;  %v6195_v10 = vsel %vm163_vm3, %v3795_v39, %v3874_v13 }
 0x6e6   :  { %v3228_v52 = vrot.slane %v6191_v45, 4 }
 0x6e8   :  { %v6201_v54 = vsel %vm163_vm3, %v6166_v19, %v3228_v52 }
 0x6ea   :  { %v3139_v47 = vpop.permute.xlu0 %3138 }
 0x6eb   :  { %v3172_v17 = vrot.slane %v3139_v47, 4  ;;  %v3171_v20 = vsel %vm163_vm3, %v3170_v40, %v3139_v47  ;;  %v3817_v47 = vsel %vm163_vm3, %v3816_v16, %v6146_v4  ;;  %v3415_v40 = vsel %vm163_vm3, %v3414_v14, %v6111_v3 }
 0x6ec   :  { %v6244_v51 = vperm.slane %v3171_v20, %v4314_v38  ;;  %v3884_v4 = vrot.slane %v6241_v49, 4  ;;  %v6290_v20 = vperm.slane %v3415_v40, %v4314_v38  ;;  %v3804_v16 = vrot.slane %v6183_v6, 4 }
 0x6ed   :  { %v6212_v48 = vpop.permute.xlu1 %3548  ;;  %v6217_v56 = vsel %vm163_vm3, %v6135_v33, %v3172_v17  ;;  %v3382_v33 = vrot.slane %v6210_v0, 4 }
 0x6ee   :  { %v3573_v7 = vsel %vm163_vm3, %v3572_v46, %v6212_v48  ;;  %v3654_v46 = vrot.slane %v6174_v23, 4  ;;  %v3182_v63 = vrot.slane %v6244_v51, 4 }
 0x6ef   :  { %v3579_v50 = vperm.slane %v3573_v7, %v4314_v38  ;;  %v3383_v7 = vsel %vm163_vm3, %v3382_v33, %v6236_v34  ;;  %v3651_v33 = vperm.slane %v6141_v58, %v4314_v38  ;;  %v3574_v58 = vrot.slane %v6212_v48, 4 }
 0x6f1   :  { %v3597_v39 = vsel %vm163_vm3, %v3596_v36, %v3579_v50  ;;  %v3598_v2 = vrot.slane %v3579_v50, 4  ;;  %v3438_v36 = vrot.slane %v6256_v8, 4  ;;  %v6282_v50 = vperm.slane %v3817_v47, %v4314_v38 }
 0x6f2   :  { %v6233_v22 = vperm.slane %v3597_v39, %v4347_v60  ;;  %v6246_v30 = vpop.permute.xlu0 %3144  ;;  %v3655_v39 = vsel %vm163_vm3, %v6169_v15, %v3654_v46 }
 0x6f3   :  { %v3599_v13 = vsel %vm163_vm3, %v3591_v21, %v3598_v2  ;;  %v3159_v21 = vsel %vm163_vm3, %v3158_v25, %v6238_v61  ;;  %v3226_v25 = vrot.slane %v6166_v19, 4  ;;  %v3828_v46 = vrot.slane %v6282_v50, 4 }
 0x6f4   :  { %v6252_v52 = vperm.slane %v3599_v13, %v4347_v60  ;;  %v3620_v5 = vrot.slane %v6233_v22, 4  ;;  %v6285_v44 = vperm.slane %v3159_v21, %v4314_v38  ;;  %v6303_v13 = vperm.slane %v3383_v7, %v4347_v60 }
 0x6f5   :  { %v6260_v59 = vpop.permute.xlu1 %3782  ;;  %v3663_v21 = vperm.slane %v3655_v39, %v4347_v60 }
 0x6f6   :  { %v3861_v17 = vsel %vm163_vm3, %v3860_v24, %v6260_v59  ;;  %3689 = vrot.lane.b32.xlu0 %v6252_v52, %s4225_s21  ;;  %v3621_v41 = vsel %vm163_vm3, 0.0, %v3620_v5  ;;  %v3183_v24 = vsel %vm163_vm3, %v3182_v63, %v6285_v44  ;;  %v3666_v63 = vrot.slane %v3639_v27, 4 }
 0x6f7   :  { %v6275_v23 = vperm.slane %v3861_v17, %v4314_v38  ;;  %3685 = vrot.lane.b32.xlu1 %v3621_v41, %s4229_s25  ;;  %v3227_v17 = vsel %vm163_vm3, %v3226_v25, %v6191_v45  ;;  %v6322_v40 = vperm.slane %v3183_v24, %v4347_v60  ;;  %v3214_v24 = vrot.slane %v6246_v30, 4 }
 0x6f8   :  { %v6333_v45 = vperm.slane %v3227_v17, %v4314_v38 }
 0x6f9   :  { %v3885_v37 = vsel %vm163_vm3, %v3884_v4, %v6275_v23  ;;  %v3664_v4 = vrot.slane %v3651_v33, 4 }
 0x6fa   :  { %v6296_v2 = vperm.slane %v3885_v37, %v4347_v60  ;;  %v3781_v14 = vpop.permute.xlu0 %3780  ;;  %v3575_v37 = vsel %vm163_vm3, %v6179_v18, %v3574_v58 }
 0x6fb   :  { %v3805_v15 = vsel %vm163_vm3, %v3804_v16, %v3781_v14  ;;  %v3806_v5 = vrot.slane %v3781_v14, 4  ;;  %v3406_v16 = vrot.slane %v6303_v13, 4  ;;  %v6339_v39 = vsel %vm163_vm3, %v3664_v4, %v3639_v27 }
 0x6fc   :  { %v3908_v47 = vrot.slane %v6296_v2, 4  ;;  %v3811_v12 = vperm.slane %v3805_v15, %v4314_v38  ;;  %v3595_v14 = vperm.slane %v6161_v42, %v4314_v38  ;;  %v3583_v18 = vperm.slane %v3575_v37, %v4314_v38 }
 0x6fd   :  { %v6318_v41 = vsel %vm163_vm3, %v6183_v6, %v3806_v5  ;;  %v3439_v6 = vsel %vm163_vm3, %v3438_v36, %v6290_v20  ;;  %v3206_v36 = vrot.slane %v6322_v40, 4  ;;  %v6349_v5 = vsel %vm163_vm3, %v3651_v33, %v3666_v63 }
 0x6fe   :  { %v3909_v19 = vsel %vm163_vm3, 0.0, %v3908_v47  ;;  %v3829_v48 = vsel %vm163_vm3, %v3828_v46, %v3811_v12  ;;  %v3238_v42 = vrot.slane %v6333_v45, 4  ;;  %v6359_v58 = vperm.slane %v3439_v6, %v4347_v60 }
 0x6ff   :  { %3717 = vrot.lane.b32.xlu1 %v3663_v21, %s4225_s21  ;;  %3945 = vrot.lane.b32.xlu0 %v3909_v19, %s4229_s25  ;;  %v6328_v7 = vperm.slane %v3829_v48, %v4347_v60  ;;  %v3608_v17 = vrot.slane %v3595_v14, 4  ;;  %v3160_v33 = vrot.slane %v6238_v61, 4  ;;  %v3407_v19 = vsel %vm163_vm3, 0.0, %v3406_v16 }
 0x700   :  { %v3207_v4 = vsel %vm163_vm3, 0.0, %v3206_v36  ;;  %v3678_v16 = vrot.slane %v3663_v21, 4  ;;  %v3622_v21 = vrot.slane %v6252_v52, 4 }
 0x701   :  { %v3852_v25 = vrot.slane %v6328_v7, 4  ;;  %v6371_v37 = vsel %vm163_vm3, %v3608_v17, %v3583_v18  ;;  %v3161_v6 = vsel %vm163_vm3, %v6163_v1, %v3160_v33  ;;  %v3184_v1 = vrot.slane %v6285_v44, 4 }
 0x702   :  { %v6346_v15 = vpop.permute.xlu0 %3136  ;;  %v3169_v36 = vperm.slane %v3161_v6, %v4314_v38  ;;  %v3610_v6 = vrot.slane %v3583_v18, 4  ;;  %v3623_v44 = vsel %vm163_vm3, 0.0, %v3622_v21  ;;  %v3237_v21 = vperm.slane %v6201_v54, %v4314_v38 }
 0x703   :  { %v3215_v27 = vsel %vm163_vm3, %v3214_v24, %v6346_v15  ;;  %v3853_v47 = vsel %vm163_vm3, 0.0, %v3852_v25  ;;  %v3462_v24 = vrot.slane %v6359_v58, 4 }
 0x704   :  { %v3221_v46 = vperm.slane %v3215_v27, %v4314_v38  ;;  %3917 = vrot.lane.b32.xlu2 %v3853_v47, %s4229_s25  ;;  %v3181_v27 = vperm.slane %v6217_v56, %v4314_v38  ;;  %v3830_v47 = vrot.slane %v3811_v12, 4  ;;  %v3196_v33 = vrot.slane %v3169_v36, 4 }
 0x705   :  { %v3463_v17 = vsel %vm163_vm3, 0.0, %v3462_v24  ;;  %v3185_v56 = vsel %vm163_vm3, %v6244_v51, %v3184_v1 }
 0x706   :  { %v3239_v63 = vsel %vm163_vm3, %v3238_v42, %v3221_v46  ;;  %v3679_v42 = vsel %vm163_vm3, 0.0, %v3678_v16  ;;  %v3831_v12 = vsel %vm163_vm3, %v6282_v50, %v3830_v47  ;;  %v3440_v50 = vrot.slane %v6290_v20, 4 }
 0x707   :  { %3471 = vrot.lane.b32.xlu0 %v3407_v19, %s4229_s25  ;;  %3271 = vrot.lane.b32.xlu1 %v3207_v4, %s4229_s25  ;;  %v6368_v48 = vperm.slane %v3239_v63, %v4347_v60  ;;  %v3194_v19 = vrot.slane %v3181_v27, 4  ;;  %v3862_v4 = vrot.slane %v6260_v59, 4  ;;  %v6394_v63 = vsel %vm163_vm3, %v3181_v27, %v3196_v33 }
 0x708   :  { %v3193_v59 = vperm.slane %v3185_v56, %v4347_v60  ;;  %v3839_v51 = vperm.slane %v3831_v12, %v4347_v60  ;;  %v3240_v24 = vrot.slane %v3221_v46, 4  ;;  %v3441_v20 = vsel %vm163_vm3, %v6256_v8, %v3440_v50 }
 0x709   :  { %v3262_v61 = vrot.slane %v6368_v48, 4  ;;  %v3863_v52 = vsel %vm163_vm3, %v6151_v29, %v3862_v4  ;;  %v6404_v16 = vsel %vm163_vm3, %v3194_v19, %v3169_v36  ;;  %v3827_v36 = vperm.slane %v6158_v57, %v4314_v38 }
 0x70a   :  { %v3871_v29 = vperm.slane %v3863_v52, %v4314_v38  ;;  %v3241_v46 = vsel %vm163_vm3, %v6333_v45, %v3240_v24  ;;  %v3384_v47 = vrot.slane %v6236_v34, 4  ;;  %v3449_v57 = vperm.slane %v3441_v20, %v4347_v60 }
 0x70b   :  { %v3263_v25 = vsel %vm163_vm3, 0.0, %v3262_v61  ;;  %v3886_v61 = vrot.slane %v6275_v23, 4  ;;  %v3883_v23 = vperm.slane %v6195_v10, %v4314_v38  ;;  %v3815_v10 = vperm.slane %v6318_v41, %v4314_v38 }
 0x70c   :  { %3299 = vrot.lane.b32.xlu2 %v3263_v25, %s4229_s25  ;;  %v6415_v25 = vsel %vm163_vm3, %v3595_v14, %v3610_v6  ;;  %v3216_v14 = vrot.slane %v6346_v15, 4  ;;  %v3249_v8 = vperm.slane %v3241_v46, %v4347_v60  ;;  %v3385_v15 = vsel %vm163_vm3, %v6210_v0, %v3384_v47 }
 0x70d   :  { %v3887_v18 = vsel %vm163_vm3, %v6241_v49, %v3886_v61  ;;  %v3896_v49 = vrot.slane %v3883_v23, 4  ;;  %v3842_v33 = vrot.slane %v3815_v10, 4  ;;  %v3854_v19 = vrot.slane %v3839_v51, 4 }
 0x70e   :  { %v3895_v27 = vperm.slane %v3887_v18, %v4347_v60  ;;  %v3217_v34 = vsel %vm163_vm3, %v6246_v30, %v3216_v14  ;;  %v3393_v56 = vperm.slane %v3385_v15, %v4347_v60  ;;  %v3250_v12 = vrot.slane %v3237_v21, 4 }
 0x70f   :  { %3721 = vrot.lane.b32.xlu0 %v3679_v42, %s4230_s26  ;;  %3499 = vrot.lane.b32.xlu1 %v3463_v17, %s4229_s25  ;;  %v3898_v42 = vrot.slane %v3871_v29, 4  ;;  %v3840_v17 = vrot.slane %v3827_v36, 4  ;;  %v3897_v45 = vsel %vm163_vm3, %v3896_v49, %v3871_v29  ;;  %v3225_v4 = vperm.slane %v3217_v34, %v4314_v38 }
 0x710   :  { %v3615_v30 = vperm.slane %v6371_v37, %v4347_v60  ;;  %v6450_v0 = vsel %vm163_vm3, %v3827_v36, %v3842_v33  ;;  %v3855_v6 = vsel %vm163_vm3, 0.0, %v3854_v19  ;;  %v3264_v52 = vrot.slane %v3249_v8, 4 }
 0x711   :  { %v3841_v41 = vsel %vm163_vm3, %v3840_v17, %v3815_v10  ;;  %v6440_v1 = vsel %vm163_vm3, %v3883_v23, %v3898_v42  ;;  %v3251_v54 = vsel %vm163_vm3, %v3250_v12, %v3225_v4  ;;  %v3252_v61 = vrot.slane %v3225_v4, 4 }
 0x712   :  { %v3265_v24 = vsel %vm163_vm3, 0.0, %v3264_v52  ;;  %v3208_v23 = vrot.slane %v3193_v59, 4  ;;  %v3408_v29 = vrot.slane %v3393_v56, 4  ;;  %v3624_v18 = vrot.slane %v3615_v30, 4 }
 0x713   :  { %v6460_v37 = vsel %vm163_vm3, %v3237_v21, %v3252_v61  ;;  %v3372_v36 = vrot.slane %v6075_v62, 4  ;;  %v3428_v49 = vrot.slane %v6079_v55, 4  ;;  %v3416_v55 = vrot.slane %v6111_v3, 4 }
 0x714   :  { %3693 = vrot.lane.b32.xlu2 %v3623_v44, %s4230_s26  ;;  %v3910_v44 = vrot.slane %v3895_v27, 4  ;;  %v3409_v20 = vsel %vm163_vm3, 0.0, %v3408_v29  ;;  %v3625_v46 = vsel %vm163_vm3, 0.0, %v3624_v18  ;;  %v3847_v34 = vperm.slane %v3841_v41, %v4347_v60 }
 0x715   :  { %v3373_v10 = vsel %vm163_vm3, %v6055_v26, %v3372_v36  ;;  %v3903_v26 = vperm.slane %v3897_v45, %v4347_v60  ;;  %v3417_v15 = vsel %vm163_vm3, %v6085_v11, %v3416_v55  ;;  %v3257_v11 = vperm.slane %v3251_v54, %v4347_v60 }
 0x716   :  { %v3911_v50 = vsel %vm163_vm3, 0.0, %v3910_v44  ;;  %v6477_v62 = vperm.slane %v3373_v10, %v4314_v38  ;;  %v6511_v33 = vperm.slane %v3417_v15, %v4314_v38  ;;  %v3675_v19 = vperm.slane %v6349_v5, %v4347_v60 }
 0x717   :  { %3275 = vrot.lane.b32.xlu0 %v3193_v59, %s4225_s21  ;;  %3921 = vrot.lane.b32.xlu1 %v3839_v51, %s4225_s21  ;;  %v3671_v51 = vperm.slane %v6339_v39, %v4347_v60  ;;  %v3209_v39 = vsel %vm163_vm3, 0.0, %v3208_v23  ;;  %v3464_v59 = vrot.slane %v3449_v57, 4  ;;  %v3856_v4 = vrot.slane %v3847_v34, 4 }
 0x718   :  { %v3912_v5 = vrot.slane %v3903_v26, 4  ;;  %v3266_v54 = vrot.slane %v3257_v11, 4  ;;  %v3851_v29 = vperm.slane %v6450_v0, %v4347_v60  ;;  %v3907_v0 = vperm.slane %v6440_v1, %v4347_v60 }
 0x719   :  { %v3680_v47 = vrot.slane %v3671_v51, 4  ;;  %v3465_v14 = vsel %vm163_vm3, 0.0, %v3464_v59  ;;  %v3857_v12 = vsel %vm163_vm3, 0.0, %v3856_v4 }
 0x71a   :  { %v3913_v44 = vsel %vm163_vm3, 0.0, %v3912_v5 }
 0x71b   :  { %v3681_v17 = vsel %vm163_vm3, 0.0, %v3680_v47  ;;  %v3261_v47 = vperm.slane %v6460_v37, %v4347_v60 }
 0x71c   :  { %3949 = vrot.lane.b32.xlu2 %v3895_v27, %s4225_s21  ;;  %v3360_v27 = vrot.slane %v6107_v28, 4 }
 0x71e   :  { %v3361_v42 = vsel %vm163_vm3, %v6091_v35, %v3360_v27 }
 0x71f   :  { %3503 = vrot.lane.b32.xlu0 %v3449_v57, %s4225_s21  ;;  %3303 = vrot.lane.b32.xlu1 %v3249_v8, %s4225_s21  ;;  %v6486_v28 = vperm.slane %v3361_v42, %v4314_v38  ;;  %v3394_v57 = vrot.slane %v6477_v62, 4  ;;  %v3429_v8 = vsel %vm163_vm3, %v6060_v32, %v3428_v49  ;;  %v3201_v32 = vperm.slane %v6404_v16, %v4347_v60 }
 0x720   :  { %v6496_v35 = vperm.slane %v3429_v8, %v4314_v38  ;;  %v3619_v38 = vperm.slane %v6415_v25, %v4347_v60  ;;  %v3267_v25 = vsel %vm163_vm3, 0.0, %v3266_v54  ;;  %v3452_v8 = vrot.slane %v6511_v33, 4 }
 0x721   :  { %v3395_v45 = vsel %vm163_vm3, %v3394_v57, %v6486_v28  ;;  %v3396_v49 = vrot.slane %v6486_v28, 4  ;;  %v3858_v57 = vrot.slane %v3851_v29, 4  ;;  %v3205_v28 = vperm.slane %v6394_v63, %v4347_v60 }
 0x722   :  { %v3401_v21 = vperm.slane %v3395_v45, %v4347_v60  ;;  %v3450_v3 = vrot.slane %v6496_v35, 4  ;;  %v3453_v63 = vsel %vm163_vm3, %v6496_v35, %v3452_v8 }
 0x723   :  { %v3397_v37 = vsel %vm163_vm3, %v6477_v62, %v3396_v49  ;;  %v3859_v45 = vsel %vm163_vm3, 0.0, %v3858_v57 }
 0x724   :  { %3475 = vrot.lane.b32.xlu2 %v3393_v56, %s4225_s21  ;;  %v3451_v41 = vsel %vm163_vm3, %v3450_v3, %v6511_v33  ;;  %v3210_v56 = vrot.slane %v3201_v32, 4  ;;  %v3405_v55 = vperm.slane %v3397_v37, %v4347_v60  ;;  %v3268_v3 = vrot.slane %v3261_v47, 4 }
 0x725   :  { %v3457_v16 = vperm.slane %v3451_v41, %v4347_v60  ;;  %v3461_v33 = vperm.slane %v3453_v63, %v4347_v60 }
 0x726   :  { %v3269_v41 = vsel %vm163_vm3, 0.0, %v3268_v3 }
 0x727   :  { %3925 = vrot.lane.b32.xlu0 %v3855_v6, %s4230_s26  ;;  %3697 = vrot.lane.b32.xlu1 %v3615_v30, %s4227_s23  ;;  %v3211_v30 = vsel %vm163_vm3, 0.0, %v3210_v56  ;;  %v3466_v61 = vrot.slane %v3457_v16, 4 }
 0x729   :  { %v3467_v52 = vsel %vm163_vm3, 0.0, %v3466_v61  ;;  %v3468_v61 = vrot.slane %v3461_v33, 4 }
 0x72c   :  { %3725 = vrot.lane.b32.xlu2 %v3671_v51, %s4227_s23 }
 0x72f   :  { %3953 = vrot.lane.b32.xlu1 %v3911_v50, %s4230_s26  ;;  %3307 = vrot.lane.b32.xlu0 %v3265_v24, %s4230_s26  ;;  %v3410_v50 = vrot.slane %v3401_v21, 4  ;;  %v3626_v24 = vrot.slane %v3619_v38, 4 }
 0x731   :  { %v3411_v23 = vsel %vm163_vm3, 0.0, %v3410_v50  ;;  %v3627_v18 = vsel %vm163_vm3, 0.0, %v3626_v24 }
 0x734   :  { %3279 = vrot.lane.b32.xlu2 %v3209_v39, %s4230_s26 }
 0x737   :  { %3479 = vrot.lane.b32.xlu1 %v3409_v20, %s4230_s26  ;;  %3701 = vrot.lane.b32.xlu0 %v3625_v46, %s4228_s24  ;;  %v3682_v20 = vrot.slane %v3675_v19, 4 }
 0x739   :  { %v3683_v59 = vsel %vm163_vm3, 0.0, %v3682_v20 }
 0x73c   :  { %3507 = vrot.lane.b32.xlu2 %v3465_v14, %s4230_s26  ;;  %v3714_v6 = vpop.permute.xlu2 %3713 }
 0x73d   :  { %v3747_v14 = vsel %vm331_vm4, %v6186_v53, %v3714_v6 }
 0x73f   :  { %3729 = vrot.lane.b32.xlu1 %v3681_v17, %s4228_s24  ;;  %3957 = vrot.lane.b32.xlu0 %v3903_v26, %s4227_s23 }
 0x744   :  { %3929 = vrot.lane.b32.xlu2 %v3847_v34, %s4227_s23 }
 0x747   :  { %3283 = vrot.lane.b32.xlu1 %v3201_v32, %s4227_s23  ;;  %3483 = vrot.lane.b32.xlu0 %v3401_v21, %s4227_s23  ;;  %v3914_v21 = vrot.slane %v3907_v0, 4 }
 0x74c   :  { %3311 = vrot.lane.b32.xlu2 %v3257_v11, %s4227_s23 }
 0x74f   :  { %3511 = vrot.lane.b32.xlu1 %v3457_v16, %s4227_s23  ;;  %3733 = vrot.lane.b32.xlu0 %v3675_v19, %s4226_s22  ;;  %v3212_v19 = vrot.slane %v3205_v28, 4 }
 0x754   :  { %3705 = vrot.lane.b32.xlu2 %v3619_v38, %s4226_s22  ;;  %v3412_v38 = vrot.slane %v3405_v55, 4 }
 0x757   :  { %3933 = vrot.lane.b32.xlu1 %v3857_v12, %s4228_s24  ;;  %3287 = vrot.lane.b32.xlu0 %v3211_v30, %s4228_s24  ;;  %v3062_v12 = vrot.slane %v6065_v31, 4  ;;  %v3213_v30 = vsel %vm163_vm3, 0.0, %v3212_v19 }
 0x759   :  { %v3063_v6 = vsel %vm163_vm3, 0.0, %v3062_v12 }
 0x75c   :  { %3961 = vrot.lane.b32.xlu2 %v3913_v44, %s4228_s24 }
 0x75e   :  { %v6533_v51 = vpop.permute.xlu2 %3917 }
 0x75f   :  { %3315 = vrot.lane.b32.xlu1 %v3267_v25, %s4228_s24  ;;  %3515 = vrot.lane.b32.xlu0 %v3467_v52, %s4228_s24  ;;  %v3972_v31 = vsel %vm331_vm4, %v6328_v7, %v6533_v51 }
 0x764   :  { %3487 = vrot.lane.b32.xlu2 %v3411_v23, %s4228_s24  ;;  %v3469_v23 = vsel %vm163_vm3, 0.0, %v3468_v61 }
 0x766   :  { %v6542_v36 = vpop.permute.xlu2 %3299 }
 0x767   :  { %3709 = vrot.lane.b32.xlu1 %v3627_v18, %s4231_s27  ;;  %3937 = vrot.lane.b32.xlu0 %v3851_v29, %s4226_s22  ;;  %v3333_v7 = vsel %vm331_vm4, %v6368_v48, %v6542_v36 }
 0x768   :  { %v3690_v39 = vpop.permute.xlu0 %3689 }
 0x769   :  { %v3686_v46 = vpop.permute.xlu1 %3685 }
 0x76a   :  { %v3740_v10 = vsel %vm331_vm4, %v6233_v22, %v3686_v46 }
 0x76b   :  { %v3741_v27 = vsel %vm333_vm5, %v3740_v10, %v3690_v39 }
 0x76c   :  { %3737 = vrot.lane.b32.xlu2 %v3683_v59, %s4231_s27 }
 0x76e   :  { %v3694_v42 = vpop.permute.xlu2 %3693 }
 0x76f   :  { %3965 = vrot.lane.b32.xlu1 %v3907_v0, %s4226_s22  ;;  %3319 = vrot.lane.b32.xlu0 %v3261_v47, %s4226_s22  ;;  %v6559_v22 = vsel %vm335_vm6, %v3741_v27, %v3694_v42 }
 0x771   :  { %v3718_v26 = vpop.permute.xlu1 %3717  ;;  %v3946_v17 = vpop.permute.xlu0 %3945 }
 0x772   :  { %v3748_v1 = vsel %vm333_vm5, %v3747_v14, %v3718_v26  ;;  %v3979_v53 = vsel %vm331_vm4, %v6296_v2, %v3946_v17  ;;  %v3915_v2 = vsel %vm163_vm3, 0.0, %v3914_v21 }
 0x774   :  { %3291 = vrot.lane.b32.xlu2 %v3205_v28, %s4226_s22 }
 0x776   :  { %v3950_v34 = vpop.permute.xlu2 %3949 }
 0x777   :  { %3491 = vrot.lane.b32.xlu1 %v3405_v55, %s4226_s22  ;;  %3941 = vrot.lane.b32.xlu0 %v3859_v45, %s4231_s27  ;;  %v3980_v62 = vsel %vm333_vm5, %v3979_v53, %v3950_v34 }
 0x779   :  { %v3272_v15 = vpop.permute.xlu1 %3271  ;;  %v3472_v32 = vpop.permute.xlu0 %3471 }
 0x77a   :  { %v3526_v11 = vsel %vm331_vm4, %v6303_v13, %v3472_v32  ;;  %v3413_v13 = vsel %vm163_vm3, 0.0, %v3412_v38  ;;  %v3326_v44 = vsel %vm331_vm4, %v6322_v40, %v3272_v15 }
 0x77c   :  { %3519 = vrot.lane.b32.xlu2 %v3461_v33, %s4226_s22 }
 0x77e   :  { %v3476_v16 = vpop.permute.xlu2 %3475 }
 0x77f   :  { %3969 = vrot.lane.b32.xlu1 %v3915_v2, %s4231_s27  ;;  %3323 = vrot.lane.b32.xlu0 %v3269_v41, %s4231_s27  ;;  %v3527_v35 = vsel %vm333_vm5, %v3526_v11, %v3476_v16 }
 0x781   :  { %v3500_v4 = vpop.permute.xlu1 %3499  ;;  %v3722_v56 = vpop.permute.xlu0 %3721 }
 0x782   :  { %v3749_v60 = vsel %vm335_vm6, %v3748_v1, %v3722_v56  ;;  %v3533_v40 = vsel %vm331_vm4, %v6359_v58, %v3500_v4 }
 0x784   :  { %3295 = vrot.lane.b32.xlu2 %v3213_v30, %s4231_s27 }
 0x786   :  { %v3726_v5 = vpop.permute.xlu2 %3725 }
 0x787   :  { %3495 = vrot.lane.b32.xlu1 %v3413_v13, %s4231_s27  ;;  %3117 = vrot.lane.b32.xlu0 %v3063_v6, %s4231_s27  ;;  %v6597_v54 = vsel %vm337_vm7, %v3749_v60, %v3726_v5 }
 0x789   :  { %v3922_v25 = vpop.permute.xlu1 %3921  ;;  %v3276_v52 = vpop.permute.xlu0 %3275 }
 0x78a   :  { %v3973_v50 = vsel %vm333_vm5, %v3972_v31, %v3922_v25  ;;  %v3327_v24 = vsel %vm333_vm5, %v3326_v44, %v3276_v52  ;;  %v3988_v25 = vld [vmem:[%s6687_s1] sm:$0xff] }
 0x78b   :  { %4136 = vmatmul.msk.f32.vlgmr.msra.gmra.mxu0 %vm4015_vm12, %v3988_v25  ;;  %4138 = vmatmul.msk.f32.vlgmr.msra.gmra.mxu1 %vm4015_vm12, %v3988_v25 }
 0x78c   :  { %3523 = vrot.lane.b32.xlu2 %v3469_v23, %s4231_s27 }
 0x78e   :  { %v3280_v29 = vpop.permute.xlu2 %3279 }
 0x78f   :  { %v3328_v18 = vsel %vm335_vm6, %v3327_v24, %v3280_v29  ;;  %v4232_v24 = vmov 0  }
 0x790   :  { %4162 = vset.pattern.permute.xlu1 %v4232_v24  ;;  %4163 = vset.pattern.permute.xlu0 %v4232_v24 }
 0x791   :  { %v3304_v51 = vpop.permute.xlu1 %3303  ;;  %v3504_v39 = vpop.permute.xlu0 %3503 }
 0x792   :  { %v3334_v20 = vsel %vm333_vm5, %v3333_v7, %v3304_v51  ;;  %v3534_v46 = vsel %vm333_vm5, %v3533_v40, %v3504_v39 }
 0x796   :  { %v3508_v10 = vpop.permute.xlu2 %3507 }
 0x797   :  { %v3535_v27 = vsel %vm335_vm6, %v3534_v46, %v3508_v10 }
 0x799   :  { %v3698_v59 = vpop.permute.xlu1 %3697  ;;  %v3926_v0 = vpop.permute.xlu0 %3925 }
 0x79a   :  { %v3743_v47 = vsel %vm337_vm7, %v6559_v22, %v3698_v59  ;;  %v3974_v49 = vsel %vm335_vm6, %v3973_v50, %v3926_v0 }
 0x79e   :  { %v3930_v48 = vpop.permute.xlu2 %3929 }
 0x79f   :  { %v3975_v36 = vsel %vm337_vm7, %v3974_v49, %v3930_v48 }
 0x7a1   :  { %v3954_v58 = vpop.permute.xlu1 %3953  ;;  %v3308_v42 = vpop.permute.xlu0 %3307 }
 0x7a2   :  { %v3981_v14 = vsel %vm335_vm6, %v3980_v62, %v3954_v58  ;;  %v3335_v26 = vsel %vm335_vm6, %v3334_v20, %v3308_v42 }
 0x7a6   :  { %v3312_v17 = vpop.permute.xlu2 %3311 }
 0x7a7   :  { %v6624_v1 = vsel %vm337_vm7, %v3335_v26, %v3312_v17 }
 0x7a9   :  { %v3480_v37 = vpop.permute.xlu1 %3479  ;;  %v3702_v57 = vpop.permute.xlu0 %3701 }
 0x7aa   :  { %v6627_v28 = vsel %vm335_vm6, %v3527_v35, %v3480_v37  ;;  %v3744_v22 = vsel %vm339_vm8, %v3743_v47, %v3702_v57 }
 0x7ae   :  { %v3706_v8 = vpop.permute.xlu2 %3705 }
 0x7af   :  { %v6631_v55 = vsel %vm341_vm9, %v3744_v22, %v3706_v8 }
 0x7b1   :  { %v3730_v45 = vpop.permute.xlu1 %3729  ;;  %v3958_v53 = vpop.permute.xlu0 %3957 }
 0x7b2   :  { %v3751_v61 = vsel %vm339_vm8, %v6597_v54, %v3730_v45  ;;  %v4009_v54 = vld [vmem:[%s6688_s2] sm:$0xff] }
 0x7b3   :  { %4012 = vperm.xlu1 %4162, %v4009_v54  }
 0x7b6   :  { %v3962_v34 = vpop.permute.xlu2 %3961 }
 0x7b9   :  { %v3284_v62 = vpop.permute.xlu1 %3283  ;;  %v3484_v63 = vpop.permute.xlu0 %3483 }
 0x7ba   :  { %v3329_v56 = vsel %vm337_vm7, %v3328_v18, %v3284_v62  ;;  %v3529_v17 = vsel %vm337_vm7, %v6627_v28, %v3484_v63  ;;  %v3995_v28 = vld [vmem:[#allocation3 + $0x18] sm:$0xff]  ;;  %v3996_v63 = vld [vmem:[#allocation3 + $0x20] sm:$0xff] }
 0x7be   :  { %v3488_v15 = vpop.permute.xlu2 %3487 }
 0x7bf   :  { %v3530_v37 = vsel %vm339_vm8, %v3529_v17, %v3488_v15  ;;  %v3991_v15 = vld [vmem:[#allocation3 + $0x48] sm:$0xff] }
 0x7c1   :  { %v3512_v32 = vpop.permute.xlu1 %3511  ;;  %v3734_v21 = vpop.permute.xlu0 %3733 }
 0x7c2   :  { %v3752_v31 = vsel %vm341_vm9, %v3751_v61, %v3734_v21  ;;  %v3536_v50 = vsel %vm337_vm7, %v3535_v27, %v3512_v32  ;;  %v3982_v27 = vsel %vm337_vm7, %v3981_v14, %v3958_v53  ;;  %v3992_v21 = vld [vmem:[#allocation3 + $0x80] sm:$0xff] }
 0x7c3   :  { %v3983_v59 = vsel %vm339_vm8, %v3982_v27, %v3962_v34 }
 0x7c6   :  { %v3738_v3 = vpop.permute.xlu2 %3737 }
 0x7c7   :  { %v3753_v52 = vsel %vm343_vm10, %v3752_v31, %v3738_v3 }
 0x7c8   :  { %v3757_v23 = vrot.slane %v3753_v52, 4 }
 0x7c9   :  { %v3934_v33 = vpop.permute.xlu1 %3933  ;;  %v3288_v2 = vpop.permute.xlu0 %3287 }
 0x7ca   :  { %v3330_v60 = vsel %vm339_vm8, %v3329_v56, %v3288_v2  ;;  %v3976_v7 = vsel %vm339_vm8, %v3975_v36, %v3934_v33 }
 0x7ce   :  { %v3292_v41 = vpop.permute.xlu2 %3291 }
 0x7cf   :  { %v3331_v38 = vsel %vm341_vm9, %v3330_v60, %v3292_v41 }
 0x7d1   :  { %v3316_v11 = vpop.permute.xlu1 %3315  ;;  %v3516_v16 = vpop.permute.xlu0 %3515 }
 0x7d2   :  { %v3337_v58 = vsel %vm339_vm8, %v6624_v1, %v3316_v11 }
 0x7d6   :  { %v3520_v35 = vpop.permute.xlu2 %3519 }
 0x7d9   :  { %v3710_v19 = vpop.permute.xlu1 %3709  ;;  %v3938_v4 = vpop.permute.xlu0 %3937 }
 0x7da   :  { %v3977_v51 = vsel %vm341_vm9, %v3976_v7, %v3938_v4  ;;  %v3746_v14 = vsel %vm343_vm10, %v6631_v55, %v3710_v19 }
 0x7db   :  { %v3756_v57 = vrot.slane %v3746_v14, 4 }
 0x7de   :  { %v3296_v12 = vpop.permute.xlu2 %3295 }
 0x7df   :  { %v3332_v30 = vsel %vm343_vm10, %v3331_v38, %v3296_v12 }
 0x7e0   :  { %v3342_v13 = vrot.slane %v3332_v30, 4 }
 0x7e1   :  { %v3966_v6 = vpop.permute.xlu1 %3965  ;;  %v3320_v5 = vpop.permute.xlu0 %3319 }
 0x7e2   :  { %v3346_v44 = vsel %vm572_vm11, %v6138_v43, %v3342_v13  ;;  %v3537_v43 = vsel %vm339_vm8, %v3536_v50, %v3516_v16  ;;  %v3984_v0 = vsel %vm341_vm9, %v3983_v59, %v3966_v6  ;;  %v3338_v42 = vsel %vm341_vm9, %v3337_v58, %v3320_v5 }
 0x7e3   :  { %v3538_v29 = vsel %vm341_vm9, %v3537_v43, %v3520_v35 }
 0x7e6   :  { %v3524_v18 = vpop.permute.xlu2 %3523 }
 0x7e7   :  { %v3539_v40 = vsel %vm343_vm10, %v3538_v29, %v3524_v18 }
 0x7e8   :  { %v3761_v39 = vsel %vm572_vm11, %v3539_v40, %v3757_v23 }
 0x7e9   :  { %v3492_v20 = vpop.permute.xlu1 %3491  ;;  %v3942_v46 = vpop.permute.xlu0 %3941 }
 0x7ea   :  { %v3978_v10 = vsel %vm343_vm10, %v3977_v51, %v3942_v46  ;;  %v3531_v22 = vsel %vm341_vm9, %v3530_v37, %v3492_v20 }
 0x7eb   :  { %3986 = vst [vmem:[#allocation3 + $0x50] sm:$0xf] %v3978_v10 }
 0x7f1   :  { %v3970_v47 = vpop.permute.xlu1 %3969  ;;  %v3324_v49 = vpop.permute.xlu0 %3323 }
 0x7f2   :  { %v3985_v48 = vsel %vm343_vm10, %v3984_v0, %v3970_v47  ;;  %v4007_v36 = vld [vmem:[#allocation3 + $0x50] sm:$0xf]  ;;  %v3339_v26 = vsel %vm343_vm10, %v3338_v42, %v3324_v49 }
 0x7f3   :  { %3987 = vst [vmem:[#allocation3 + $0x90] sm:$0xf] %v3985_v48  ;;  %4139 = vmatpush.msk.msra.mxu2 %vm572_vm11, %v4007_v36  ;;  %v3343_v8 = vrot.slane %v3339_v26, 4 }
 0x7f9   :  { %v3496_v45 = vpop.permute.xlu1 %3495  ;;  %v3118_v53 = vpop.permute.xlu0 %3117 }
 0x7fa   :  { %v3532_v1 = vsel %vm343_vm10, %v3531_v22, %v3496_v45  ;;  %v3133_v34 = vsel %vm343_vm10, %v6149_v9, %v3118_v53  ;;  %v4008_v62 = vld [vmem:[#allocation3 + $0x90] sm:$0xf] }
 0x7fb   :  { %v3760_v55 = vsel %vm572_vm11, %v3532_v1, %v3756_v57  ;;  %v3347_v32 = vsel %vm572_vm11, %v3133_v34, %v3343_v8  ;;  %4141 = vmatpush.msk.msra.mxu3 %vm572_vm11, %v4008_v62 }
 0x7fc   :  { %4083 = vmatpush.msra.mxu2 %v3760_v55 }
 0x7fd   :  { %4103 = vmatpush.msra.mxu3 %v3761_v39 }
 0x7fe   :  { %4084 = vmatpush.msra.mxu2 %v3346_v44 }
 0x7ff   :  { %4104 = vmatpush.msra.mxu3 %v3347_v32 }
 0x800   :  { %4085 = vmatpush.msra.mxu2 %v3995_v28 }
 0x801   :  { %4105 = vmatpush.msra.mxu3 %v3996_v63 }
 0x802   :  { %4086 = vmatpush.msra.mxu2 %v3991_v15 }
 0x803   :  { %4106 = vmatpush.msra.mxu3 %v3992_v21  ;;  %4140 = vmatmul.msk.f32.vlgmr.msra.gmra.mxu2 %vm4015_vm12, %v3988_v25 }
 0x804   :  { %4142 = vmatmul.msk.f32.vlgmr.msra.gmra.mxu3 %vm4015_vm12, %v3988_v25 }
 0x808   :  { %v4048_v3 = vpop.f32.mrf.mxu0  ;;  %v4068_v33 = vpop.f32.mrf.mxu1 }
 0x825   :  { %v4013_v9 = vpop.permute.xlu1 %4012 }
 0x826   :  { %v4049_v2 = vadd.f32 %v4048_v3, %v4013_v9  ;;  %v4069_v41 = vadd.f32 %v4068_v33, %v4013_v9 }
 0x828   :  { %4111 = vst [vmem:[#allocation7] sm:$0xff] %v4049_v2 }
 0x829   :  { %4112 = vst [vmem:[#allocation7 + $0x8] sm:$0xff] %v4069_v41 }
 0x886   :  { %v4088_v11 = vpop.f32.mrf.mxu2 }
 0x887   :  { %v4089_v16 = vadd.f32 %v4088_v11, %v4013_v9  ;;  %v4108_v35 = vpop.f32.mrf.mxu3 }
 0x888   :  { %v4109_v19 = vadd.f32 %v4108_v35, %v4013_v9 }
 0x889   :  { %4114 = vst [vmem:[#allocation7 + $0x10] sm:$0xff] %v4089_v16 }
 0x88a   :  { %4115 = vst [vmem:[#allocation7 + $0x18] sm:$0xff] %v4109_v19 }
 0x88b   :  { %4128 = dma.vmem_to_hbm [thread:$0]  %s4121_s7, 512, %s4123_s5, [#allocation6], %s4234_s8, %s4234_s8, %s4229_s25  }
 0x88c   :  { %4214 = dma.done.wait [#allocation6], 512  }
 0x88d   :  { %4215 = vsyncadd [#allocation6], 4294966784 }
 0x88e   :  { %4133 = vsyncpa [#allocation5], 1 }
 0x88f   :  { %4134 = vsyncpa [#allocation6], 1 }

</bundles_post_ra>
